<compile_context>
chip_gen: v7x
topology: tpu7x:2x2x1
jax: 0.10.0
libtpu: 0.0.40
codegen_flags: <defaults>
</compile_context>

<pallas_src>
import functools

import jax
import jax.numpy as jnp
from jax import lax
from jax.experimental import pallas as pl
from jax.experimental.pallas import tpu as pltpu

HIDDEN = 128
D_DENSE2 = 64
D_OUT = 2
D_OUT_PAD = 128   # lane-dense output slab; real outputs live in [:, :D_OUT]


def _sigmoid(x):
    # sigmoid(x) == 0.5 * (tanh(x/2) + 1): one EUP tanh instead of exp + recip.
    return 0.5 * (jnp.tanh(0.5 * x) + 1.0)


def _lstm_activations(gates, c_prev):
    """gates packed [i, f, o, g]: one sigmoid over 3H lanes, one tanh over H."""
    H = HIDDEN
    sig = _sigmoid(gates[:, : 3 * H])
    g = jnp.tanh(gates[:, 3 * H:])
    i = sig[:, :H]
    f = sig[:, H: 2 * H]
    o = sig[:, 2 * H: 3 * H]
    c = f * c_prev + i * g
    h = o * jnp.tanh(c)
    return h, c


def pos_model_kernel(
    x_ref,                                # (TC*B, Din)  time-major, batch-flattened chunk
    wih1_ref, whh1_ref, b1_ref,           # layer-0 LSTM (transposed, [i,f,o,g]) + fused bias
    w2_ref, b2_ref,                       # layer-1 LSTM: fused [wih2; whh2] (2H, 4H) + bias
    wd1_ref, bd1_ref,                     # dense1 128->128
    wd2_ref, bd2_ref,                     # dense2 128->64
    wp_ref, bp_ref,                       # position 64->128 (zero-padded from 64->2)
    out_ref,                              # (TC*B, 128) lane-dense; cols [0:2] are real
    h1_s, c1_s, h2_s, c2_s,               # (B, H) recurrent state, persists across grid steps
    gproj_s,                              # (TC*B, 4H) hoisted layer-0 input projection
    h2buf_s,                              # (TC*B, H) layer-1 hidden states for this chunk
):
    H = HIDDEN
    B = h1_s.shape[0]
    TC = x_ref.shape[0] // B

    # Zero initial hidden/cell state on the first time-chunk (PyTorch default).
    @pl.when(pl.program_id(0) == 0)
    def _():
        h1_s[...] = jnp.zeros_like(h1_s)
        c1_s[...] = jnp.zeros_like(c1_s)
        h2_s[...] = jnp.zeros_like(h2_s)
        c2_s[...] = jnp.zeros_like(c2_s)

    # Hoisted layer-0 input projection (+ fused bias) for all timesteps in the
    # chunk: one big MXU matmul off the serial recurrence critical path.
    gproj_s[...] = (
        jnp.dot(x_ref[...], wih1_ref[...], preferred_element_type=jnp.float32)
        + b1_ref[...]
    )

    # Hoist weight loads / bias broadcast out of the time loop
    # (JAX does not CSE broadcast_in_dim).
    whh1 = whh1_ref[...]
    w2 = w2_ref[...]
    b2b = jnp.broadcast_to(b2_ref[...], (B, 4 * H))

    def step(t, carry):
        h1, c1, h2, c2 = carry
        off = pl.multiple_of(t * B, 8)
        g1 = gproj_s[pl.ds(off, B), :] + jnp.dot(
            h1, whh1, preferred_element_type=jnp.float32)
        h1, c1 = _lstm_activations(g1, c1)
        # NOTE: inter-layer dropout(0.2) is training-only -> identity in eval.
        hcat = jnp.concatenate([h1, h2], axis=1)       # lane-boundary concat (free)
        g2 = jnp.dot(hcat, w2, preferred_element_type=jnp.float32) + b2b
        h2, c2 = _lstm_activations(g2, c2)
        h2buf_s[pl.ds(off, B), :] = h2
        return h1, c1, h2, c2

    h1, c1, h2, c2 = lax.fori_loop(
        0, TC, step,
        (h1_s[...], c1_s[...], h2_s[...], c2_s[...]),
        unroll=min(8, TC))

    h1_s[...] = h1
    c1_s[...] = c1
    h2_s[...] = h2
    c2_s[...] = c2

    # Dense head on the whole chunk at once (MXU-friendly (TC*B, .) matmuls).
    feats = h2buf_s[...]
    f1 = jnp.maximum(
        jnp.dot(feats, wd1_ref[...], preferred_element_type=jnp.float32) + bd1_ref[...],
        0.0)
    # NOTE: Gaussian noise branch is training-only -> skipped (eval semantics).
    f2 = jnp.maximum(
        jnp.dot(f1, wd2_ref[...], preferred_element_type=jnp.float32) + bd2_ref[...],
        0.0)
    out_ref[...] = (
        jnp.dot(f2, wp_ref[...], preferred_element_type=jnp.float32) + bp_ref[...]
    )


# ----------------------------------------------------------------------------
# Parameters
# ----------------------------------------------------------------------------
def init_torch_params(key, input_size):
    """Deterministic synthetic params in PyTorch layout (gate order [i, f, g, o])."""
    H = HIDDEN
    k = 1.0 / jnp.sqrt(jnp.float32(H))
    keys = jax.random.split(key, 14)
    u = lambda kk, shape: jax.random.uniform(kk, shape, jnp.float32, -k, k)
    return dict(
        w_ih_l0=u(keys[0], (4 * H, input_size)),
        w_hh_l0=u(keys[1], (4 * H, H)),
        b_ih_l0=u(keys[2], (4 * H,)),
        b_hh_l0=u(keys[3], (4 * H,)),
        w_ih_l1=u(keys[4], (4 * H, H)),
        w_hh_l1=u(keys[5], (4 * H, H)),
        b_ih_l1=u(keys[6], (4 * H,)),
        b_hh_l1=u(keys[7], (4 * H,)),
        w_d1=u(keys[8], (H, H)),
        b_d1=u(keys[9], (H,)),
        w_d2=u(keys[10], (D_DENSE2, H)),
        b_d2=u(keys[11], (D_DENSE2,)),
        w_p=u(keys[12], (D_OUT, D_DENSE2)),
        b_p=u(keys[13], (D_OUT,)),
    )


def _reorder_gates(w):
    """PyTorch gate blocks [i, f, g, o] -> kernel order [i, f, o, g] (axis 0)."""
    H = HIDDEN
    return jnp.concatenate([w[: 2 * H], w[3 * H: 4 * H], w[2 * H: 3 * H]], axis=0)


def prepare_kernel_params(p):
    """Transpose, fuse biases, reorder gates, fuse layer-1 weights, pad the head."""
    H = HIDDEN
    wih1 = _reorder_gates(p["w_ih_l0"]).T
    whh1 = _reorder_gates(p["w_hh_l0"]).T
    b1 = _reorder_gates(p["b_ih_l0"] + p["b_hh_l0"]).reshape(1, 4 * H)
    wih2 = _reorder_gates(p["w_ih_l1"]).T
    whh2 = _reorder_gates(p["w_hh_l1"]).T
    w2 = jnp.concatenate([wih2, whh2], axis=0)                     # (2H, 4H)
    b2 = _reorder_gates(p["b_ih_l1"] + p["b_hh_l1"]).reshape(1, 4 * H)
    # Lane-dense head: pad 64->2 projection to 64->128 with zero columns.
    wp = jnp.zeros((D_DENSE2, D_OUT_PAD), jnp.float32).at[:, :D_OUT].set(p["w_p"].T)
    bp = jnp.zeros((1, D_OUT_PAD), jnp.float32).at[:, :D_OUT].set(
        p["b_p"].reshape(1, D_OUT))
    return (
        wih1, whh1, b1,
        w2, b2,
        p["w_d1"].T, p["b_d1"].reshape(1, H),
        p["w_d2"].T, p["b_d2"].reshape(1, D_DENSE2),
        wp, bp,
    )


# ----------------------------------------------------------------------------
# Wrapper
# ----------------------------------------------------------------------------
def _round_up(x, m):
    return (x + m - 1) // m * m


@functools.partial(jax.jit, static_argnames=("chunk_t",))
def pos_model_forward(x, kernel_params, *, chunk_t=128):
    """x: (B, T, Din) float32, PyTorch batch_first layout -> (B, T, 2)."""
    B, T, Din = x.shape
    H = HIDDEN
    B_pad = _round_up(B, 8)                  # f32 sublane tile is 8
    tc = min(chunk_t, _round_up(T, 8))       # don't over-pad short sequences
    T_pad = _round_up(T, tc)
    num_chunks = T_pad // tc
    rows = tc * B_pad                        # rows per chunk in the flattened layout

    # Pad batch/time, go time-major, and flatten to a 2-D lane-dense layout so
    # the kernel never reshapes across (8,128) tiles.
    x_p = jnp.zeros((B_pad, T_pad, Din), x.dtype).at[:B, :T, :].set(x)
    x2d = jnp.transpose(x_p, (1, 0, 2)).reshape(T_pad * B_pad, Din)

    full2d = lambda a: pl.BlockSpec(a.shape, lambda i: (0, 0))   # resident weights

    out2d = pl.pallas_call(
        pos_model_kernel,
        out_shape=jax.ShapeDtypeStruct((T_pad * B_pad, D_OUT_PAD), jnp.float32),
        grid=(num_chunks,),
        in_specs=[pl.BlockSpec((rows, Din), lambda i: (i, 0))]
        + [full2d(p) for p in kernel_params],
        out_specs=pl.BlockSpec((rows, D_OUT_PAD), lambda i: (i, 0)),
        scratch_shapes=[
            pltpu.VMEM((B_pad, H), jnp.float32),       # h1
            pltpu.VMEM((B_pad, H), jnp.float32),       # c1
            pltpu.VMEM((B_pad, H), jnp.float32),       # h2
            pltpu.VMEM((B_pad, H), jnp.float32),       # c2
            pltpu.VMEM((rows, 4 * H), jnp.float32),    # hoisted layer-0 gate projection
            pltpu.VMEM((rows, H), jnp.float32),        # layer-1 hiddens for the chunk
        ],
        compiler_params=pltpu.CompilerParams(
            dimension_semantics=("arbitrary",),        # state carries across time chunks
            vmem_limit_bytes=32 * 1024 * 1024,         # explicit budget (v7x-safe)
        ),
    )(x2d, *kernel_params)

    out = out2d[:, :D_OUT].reshape(T_pad, B_pad, D_OUT).transpose(1, 0, 2)
    return out[:B, :T, :]


# ----------------------------------------------------------------------------
# Pure-JAX reference (PyTorch semantics, eval mode)
# ----------------------------------------------------------------------------
def pos_model_reference(x, p):
    B, T, _ = x.shape
    H = HIDDEN

    def cell(x_t, h, c, w_ih, w_hh, b_ih, b_hh):
        g = x_t @ w_ih.T + h @ w_hh.T + b_ih + b_hh
        i = jax.nn.sigmoid(g[:, :H])
        f = jax.nn.sigmoid(g[:, H: 2 * H])
        gg = jnp.tanh(g[:, 2 * H: 3 * H])
        o = jax.nn.sigmoid(g[:, 3 * H:])
        c = f * c + i * gg
        return o * jnp.tanh(c), c

    h1 = c1 = h2 = c2 = jnp.zeros((B, H), jnp.float32)
    outs = []
    for t in range(T):
        h1, c1 = cell(x[:, t, :], h1, c1,
                      p["w_ih_l0"], p["w_hh_l0"], p["b_ih_l0"], p["b_hh_l0"])
        h2, c2 = cell(h1, h2, c2,
                      p["w_ih_l1"], p["w_hh_l1"], p["b_ih_l1"], p["b_hh_l1"])
        outs.append(h2)
    feats = jnp.stack(outs, axis=1)                        # (B, T, H)
    f1 = jnp.maximum(feats @ p["w_d1"].T + p["b_d1"], 0.0)
    f2 = jnp.maximum(f1 @ p["w_d2"].T + p["b_d2"], 0.0)
    return f2 @ p["w_p"].T + p["b_p"]


if __name__ == "__main__":
    D_IN = 32
    key = jax.random.PRNGKey(0)
    kx, kp, kx2 = jax.random.split(key, 3)

    torch_params = init_torch_params(kp, D_IN)
    kernel_params = prepare_kernel_params(torch_params)

    # Small test at toy scale.
    B, T = 2, 8
    x = jax.random.normal(kx, (B, T, D_IN), dtype=jnp.float32)
    pos = jax.block_until_ready(pos_model_forward(x, kernel_params))
    assert pos.shape == (B, T, 2), pos.shape
    ref = pos_model_reference(x, torch_params)
    assert jnp.allclose(pos, ref, rtol=1e-3, atol=1e-3), (
        float(jnp.max(jnp.abs(pos - ref))))

    # Multi-chunk test: exercises cross-chunk recurrent-state carry, the
    # fori_loop recurrence, and trailing-time padding (T % chunk_t != 0).
    B2, T2 = 3, 40
    x2 = jax.random.normal(kx2, (B2, T2, D_IN), dtype=jnp.float32)
    pos2 = jax.block_until_ready(pos_model_forward(x2, kernel_params, chunk_t=16))
    assert pos2.shape == (B2, T2, 2), pos2.shape
    ref2 = pos_model_reference(x2, torch_params)
    assert jnp.allclose(pos2, ref2, rtol=1e-3, atol=1e-3), (
        float(jnp.max(jnp.abs(pos2 - ref2))))

    print("KERNEL_OK")
</pallas_src>

<mosaic_0001>
module attributes {stable_mosaic.version = 11 : i64} {
  func.func @pos_model_kernel(%arg0: i32, %arg1: memref<64x32xf32, #tpu.memory_space<vmem>>, %arg2: memref<32x512xf32, #tpu.memory_space<vmem>>, %arg3: memref<128x512xf32, #tpu.memory_space<vmem>>, %arg4: memref<1x512xf32, #tpu.memory_space<vmem>>, %arg5: memref<256x512xf32, #tpu.memory_space<vmem>>, %arg6: memref<1x512xf32, #tpu.memory_space<vmem>>, %arg7: memref<128x128xf32, #tpu.memory_space<vmem>>, %arg8: memref<1x128xf32, #tpu.memory_space<vmem>>, %arg9: memref<128x64xf32, #tpu.memory_space<vmem>>, %arg10: memref<1x64xf32, #tpu.memory_space<vmem>>, %arg11: memref<64x128xf32, #tpu.memory_space<vmem>>, %arg12: memref<1x128xf32, #tpu.memory_space<vmem>>, %arg13: memref<64x128xf32, #tpu.memory_space<vmem>>, %arg14: memref<8x128xf32, #tpu.memory_space<vmem>>, %arg15: memref<8x128xf32, #tpu.memory_space<vmem>>, %arg16: memref<8x128xf32, #tpu.memory_space<vmem>>, %arg17: memref<8x128xf32, #tpu.memory_space<vmem>>, %arg18: memref<64x512xf32, #tpu.memory_space<vmem>>, %arg19: memref<64x128xf32, #tpu.memory_space<vmem>>) attributes {dimension_semantics = [#tpu.dimension_semantics<arbitrary>], iteration_bounds = array<i64: 1>, scalar_prefetch = 0 : i64, scratch_operands = 6 : i64, tpu.core_type = #tpu.core_type<tc>, window_params = [{transform_indices = @transform_0, window_bounds = array<i64: 64, 32>}, {pipeline_mode = #tpu.pipeline_mode<synchronous>, transform_indices = @transform_1, window_bounds = array<i64: 32, 512>}, {pipeline_mode = #tpu.pipeline_mode<synchronous>, transform_indices = @transform_2, window_bounds = array<i64: 128, 512>}, {pipeline_mode = #tpu.pipeline_mode<synchronous>, transform_indices = @transform_3, window_bounds = array<i64: 1, 512>}, {pipeline_mode = #tpu.pipeline_mode<synchronous>, transform_indices = @transform_4, window_bounds = array<i64: 256, 512>}, {pipeline_mode = #tpu.pipeline_mode<synchronous>, transform_indices = @transform_5, window_bounds = array<i64: 1, 512>}, {pipeline_mode = #tpu.pipeline_mode<synchronous>, transform_indices = @transform_6, window_bounds = array<i64: 128, 128>}, {pipeline_mode = #tpu.pipeline_mode<synchronous>, transform_indices = @transform_7, window_bounds = array<i64: 1, 128>}, {pipeline_mode = #tpu.pipeline_mode<synchronous>, transform_indices = @transform_8, window_bounds = array<i64: 128, 64>}, {pipeline_mode = #tpu.pipeline_mode<synchronous>, transform_indices = @transform_9, window_bounds = array<i64: 1, 64>}, {pipeline_mode = #tpu.pipeline_mode<synchronous>, transform_indices = @transform_10, window_bounds = array<i64: 64, 128>}, {pipeline_mode = #tpu.pipeline_mode<synchronous>, transform_indices = @transform_11, window_bounds = array<i64: 1, 128>}, {transform_indices = @transform_12, window_bounds = array<i64: 64, 128>}]} {
    %c0_i32 = arith.constant 0 : i32
    %0 = arith.cmpi eq, %arg0, %c0_i32 : i32
    %1 = arith.extui %0 : i1 to i32
    %c0_i32_0 = arith.constant 0 : i32
    %2 = arith.cmpi ne, %1, %c0_i32_0 : i32
    scf.if %2 {
      %cst_140 = arith.constant 0.000000e+00 : f32
      %420 = vector.broadcast %cst_140 : f32 to vector<8x128xf32>
      %c0_141 = arith.constant 0 : index
      %c0_142 = arith.constant 0 : index
      %421 = vector.load %arg14[%c0_141, %c0_142] : memref<8x128xf32, #tpu.memory_space<vmem>>, vector<8x128xf32>
      tpu.vector_store %arg14[%c0_141, %c0_142], %420 {strides = array<i32>} : memref<8x128xf32, #tpu.memory_space<vmem>>, vector<8x128xf32>,
      %cst_143 = arith.constant 0.000000e+00 : f32
      %422 = vector.broadcast %cst_143 : f32 to vector<8x128xf32>
      %c0_144 = arith.constant 0 : index
      %c0_145 = arith.constant 0 : index
      %423 = vector.load %arg15[%c0_144, %c0_145] : memref<8x128xf32, #tpu.memory_space<vmem>>, vector<8x128xf32>
      tpu.vector_store %arg15[%c0_144, %c0_145], %422 {strides = array<i32>} : memref<8x128xf32, #tpu.memory_space<vmem>>, vector<8x128xf32>,
      %cst_146 = arith.constant 0.000000e+00 : f32
      %424 = vector.broadcast %cst_146 : f32 to vector<8x128xf32>
      %c0_147 = arith.constant 0 : index
      %c0_148 = arith.constant 0 : index
      %425 = vector.load %arg16[%c0_147, %c0_148] : memref<8x128xf32, #tpu.memory_space<vmem>>, vector<8x128xf32>
      tpu.vector_store %arg16[%c0_147, %c0_148], %424 {strides = array<i32>} : memref<8x128xf32, #tpu.memory_space<vmem>>, vector<8x128xf32>,
      %cst_149 = arith.constant 0.000000e+00 : f32
      %426 = vector.broadcast %cst_149 : f32 to vector<8x128xf32>
      %c0_150 = arith.constant 0 : index
      %c0_151 = arith.constant 0 : index
      %427 = vector.load %arg17[%c0_150, %c0_151] : memref<8x128xf32, #tpu.memory_space<vmem>>, vector<8x128xf32>
      tpu.vector_store %arg17[%c0_150, %c0_151], %426 {strides = array<i32>} : memref<8x128xf32, #tpu.memory_space<vmem>>, vector<8x128xf32>,
    } else {
    }
    %c0 = arith.constant 0 : index
    %c0_1 = arith.constant 0 : index
    %3 = vector.load %arg1[%c0, %c0_1] : memref<64x32xf32, #tpu.memory_space<vmem>>, vector<64x32xf32>
    %c0_2 = arith.constant 0 : index
    %c0_3 = arith.constant 0 : index
    %4 = vector.load %arg2[%c0_2, %c0_3] : memref<32x512xf32, #tpu.memory_space<vmem>>, vector<32x512xf32>
    %cst = arith.constant dense<0.000000e+00> : vector<64x512xf32>
    %5 = tpu.matmul %3, %4, %cst {dimension_numbers = #tpu.dot_dimension_numbers<[1], [0], [0], [1], [0, 0, 1, 1], [], []>} : vector<64x32xf32>, vector<32x512xf32>, vector<64x512xf32> -> vector<64x512xf32>
    %c0_4 = arith.constant 0 : index
    %c0_5 = arith.constant 0 : index
    %6 = vector.load %arg4[%c0_4, %c0_5] : memref<1x512xf32, #tpu.memory_space<vmem>>, vector<1x512xf32>
    %7 = vector.broadcast %6 : vector<1x512xf32> to vector<64x512xf32>
    %8 = arith.addf %5, %7 : vector<64x512xf32>
    %c0_6 = arith.constant 0 : index
    %c0_7 = arith.constant 0 : index
    %9 = vector.load %arg18[%c0_6, %c0_7] : memref<64x512xf32, #tpu.memory_space<vmem>>, vector<64x512xf32>
    tpu.vector_store %arg18[%c0_6, %c0_7], %8 {strides = array<i32>} : memref<64x512xf32, #tpu.memory_space<vmem>>, vector<64x512xf32>,
    %c0_8 = arith.constant 0 : index
    %c0_9 = arith.constant 0 : index
    %10 = vector.load %arg3[%c0_8, %c0_9] : memref<128x512xf32, #tpu.memory_space<vmem>>, vector<128x512xf32>
    %c0_10 = arith.constant 0 : index
    %c0_11 = arith.constant 0 : index
    %11 = vector.load %arg5[%c0_10, %c0_11] : memref<256x512xf32, #tpu.memory_space<vmem>>, vector<256x512xf32>
    %c0_12 = arith.constant 0 : index
    %c0_13 = arith.constant 0 : index
    %12 = vector.load %arg6[%c0_12, %c0_13] : memref<1x512xf32, #tpu.memory_space<vmem>>, vector<1x512xf32>
    %13 = vector.shape_cast %12 : vector<1x512xf32> to vector<1x512xf32>
    %14 = vector.broadcast %13 : vector<1x512xf32> to vector<8x512xf32>
    %c0_14 = arith.constant 0 : index
    %c0_15 = arith.constant 0 : index
    %15 = vector.load %arg14[%c0_14, %c0_15] : memref<8x128xf32, #tpu.memory_space<vmem>>, vector<8x128xf32>
    %c0_16 = arith.constant 0 : index
    %c0_17 = arith.constant 0 : index
    %16 = vector.load %arg15[%c0_16, %c0_17] : memref<8x128xf32, #tpu.memory_space<vmem>>, vector<8x128xf32>
    %c0_18 = arith.constant 0 : index
    %c0_19 = arith.constant 0 : index
    %17 = vector.load %arg16[%c0_18, %c0_19] : memref<8x128xf32, #tpu.memory_space<vmem>>, vector<8x128xf32>
    %c0_20 = arith.constant 0 : index
    %c0_21 = arith.constant 0 : index
    %18 = vector.load %arg17[%c0_20, %c0_21] : memref<8x128xf32, #tpu.memory_space<vmem>>, vector<8x128xf32>
    %c0_i32_22 = arith.constant 0 : i32
    %c8_i32 = arith.constant 8 : i32
    %19 = arith.muli %c0_i32_22, %c8_i32 : i32
    %20 = tpu.assume_multiple %19, 8 : i32
    %21 = arith.index_cast %20 : i32 to index
    %c0_23 = arith.constant 0 : index
    %22 = vector.load %arg18[%21, %c0_23] : memref<64x512xf32, #tpu.memory_space<vmem>>, vector<8x512xf32>
    %cst_24 = arith.constant dense<0.000000e+00> : vector<8x512xf32>
    %23 = tpu.matmul %15, %10, %cst_24 {dimension_numbers = #tpu.dot_dimension_numbers<[1], [0], [0], [1], [0, 0, 1, 1], [], []>} : vector<8x128xf32>, vector<128x512xf32>, vector<8x512xf32> -> vector<8x512xf32>
    %24 = arith.addf %22, %23 : vector<8x512xf32>
    %25 = vector.extract_strided_slice %24 {offsets = [0, 0], sizes = [8, 384], strides = [1, 1]} : vector<8x512xf32> to vector<8x384xf32>
    %cst_25 = arith.constant 5.000000e-01 : f32
    %26 = vector.broadcast %cst_25 : f32 to vector<8x384xf32>
    %27 = arith.mulf %26, %25 : vector<8x384xf32>
    %28 = math.tanh %27 : vector<8x384xf32>
    %cst_26 = arith.constant 1.000000e+00 : f32
    %29 = vector.broadcast %cst_26 : f32 to vector<8x384xf32>
    %30 = arith.addf %28, %29 : vector<8x384xf32>
    %cst_27 = arith.constant 5.000000e-01 : f32
    %31 = vector.broadcast %cst_27 : f32 to vector<8x384xf32>
    %32 = arith.mulf %31, %30 : vector<8x384xf32>
    %33 = vector.extract_strided_slice %24 {offsets = [0, 384], sizes = [8, 128], strides = [1, 1]} : vector<8x512xf32> to vector<8x128xf32>
    %34 = math.tanh %33 : vector<8x128xf32>
    %35 = vector.extract_strided_slice %32 {offsets = [0, 0], sizes = [8, 128], strides = [1, 1]} : vector<8x384xf32> to vector<8x128xf32>
    %36 = vector.extract_strided_slice %32 {offsets = [0, 128], sizes = [8, 128], strides = [1, 1]} : vector<8x384xf32> to vector<8x128xf32>
    %37 = vector.extract_strided_slice %32 {offsets = [0, 256], sizes = [8, 128], strides = [1, 1]} : vector<8x384xf32> to vector<8x128xf32>
    %38 = arith.mulf %36, %16 : vector<8x128xf32>
    %39 = arith.mulf %35, %34 : vector<8x128xf32>
    %40 = arith.addf %38, %39 : vector<8x128xf32>
    %41 = math.tanh %40 : vector<8x128xf32>
    %42 = arith.mulf %37, %41 : vector<8x128xf32>
    %43 = tpu.concatenate %42, %17 in 1 : vector<8x128xf32>, vector<8x128xf32> -> vector<8x256xf32>
    %cst_28 = arith.constant dense<0.000000e+00> : vector<8x512xf32>
    %44 = tpu.matmul %43, %11, %cst_28 {dimension_numbers = #tpu.dot_dimension_numbers<[1], [0], [0], [1], [0, 0, 1, 1], [], []>} : vector<8x256xf32>, vector<256x512xf32>, vector<8x512xf32> -> vector<8x512xf32>
    %45 = arith.addf %44, %14 : vector<8x512xf32>
    %46 = vector.extract_strided_slice %45 {offsets = [0, 0], sizes = [8, 384], strides = [1, 1]} : vector<8x512xf32> to vector<8x384xf32>
    %cst_29 = arith.constant 5.000000e-01 : f32
    %47 = vector.broadcast %cst_29 : f32 to vector<8x384xf32>
    %48 = arith.mulf %47, %46 : vector<8x384xf32>
    %49 = math.tanh %48 : vector<8x384xf32>
    %cst_30 = arith.constant 1.000000e+00 : f32
    %50 = vector.broadcast %cst_30 : f32 to vector<8x384xf32>
    %51 = arith.addf %49, %50 : vector<8x384xf32>
    %cst_31 = arith.constant 5.000000e-01 : f32
    %52 = vector.broadcast %cst_31 : f32 to vector<8x384xf32>
    %53 = arith.mulf %52, %51 : vector<8x384xf32>
    %54 = vector.extract_strided_slice %45 {offsets = [0, 384], sizes = [8, 128], strides = [1, 1]} : vector<8x512xf32> to vector<8x128xf32>
    %55 = math.tanh %54 : vector<8x128xf32>
    %56 = vector.extract_strided_slice %53 {offsets = [0, 0], sizes = [8, 128], strides = [1, 1]} : vector<8x384xf32> to vector<8x128xf32>
    %57 = vector.extract_strided_slice %53 {offsets = [0, 128], sizes = [8, 128], strides = [1, 1]} : vector<8x384xf32> to vector<8x128xf32>
    %58 = vector.extract_strided_slice %53 {offsets = [0, 256], sizes = [8, 128], strides = [1, 1]} : vector<8x384xf32> to vector<8x128xf32>
    %59 = arith.mulf %57, %18 : vector<8x128xf32>
    %60 = arith.mulf %56, %55 : vector<8x128xf32>
    %61 = arith.addf %59, %60 : vector<8x128xf32>
    %62 = math.tanh %61 : vector<8x128xf32>
    %63 = arith.mulf %58, %62 : vector<8x128xf32>
    %64 = arith.index_cast %20 : i32 to index
    %c0_32 = arith.constant 0 : index
    %65 = vector.load %arg19[%64, %c0_32] : memref<64x128xf32, #tpu.memory_space<vmem>>, vector<8x128xf32>
    tpu.vector_store %arg19[%64, %c0_32], %63 {strides = array<i32>} : memref<64x128xf32, #tpu.memory_space<vmem>>, vector<8x128xf32>,
    %c1_i32 = arith.constant 1 : i32
    %c8_i32_33 = arith.constant 8 : i32
    %66 = arith.muli %c1_i32, %c8_i32_33 : i32
    %67 = tpu.assume_multiple %66, 8 : i32
    %68 = arith.index_cast %67 : i32 to index
    %c0_34 = arith.constant 0 : index
    %69 = vector.load %arg18[%68, %c0_34] : memref<64x512xf32, #tpu.memory_space<vmem>>, vector<8x512xf32>
    %cst_35 = arith.constant dense<0.000000e+00> : vector<8x512xf32>
    %70 = tpu.matmul %42, %10, %cst_35 {dimension_numbers = #tpu.dot_dimension_numbers<[1], [0], [0], [1], [0, 0, 1, 1], [], []>} : vector<8x128xf32>, vector<128x512xf32>, vector<8x512xf32> -> vector<8x512xf32>
    %71 = arith.addf %69, %70 : vector<8x512xf32>
    %72 = vector.extract_strided_slice %71 {offsets = [0, 0], sizes = [8, 384], strides = [1, 1]} : vector<8x512xf32> to vector<8x384xf32>
    %cst_36 = arith.constant 5.000000e-01 : f32
    %73 = vector.broadcast %cst_36 : f32 to vector<8x384xf32>
    %74 = arith.mulf %73, %72 : vector<8x384xf32>
    %75 = math.tanh %74 : vector<8x384xf32>
    %cst_37 = arith.constant 1.000000e+00 : f32
    %76 = vector.broadcast %cst_37 : f32 to vector<8x384xf32>
    %77 = arith.addf %75, %76 : vector<8x384xf32>
    %cst_38 = arith.constant 5.000000e-01 : f32
    %78 = vector.broadcast %cst_38 : f32 to vector<8x384xf32>
    %79 = arith.mulf %78, %77 : vector<8x384xf32>
    %80 = vector.extract_strided_slice %71 {offsets = [0, 384], sizes = [8, 128], strides = [1, 1]} : vector<8x512xf32> to vector<8x128xf32>
    %81 = math.tanh %80 : vector<8x128xf32>
    %82 = vector.extract_strided_slice %79 {offsets = [0, 0], sizes = [8, 128], strides = [1, 1]} : vector<8x384xf32> to vector<8x128xf32>
    %83 = vector.extract_strided_slice %79 {offsets = [0, 128], sizes = [8, 128], strides = [1, 1]} : vector<8x384xf32> to vector<8x128xf32>
    %84 = vector.extract_strided_slice %79 {offsets = [0, 256], sizes = [8, 128], strides = [1, 1]} : vector<8x384xf32> to vector<8x128xf32>
    %85 = arith.mulf %83, %40 : vector<8x128xf32>
    %86 = arith.mulf %82, %81 : vector<8x128xf32>
    %87 = arith.addf %85, %86 : vector<8x128xf32>
    %88 = math.tanh %87 : vector<8x128xf32>
    %89 = arith.mulf %84, %88 : vector<8x128xf32>
    %90 = tpu.concatenate %89, %63 in 1 : vector<8x128xf32>, vector<8x128xf32> -> vector<8x256xf32>
    %cst_39 = arith.constant dense<0.000000e+00> : vector<8x512xf32>
    %91 = tpu.matmul %90, %11, %cst_39 {dimension_numbers = #tpu.dot_dimension_numbers<[1], [0], [0], [1], [0, 0, 1, 1], [], []>} : vector<8x256xf32>, vector<256x512xf32>, vector<8x512xf32> -> vector<8x512xf32>
    %92 = arith.addf %91, %14 : vector<8x512xf32>
    %93 = vector.extract_strided_slice %92 {offsets = [0, 0], sizes = [8, 384], strides = [1, 1]} : vector<8x512xf32> to vector<8x384xf32>
    %cst_40 = arith.constant 5.000000e-01 : f32
    %94 = vector.broadcast %cst_40 : f32 to vector<8x384xf32>
    %95 = arith.mulf %94, %93 : vector<8x384xf32>
    %96 = math.tanh %95 : vector<8x384xf32>
    %cst_41 = arith.constant 1.000000e+00 : f32
    %97 = vector.broadcast %cst_41 : f32 to vector<8x384xf32>
    %98 = arith.addf %96, %97 : vector<8x384xf32>
    %cst_42 = arith.constant 5.000000e-01 : f32
    %99 = vector.broadcast %cst_42 : f32 to vector<8x384xf32>
    %100 = arith.mulf %99, %98 : vector<8x384xf32>
    %101 = vector.extract_strided_slice %92 {offsets = [0, 384], sizes = [8, 128], strides = [1, 1]} : vector<8x512xf32> to vector<8x128xf32>
    %102 = math.tanh %101 : vector<8x128xf32>
    %103 = vector.extract_strided_slice %100 {offsets = [0, 0], sizes = [8, 128], strides = [1, 1]} : vector<8x384xf32> to vector<8x128xf32>
    %104 = vector.extract_strided_slice %100 {offsets = [0, 128], sizes = [8, 128], strides = [1, 1]} : vector<8x384xf32> to vector<8x128xf32>
    %105 = vector.extract_strided_slice %100 {offsets = [0, 256], sizes = [8, 128], strides = [1, 1]} : vector<8x384xf32> to vector<8x128xf32>
    %106 = arith.mulf %104, %61 : vector<8x128xf32>
    %107 = arith.mulf %103, %102 : vector<8x128xf32>
    %108 = arith.addf %106, %107 : vector<8x128xf32>
    %109 = math.tanh %108 : vector<8x128xf32>
    %110 = arith.mulf %105, %109 : vector<8x128xf32>
    %111 = arith.index_cast %67 : i32 to index
    %c0_43 = arith.constant 0 : index
    %112 = vector.load %arg19[%111, %c0_43] : memref<64x128xf32, #tpu.memory_space<vmem>>, vector<8x128xf32>
    tpu.vector_store %arg19[%111, %c0_43], %110 {strides = array<i32>} : memref<64x128xf32, #tpu.memory_space<vmem>>, vector<8x128xf32>,
    %c2_i32 = arith.constant 2 : i32
    %c8_i32_44 = arith.constant 8 : i32
    %113 = arith.muli %c2_i32, %c8_i32_44 : i32
    %114 = tpu.assume_multiple %113, 8 : i32
    %115 = arith.index_cast %114 : i32 to index
    %c0_45 = arith.constant 0 : index
    %116 = vector.load %arg18[%115, %c0_45] : memref<64x512xf32, #tpu.memory_space<vmem>>, vector<8x512xf32>
    %cst_46 = arith.constant dense<0.000000e+00> : vector<8x512xf32>
    %117 = tpu.matmul %89, %10, %cst_46 {dimension_numbers = #tpu.dot_dimension_numbers<[1], [0], [0], [1], [0, 0, 1, 1], [], []>} : vector<8x128xf32>, vector<128x512xf32>, vector<8x512xf32> -> vector<8x512xf32>
    %118 = arith.addf %116, %117 : vector<8x512xf32>
    %119 = vector.extract_strided_slice %118 {offsets = [0, 0], sizes = [8, 384], strides = [1, 1]} : vector<8x512xf32> to vector<8x384xf32>
    %cst_47 = arith.constant 5.000000e-01 : f32
    %120 = vector.broadcast %cst_47 : f32 to vector<8x384xf32>
    %121 = arith.mulf %120, %119 : vector<8x384xf32>
    %122 = math.tanh %121 : vector<8x384xf32>
    %cst_48 = arith.constant 1.000000e+00 : f32
    %123 = vector.broadcast %cst_48 : f32 to vector<8x384xf32>
    %124 = arith.addf %122, %123 : vector<8x384xf32>
    %cst_49 = arith.constant 5.000000e-01 : f32
    %125 = vector.broadcast %cst_49 : f32 to vector<8x384xf32>
    %126 = arith.mulf %125, %124 : vector<8x384xf32>
    %127 = vector.extract_strided_slice %118 {offsets = [0, 384], sizes = [8, 128], strides = [1, 1]} : vector<8x512xf32> to vector<8x128xf32>
    %128 = math.tanh %127 : vector<8x128xf32>
    %129 = vector.extract_strided_slice %126 {offsets = [0, 0], sizes = [8, 128], strides = [1, 1]} : vector<8x384xf32> to vector<8x128xf32>
    %130 = vector.extract_strided_slice %126 {offsets = [0, 128], sizes = [8, 128], strides = [1, 1]} : vector<8x384xf32> to vector<8x128xf32>
    %131 = vector.extract_strided_slice %126 {offsets = [0, 256], sizes = [8, 128], strides = [1, 1]} : vector<8x384xf32> to vector<8x128xf32>
    %132 = arith.mulf %130, %87 : vector<8x128xf32>
    %133 = arith.mulf %129, %128 : vector<8x128xf32>
    %134 = arith.addf %132, %133 : vector<8x128xf32>
    %135 = math.tanh %134 : vector<8x128xf32>
    %136 = arith.mulf %131, %135 : vector<8x128xf32>
    %137 = tpu.concatenate %136, %110 in 1 : vector<8x128xf32>, vector<8x128xf32> -> vector<8x256xf32>
    %cst_50 = arith.constant dense<0.000000e+00> : vector<8x512xf32>
    %138 = tpu.matmul %137, %11, %cst_50 {dimension_numbers = #tpu.dot_dimension_numbers<[1], [0], [0], [1], [0, 0, 1, 1], [], []>} : vector<8x256xf32>, vector<256x512xf32>, vector<8x512xf32> -> vector<8x512xf32>
    %139 = arith.addf %138, %14 : vector<8x512xf32>
    %140 = vector.extract_strided_slice %139 {offsets = [0, 0], sizes = [8, 384], strides = [1, 1]} : vector<8x512xf32> to vector<8x384xf32>
    %cst_51 = arith.constant 5.000000e-01 : f32
    %141 = vector.broadcast %cst_51 : f32 to vector<8x384xf32>
    %142 = arith.mulf %141, %140 : vector<8x384xf32>
    %143 = math.tanh %142 : vector<8x384xf32>
    %cst_52 = arith.constant 1.000000e+00 : f32
    %144 = vector.broadcast %cst_52 : f32 to vector<8x384xf32>
    %145 = arith.addf %143, %144 : vector<8x384xf32>
    %cst_53 = arith.constant 5.000000e-01 : f32
    %146 = vector.broadcast %cst_53 : f32 to vector<8x384xf32>
    %147 = arith.mulf %146, %145 : vector<8x384xf32>
    %148 = vector.extract_strided_slice %139 {offsets = [0, 384], sizes = [8, 128], strides = [1, 1]} : vector<8x512xf32> to vector<8x128xf32>
    %149 = math.tanh %148 : vector<8x128xf32>
    %150 = vector.extract_strided_slice %147 {offsets = [0, 0], sizes = [8, 128], strides = [1, 1]} : vector<8x384xf32> to vector<8x128xf32>
    %151 = vector.extract_strided_slice %147 {offsets = [0, 128], sizes = [8, 128], strides = [1, 1]} : vector<8x384xf32> to vector<8x128xf32>
    %152 = vector.extract_strided_slice %147 {offsets = [0, 256], sizes = [8, 128], strides = [1, 1]} : vector<8x384xf32> to vector<8x128xf32>
    %153 = arith.mulf %151, %108 : vector<8x128xf32>
    %154 = arith.mulf %150, %149 : vector<8x128xf32>
    %155 = arith.addf %153, %154 : vector<8x128xf32>
    %156 = math.tanh %155 : vector<8x128xf32>
    %157 = arith.mulf %152, %156 : vector<8x128xf32>
    %158 = arith.index_cast %114 : i32 to index
    %c0_54 = arith.constant 0 : index
    %159 = vector.load %arg19[%158, %c0_54] : memref<64x128xf32, #tpu.memory_space<vmem>>, vector<8x128xf32>
    tpu.vector_store %arg19[%158, %c0_54], %157 {strides = array<i32>} : memref<64x128xf32, #tpu.memory_space<vmem>>, vector<8x128xf32>,
    %c3_i32 = arith.constant 3 : i32
    %c8_i32_55 = arith.constant 8 : i32
    %160 = arith.muli %c3_i32, %c8_i32_55 : i32
    %161 = tpu.assume_multiple %160, 8 : i32
    %162 = arith.index_cast %161 : i32 to index
    %c0_56 = arith.constant 0 : index
    %163 = vector.load %arg18[%162, %c0_56] : memref<64x512xf32, #tpu.memory_space<vmem>>, vector<8x512xf32>
    %cst_57 = arith.constant dense<0.000000e+00> : vector<8x512xf32>
    %164 = tpu.matmul %136, %10, %cst_57 {dimension_numbers = #tpu.dot_dimension_numbers<[1], [0], [0], [1], [0, 0, 1, 1], [], []>} : vector<8x128xf32>, vector<128x512xf32>, vector<8x512xf32> -> vector<8x512xf32>
    %165 = arith.addf %163, %164 : vector<8x512xf32>
    %166 = vector.extract_strided_slice %165 {offsets = [0, 0], sizes = [8, 384], strides = [1, 1]} : vector<8x512xf32> to vector<8x384xf32>
    %cst_58 = arith.constant 5.000000e-01 : f32
    %167 = vector.broadcast %cst_58 : f32 to vector<8x384xf32>
    %168 = arith.mulf %167, %166 : vector<8x384xf32>
    %169 = math.tanh %168 : vector<8x384xf32>
    %cst_59 = arith.constant 1.000000e+00 : f32
    %170 = vector.broadcast %cst_59 : f32 to vector<8x384xf32>
    %171 = arith.addf %169, %170 : vector<8x384xf32>
    %cst_60 = arith.constant 5.000000e-01 : f32
    %172 = vector.broadcast %cst_60 : f32 to vector<8x384xf32>
    %173 = arith.mulf %172, %171 : vector<8x384xf32>
    %174 = vector.extract_strided_slice %165 {offsets = [0, 384], sizes = [8, 128], strides = [1, 1]} : vector<8x512xf32> to vector<8x128xf32>
    %175 = math.tanh %174 : vector<8x128xf32>
    %176 = vector.extract_strided_slice %173 {offsets = [0, 0], sizes = [8, 128], strides = [1, 1]} : vector<8x384xf32> to vector<8x128xf32>
    %177 = vector.extract_strided_slice %173 {offsets = [0, 128], sizes = [8, 128], strides = [1, 1]} : vector<8x384xf32> to vector<8x128xf32>
    %178 = vector.extract_strided_slice %173 {offsets = [0, 256], sizes = [8, 128], strides = [1, 1]} : vector<8x384xf32> to vector<8x128xf32>
    %179 = arith.mulf %177, %134 : vector<8x128xf32>
    %180 = arith.mulf %176, %175 : vector<8x128xf32>
    %181 = arith.addf %179, %180 : vector<8x128xf32>
    %182 = math.tanh %181 : vector<8x128xf32>
    %183 = arith.mulf %178, %182 : vector<8x128xf32>
    %184 = tpu.concatenate %183, %157 in 1 : vector<8x128xf32>, vector<8x128xf32> -> vector<8x256xf32>
    %cst_61 = arith.constant dense<0.000000e+00> : vector<8x512xf32>
    %185 = tpu.matmul %184, %11, %cst_61 {dimension_numbers = #tpu.dot_dimension_numbers<[1], [0], [0], [1], [0, 0, 1, 1], [], []>} : vector<8x256xf32>, vector<256x512xf32>, vector<8x512xf32> -> vector<8x512xf32>
    %186 = arith.addf %185, %14 : vector<8x512xf32>
    %187 = vector.extract_strided_slice %186 {offsets = [0, 0], sizes = [8, 384], strides = [1, 1]} : vector<8x512xf32> to vector<8x384xf32>
    %cst_62 = arith.constant 5.000000e-01 : f32
    %188 = vector.broadcast %cst_62 : f32 to vector<8x384xf32>
    %189 = arith.mulf %188, %187 : vector<8x384xf32>
    %190 = math.tanh %189 : vector<8x384xf32>
    %cst_63 = arith.constant 1.000000e+00 : f32
    %191 = vector.broadcast %cst_63 : f32 to vector<8x384xf32>
    %192 = arith.addf %190, %191 : vector<8x384xf32>
    %cst_64 = arith.constant 5.000000e-01 : f32
    %193 = vector.broadcast %cst_64 : f32 to vector<8x384xf32>
    %194 = arith.mulf %193, %192 : vector<8x384xf32>
    %195 = vector.extract_strided_slice %186 {offsets = [0, 384], sizes = [8, 128], strides = [1, 1]} : vector<8x512xf32> to vector<8x128xf32>
    %196 = math.tanh %195 : vector<8x128xf32>
    %197 = vector.extract_strided_slice %194 {offsets = [0, 0], sizes = [8, 128], strides = [1, 1]} : vector<8x384xf32> to vector<8x128xf32>
    %198 = vector.extract_strided_slice %194 {offsets = [0, 128], sizes = [8, 128], strides = [1, 1]} : vector<8x384xf32> to vector<8x128xf32>
    %199 = vector.extract_strided_slice %194 {offsets = [0, 256], sizes = [8, 128], strides = [1, 1]} : vector<8x384xf32> to vector<8x128xf32>
    %200 = arith.mulf %198, %155 : vector<8x128xf32>
    %201 = arith.mulf %197, %196 : vector<8x128xf32>
    %202 = arith.addf %200, %201 : vector<8x128xf32>
    %203 = math.tanh %202 : vector<8x128xf32>
    %204 = arith.mulf %199, %203 : vector<8x128xf32>
    %205 = arith.index_cast %161 : i32 to index
    %c0_65 = arith.constant 0 : index
    %206 = vector.load %arg19[%205, %c0_65] : memref<64x128xf32, #tpu.memory_space<vmem>>, vector<8x128xf32>
    tpu.vector_store %arg19[%205, %c0_65], %204 {strides = array<i32>} : memref<64x128xf32, #tpu.memory_space<vmem>>, vector<8x128xf32>,
    %c4_i32 = arith.constant 4 : i32
    %c8_i32_66 = arith.constant 8 : i32
    %207 = arith.muli %c4_i32, %c8_i32_66 : i32
    %208 = tpu.assume_multiple %207, 8 : i32
    %209 = arith.index_cast %208 : i32 to index
    %c0_67 = arith.constant 0 : index
    %210 = vector.load %arg18[%209, %c0_67] : memref<64x512xf32, #tpu.memory_space<vmem>>, vector<8x512xf32>
    %cst_68 = arith.constant dense<0.000000e+00> : vector<8x512xf32>
    %211 = tpu.matmul %183, %10, %cst_68 {dimension_numbers = #tpu.dot_dimension_numbers<[1], [0], [0], [1], [0, 0, 1, 1], [], []>} : vector<8x128xf32>, vector<128x512xf32>, vector<8x512xf32> -> vector<8x512xf32>
    %212 = arith.addf %210, %211 : vector<8x512xf32>
    %213 = vector.extract_strided_slice %212 {offsets = [0, 0], sizes = [8, 384], strides = [1, 1]} : vector<8x512xf32> to vector<8x384xf32>
    %cst_69 = arith.constant 5.000000e-01 : f32
    %214 = vector.broadcast %cst_69 : f32 to vector<8x384xf32>
    %215 = arith.mulf %214, %213 : vector<8x384xf32>
    %216 = math.tanh %215 : vector<8x384xf32>
    %cst_70 = arith.constant 1.000000e+00 : f32
    %217 = vector.broadcast %cst_70 : f32 to vector<8x384xf32>
    %218 = arith.addf %216, %217 : vector<8x384xf32>
    %cst_71 = arith.constant 5.000000e-01 : f32
    %219 = vector.broadcast %cst_71 : f32 to vector<8x384xf32>
    %220 = arith.mulf %219, %218 : vector<8x384xf32>
    %221 = vector.extract_strided_slice %212 {offsets = [0, 384], sizes = [8, 128], strides = [1, 1]} : vector<8x512xf32> to vector<8x128xf32>
    %222 = math.tanh %221 : vector<8x128xf32>
    %223 = vector.extract_strided_slice %220 {offsets = [0, 0], sizes = [8, 128], strides = [1, 1]} : vector<8x384xf32> to vector<8x128xf32>
    %224 = vector.extract_strided_slice %220 {offsets = [0, 128], sizes = [8, 128], strides = [1, 1]} : vector<8x384xf32> to vector<8x128xf32>
    %225 = vector.extract_strided_slice %220 {offsets = [0, 256], sizes = [8, 128], strides = [1, 1]} : vector<8x384xf32> to vector<8x128xf32>
    %226 = arith.mulf %224, %181 : vector<8x128xf32>
    %227 = arith.mulf %223, %222 : vector<8x128xf32>
    %228 = arith.addf %226, %227 : vector<8x128xf32>
    %229 = math.tanh %228 : vector<8x128xf32>
    %230 = arith.mulf %225, %229 : vector<8x128xf32>
    %231 = tpu.concatenate %230, %204 in 1 : vector<8x128xf32>, vector<8x128xf32> -> vector<8x256xf32>
    %cst_72 = arith.constant dense<0.000000e+00> : vector<8x512xf32>
    %232 = tpu.matmul %231, %11, %cst_72 {dimension_numbers = #tpu.dot_dimension_numbers<[1], [0], [0], [1], [0, 0, 1, 1], [], []>} : vector<8x256xf32>, vector<256x512xf32>, vector<8x512xf32> -> vector<8x512xf32>
    %233 = arith.addf %232, %14 : vector<8x512xf32>
    %234 = vector.extract_strided_slice %233 {offsets = [0, 0], sizes = [8, 384], strides = [1, 1]} : vector<8x512xf32> to vector<8x384xf32>
    %cst_73 = arith.constant 5.000000e-01 : f32
    %235 = vector.broadcast %cst_73 : f32 to vector<8x384xf32>
    %236 = arith.mulf %235, %234 : vector<8x384xf32>
    %237 = math.tanh %236 : vector<8x384xf32>
    %cst_74 = arith.constant 1.000000e+00 : f32
    %238 = vector.broadcast %cst_74 : f32 to vector<8x384xf32>
    %239 = arith.addf %237, %238 : vector<8x384xf32>
    %cst_75 = arith.constant 5.000000e-01 : f32
    %240 = vector.broadcast %cst_75 : f32 to vector<8x384xf32>
    %241 = arith.mulf %240, %239 : vector<8x384xf32>
    %242 = vector.extract_strided_slice %233 {offsets = [0, 384], sizes = [8, 128], strides = [1, 1]} : vector<8x512xf32> to vector<8x128xf32>
    %243 = math.tanh %242 : vector<8x128xf32>
    %244 = vector.extract_strided_slice %241 {offsets = [0, 0], sizes = [8, 128], strides = [1, 1]} : vector<8x384xf32> to vector<8x128xf32>
    %245 = vector.extract_strided_slice %241 {offsets = [0, 128], sizes = [8, 128], strides = [1, 1]} : vector<8x384xf32> to vector<8x128xf32>
    %246 = vector.extract_strided_slice %241 {offsets = [0, 256], sizes = [8, 128], strides = [1, 1]} : vector<8x384xf32> to vector<8x128xf32>
    %247 = arith.mulf %245, %202 : vector<8x128xf32>
    %248 = arith.mulf %244, %243 : vector<8x128xf32>
    %249 = arith.addf %247, %248 : vector<8x128xf32>
    %250 = math.tanh %249 : vector<8x128xf32>
    %251 = arith.mulf %246, %250 : vector<8x128xf32>
    %252 = arith.index_cast %208 : i32 to index
    %c0_76 = arith.constant 0 : index
    %253 = vector.load %arg19[%252, %c0_76] : memref<64x128xf32, #tpu.memory_space<vmem>>, vector<8x128xf32>
    tpu.vector_store %arg19[%252, %c0_76], %251 {strides = array<i32>} : memref<64x128xf32, #tpu.memory_space<vmem>>, vector<8x128xf32>,
    %c5_i32 = arith.constant 5 : i32
    %c8_i32_77 = arith.constant 8 : i32
    %254 = arith.muli %c5_i32, %c8_i32_77 : i32
    %255 = tpu.assume_multiple %254, 8 : i32
    %256 = arith.index_cast %255 : i32 to index
    %c0_78 = arith.constant 0 : index
    %257 = vector.load %arg18[%256, %c0_78] : memref<64x512xf32, #tpu.memory_space<vmem>>, vector<8x512xf32>
    %cst_79 = arith.constant dense<0.000000e+00> : vector<8x512xf32>
    %258 = tpu.matmul %230, %10, %cst_79 {dimension_numbers = #tpu.dot_dimension_numbers<[1], [0], [0], [1], [0, 0, 1, 1], [], []>} : vector<8x128xf32>, vector<128x512xf32>, vector<8x512xf32> -> vector<8x512xf32>
    %259 = arith.addf %257, %258 : vector<8x512xf32>
    %260 = vector.extract_strided_slice %259 {offsets = [0, 0], sizes = [8, 384], strides = [1, 1]} : vector<8x512xf32> to vector<8x384xf32>
    %cst_80 = arith.constant 5.000000e-01 : f32
    %261 = vector.broadcast %cst_80 : f32 to vector<8x384xf32>
    %262 = arith.mulf %261, %260 : vector<8x384xf32>
    %263 = math.tanh %262 : vector<8x384xf32>
    %cst_81 = arith.constant 1.000000e+00 : f32
    %264 = vector.broadcast %cst_81 : f32 to vector<8x384xf32>
    %265 = arith.addf %263, %264 : vector<8x384xf32>
    %cst_82 = arith.constant 5.000000e-01 : f32
    %266 = vector.broadcast %cst_82 : f32 to vector<8x384xf32>
    %267 = arith.mulf %266, %265 : vector<8x384xf32>
    %268 = vector.extract_strided_slice %259 {offsets = [0, 384], sizes = [8, 128], strides = [1, 1]} : vector<8x512xf32> to vector<8x128xf32>
    %269 = math.tanh %268 : vector<8x128xf32>
    %270 = vector.extract_strided_slice %267 {offsets = [0, 0], sizes = [8, 128], strides = [1, 1]} : vector<8x384xf32> to vector<8x128xf32>
    %271 = vector.extract_strided_slice %267 {offsets = [0, 128], sizes = [8, 128], strides = [1, 1]} : vector<8x384xf32> to vector<8x128xf32>
    %272 = vector.extract_strided_slice %267 {offsets = [0, 256], sizes = [8, 128], strides = [1, 1]} : vector<8x384xf32> to vector<8x128xf32>
    %273 = arith.mulf %271, %228 : vector<8x128xf32>
    %274 = arith.mulf %270, %269 : vector<8x128xf32>
    %275 = arith.addf %273, %274 : vector<8x128xf32>
    %276 = math.tanh %275 : vector<8x128xf32>
    %277 = arith.mulf %272, %276 : vector<8x128xf32>
    %278 = tpu.concatenate %277, %251 in 1 : vector<8x128xf32>, vector<8x128xf32> -> vector<8x256xf32>
    %cst_83 = arith.constant dense<0.000000e+00> : vector<8x512xf32>
    %279 = tpu.matmul %278, %11, %cst_83 {dimension_numbers = #tpu.dot_dimension_numbers<[1], [0], [0], [1], [0, 0, 1, 1], [], []>} : vector<8x256xf32>, vector<256x512xf32>, vector<8x512xf32> -> vector<8x512xf32>
    %280 = arith.addf %279, %14 : vector<8x512xf32>
    %281 = vector.extract_strided_slice %280 {offsets = [0, 0], sizes = [8, 384], strides = [1, 1]} : vector<8x512xf32> to vector<8x384xf32>
    %cst_84 = arith.constant 5.000000e-01 : f32
    %282 = vector.broadcast %cst_84 : f32 to vector<8x384xf32>
    %283 = arith.mulf %282, %281 : vector<8x384xf32>
    %284 = math.tanh %283 : vector<8x384xf32>
    %cst_85 = arith.constant 1.000000e+00 : f32
    %285 = vector.broadcast %cst_85 : f32 to vector<8x384xf32>
    %286 = arith.addf %284, %285 : vector<8x384xf32>
    %cst_86 = arith.constant 5.000000e-01 : f32
    %287 = vector.broadcast %cst_86 : f32 to vector<8x384xf32>
    %288 = arith.mulf %287, %286 : vector<8x384xf32>
    %289 = vector.extract_strided_slice %280 {offsets = [0, 384], sizes = [8, 128], strides = [1, 1]} : vector<8x512xf32> to vector<8x128xf32>
    %290 = math.tanh %289 : vector<8x128xf32>
    %291 = vector.extract_strided_slice %288 {offsets = [0, 0], sizes = [8, 128], strides = [1, 1]} : vector<8x384xf32> to vector<8x128xf32>
    %292 = vector.extract_strided_slice %288 {offsets = [0, 128], sizes = [8, 128], strides = [1, 1]} : vector<8x384xf32> to vector<8x128xf32>
    %293 = vector.extract_strided_slice %288 {offsets = [0, 256], sizes = [8, 128], strides = [1, 1]} : vector<8x384xf32> to vector<8x128xf32>
    %294 = arith.mulf %292, %249 : vector<8x128xf32>
    %295 = arith.mulf %291, %290 : vector<8x128xf32>
    %296 = arith.addf %294, %295 : vector<8x128xf32>
    %297 = math.tanh %296 : vector<8x128xf32>
    %298 = arith.mulf %293, %297 : vector<8x128xf32>
    %299 = arith.index_cast %255 : i32 to index
    %c0_87 = arith.constant 0 : index
    %300 = vector.load %arg19[%299, %c0_87] : memref<64x128xf32, #tpu.memory_space<vmem>>, vector<8x128xf32>
    tpu.vector_store %arg19[%299, %c0_87], %298 {strides = array<i32>} : memref<64x128xf32, #tpu.memory_space<vmem>>, vector<8x128xf32>,
    %c6_i32 = arith.constant 6 : i32
    %c8_i32_88 = arith.constant 8 : i32
    %301 = arith.muli %c6_i32, %c8_i32_88 : i32
    %302 = tpu.assume_multiple %301, 8 : i32
    %303 = arith.index_cast %302 : i32 to index
    %c0_89 = arith.constant 0 : index
    %304 = vector.load %arg18[%303, %c0_89] : memref<64x512xf32, #tpu.memory_space<vmem>>, vector<8x512xf32>
    %cst_90 = arith.constant dense<0.000000e+00> : vector<8x512xf32>
    %305 = tpu.matmul %277, %10, %cst_90 {dimension_numbers = #tpu.dot_dimension_numbers<[1], [0], [0], [1], [0, 0, 1, 1], [], []>} : vector<8x128xf32>, vector<128x512xf32>, vector<8x512xf32> -> vector<8x512xf32>
    %306 = arith.addf %304, %305 : vector<8x512xf32>
    %307 = vector.extract_strided_slice %306 {offsets = [0, 0], sizes = [8, 384], strides = [1, 1]} : vector<8x512xf32> to vector<8x384xf32>
    %cst_91 = arith.constant 5.000000e-01 : f32
    %308 = vector.broadcast %cst_91 : f32 to vector<8x384xf32>
    %309 = arith.mulf %308, %307 : vector<8x384xf32>
    %310 = math.tanh %309 : vector<8x384xf32>
    %cst_92 = arith.constant 1.000000e+00 : f32
    %311 = vector.broadcast %cst_92 : f32 to vector<8x384xf32>
    %312 = arith.addf %310, %311 : vector<8x384xf32>
    %cst_93 = arith.constant 5.000000e-01 : f32
    %313 = vector.broadcast %cst_93 : f32 to vector<8x384xf32>
    %314 = arith.mulf %313, %312 : vector<8x384xf32>
    %315 = vector.extract_strided_slice %306 {offsets = [0, 384], sizes = [8, 128], strides = [1, 1]} : vector<8x512xf32> to vector<8x128xf32>
    %316 = math.tanh %315 : vector<8x128xf32>
    %317 = vector.extract_strided_slice %314 {offsets = [0, 0], sizes = [8, 128], strides = [1, 1]} : vector<8x384xf32> to vector<8x128xf32>
    %318 = vector.extract_strided_slice %314 {offsets = [0, 128], sizes = [8, 128], strides = [1, 1]} : vector<8x384xf32> to vector<8x128xf32>
    %319 = vector.extract_strided_slice %314 {offsets = [0, 256], sizes = [8, 128], strides = [1, 1]} : vector<8x384xf32> to vector<8x128xf32>
    %320 = arith.mulf %318, %275 : vector<8x128xf32>
    %321 = arith.mulf %317, %316 : vector<8x128xf32>
    %322 = arith.addf %320, %321 : vector<8x128xf32>
    %323 = math.tanh %322 : vector<8x128xf32>
    %324 = arith.mulf %319, %323 : vector<8x128xf32>
    %325 = tpu.concatenate %324, %298 in 1 : vector<8x128xf32>, vector<8x128xf32> -> vector<8x256xf32>
    %cst_94 = arith.constant dense<0.000000e+00> : vector<8x512xf32>
    %326 = tpu.matmul %325, %11, %cst_94 {dimension_numbers = #tpu.dot_dimension_numbers<[1], [0], [0], [1], [0, 0, 1, 1], [], []>} : vector<8x256xf32>, vector<256x512xf32>, vector<8x512xf32> -> vector<8x512xf32>
    %327 = arith.addf %326, %14 : vector<8x512xf32>
    %328 = vector.extract_strided_slice %327 {offsets = [0, 0], sizes = [8, 384], strides = [1, 1]} : vector<8x512xf32> to vector<8x384xf32>
    %cst_95 = arith.constant 5.000000e-01 : f32
    %329 = vector.broadcast %cst_95 : f32 to vector<8x384xf32>
    %330 = arith.mulf %329, %328 : vector<8x384xf32>
    %331 = math.tanh %330 : vector<8x384xf32>
    %cst_96 = arith.constant 1.000000e+00 : f32
    %332 = vector.broadcast %cst_96 : f32 to vector<8x384xf32>
    %333 = arith.addf %331, %332 : vector<8x384xf32>
    %cst_97 = arith.constant 5.000000e-01 : f32
    %334 = vector.broadcast %cst_97 : f32 to vector<8x384xf32>
    %335 = arith.mulf %334, %333 : vector<8x384xf32>
    %336 = vector.extract_strided_slice %327 {offsets = [0, 384], sizes = [8, 128], strides = [1, 1]} : vector<8x512xf32> to vector<8x128xf32>
    %337 = math.tanh %336 : vector<8x128xf32>
    %338 = vector.extract_strided_slice %335 {offsets = [0, 0], sizes = [8, 128], strides = [1, 1]} : vector<8x384xf32> to vector<8x128xf32>
    %339 = vector.extract_strided_slice %335 {offsets = [0, 128], sizes = [8, 128], strides = [1, 1]} : vector<8x384xf32> to vector<8x128xf32>
    %340 = vector.extract_strided_slice %335 {offsets = [0, 256], sizes = [8, 128], strides = [1, 1]} : vector<8x384xf32> to vector<8x128xf32>
    %341 = arith.mulf %339, %296 : vector<8x128xf32>
    %342 = arith.mulf %338, %337 : vector<8x128xf32>
    %343 = arith.addf %341, %342 : vector<8x128xf32>
    %344 = math.tanh %343 : vector<8x128xf32>
    %345 = arith.mulf %340, %344 : vector<8x128xf32>
    %346 = arith.index_cast %302 : i32 to index
    %c0_98 = arith.constant 0 : index
    %347 = vector.load %arg19[%346, %c0_98] : memref<64x128xf32, #tpu.memory_space<vmem>>, vector<8x128xf32>
    tpu.vector_store %arg19[%346, %c0_98], %345 {strides = array<i32>} : memref<64x128xf32, #tpu.memory_space<vmem>>, vector<8x128xf32>,
    %c7_i32 = arith.constant 7 : i32
    %c8_i32_99 = arith.constant 8 : i32
    %348 = arith.muli %c7_i32, %c8_i32_99 : i32
    %349 = tpu.assume_multiple %348, 8 : i32
    %350 = arith.index_cast %349 : i32 to index
    %c0_100 = arith.constant 0 : index
    %351 = vector.load %arg18[%350, %c0_100] : memref<64x512xf32, #tpu.memory_space<vmem>>, vector<8x512xf32>
    %cst_101 = arith.constant dense<0.000000e+00> : vector<8x512xf32>
    %352 = tpu.matmul %324, %10, %cst_101 {dimension_numbers = #tpu.dot_dimension_numbers<[1], [0], [0], [1], [0, 0, 1, 1], [], []>} : vector<8x128xf32>, vector<128x512xf32>, vector<8x512xf32> -> vector<8x512xf32>
    %353 = arith.addf %351, %352 : vector<8x512xf32>
    %354 = vector.extract_strided_slice %353 {offsets = [0, 0], sizes = [8, 384], strides = [1, 1]} : vector<8x512xf32> to vector<8x384xf32>
    %cst_102 = arith.constant 5.000000e-01 : f32
    %355 = vector.broadcast %cst_102 : f32 to vector<8x384xf32>
    %356 = arith.mulf %355, %354 : vector<8x384xf32>
    %357 = math.tanh %356 : vector<8x384xf32>
    %cst_103 = arith.constant 1.000000e+00 : f32
    %358 = vector.broadcast %cst_103 : f32 to vector<8x384xf32>
    %359 = arith.addf %357, %358 : vector<8x384xf32>
    %cst_104 = arith.constant 5.000000e-01 : f32
    %360 = vector.broadcast %cst_104 : f32 to vector<8x384xf32>
    %361 = arith.mulf %360, %359 : vector<8x384xf32>
    %362 = vector.extract_strided_slice %353 {offsets = [0, 384], sizes = [8, 128], strides = [1, 1]} : vector<8x512xf32> to vector<8x128xf32>
    %363 = math.tanh %362 : vector<8x128xf32>
    %364 = vector.extract_strided_slice %361 {offsets = [0, 0], sizes = [8, 128], strides = [1, 1]} : vector<8x384xf32> to vector<8x128xf32>
    %365 = vector.extract_strided_slice %361 {offsets = [0, 128], sizes = [8, 128], strides = [1, 1]} : vector<8x384xf32> to vector<8x128xf32>
    %366 = vector.extract_strided_slice %361 {offsets = [0, 256], sizes = [8, 128], strides = [1, 1]} : vector<8x384xf32> to vector<8x128xf32>
    %367 = arith.mulf %365, %322 : vector<8x128xf32>
    %368 = arith.mulf %364, %363 : vector<8x128xf32>
    %369 = arith.addf %367, %368 : vector<8x128xf32>
    %370 = math.tanh %369 : vector<8x128xf32>
    %371 = arith.mulf %366, %370 : vector<8x128xf32>
    %372 = tpu.concatenate %371, %345 in 1 : vector<8x128xf32>, vector<8x128xf32> -> vector<8x256xf32>
    %cst_105 = arith.constant dense<0.000000e+00> : vector<8x512xf32>
    %373 = tpu.matmul %372, %11, %cst_105 {dimension_numbers = #tpu.dot_dimension_numbers<[1], [0], [0], [1], [0, 0, 1, 1], [], []>} : vector<8x256xf32>, vector<256x512xf32>, vector<8x512xf32> -> vector<8x512xf32>
    %374 = arith.addf %373, %14 : vector<8x512xf32>
    %375 = vector.extract_strided_slice %374 {offsets = [0, 0], sizes = [8, 384], strides = [1, 1]} : vector<8x512xf32> to vector<8x384xf32>
    %cst_106 = arith.constant 5.000000e-01 : f32
    %376 = vector.broadcast %cst_106 : f32 to vector<8x384xf32>
    %377 = arith.mulf %376, %375 : vector<8x384xf32>
    %378 = math.tanh %377 : vector<8x384xf32>
    %cst_107 = arith.constant 1.000000e+00 : f32
    %379 = vector.broadcast %cst_107 : f32 to vector<8x384xf32>
    %380 = arith.addf %378, %379 : vector<8x384xf32>
    %cst_108 = arith.constant 5.000000e-01 : f32
    %381 = vector.broadcast %cst_108 : f32 to vector<8x384xf32>
    %382 = arith.mulf %381, %380 : vector<8x384xf32>
    %383 = vector.extract_strided_slice %374 {offsets = [0, 384], sizes = [8, 128], strides = [1, 1]} : vector<8x512xf32> to vector<8x128xf32>
    %384 = math.tanh %383 : vector<8x128xf32>
    %385 = vector.extract_strided_slice %382 {offsets = [0, 0], sizes = [8, 128], strides = [1, 1]} : vector<8x384xf32> to vector<8x128xf32>
    %386 = vector.extract_strided_slice %382 {offsets = [0, 128], sizes = [8, 128], strides = [1, 1]} : vector<8x384xf32> to vector<8x128xf32>
    %387 = vector.extract_strided_slice %382 {offsets = [0, 256], sizes = [8, 128], strides = [1, 1]} : vector<8x384xf32> to vector<8x128xf32>
    %388 = arith.mulf %386, %343 : vector<8x128xf32>
    %389 = arith.mulf %385, %384 : vector<8x128xf32>
    %390 = arith.addf %388, %389 : vector<8x128xf32>
    %391 = math.tanh %390 : vector<8x128xf32>
    %392 = arith.mulf %387, %391 : vector<8x128xf32>
    %393 = arith.index_cast %349 : i32 to index
    %c0_109 = arith.constant 0 : index
    %394 = vector.load %arg19[%393, %c0_109] : memref<64x128xf32, #tpu.memory_space<vmem>>, vector<8x128xf32>
    tpu.vector_store %arg19[%393, %c0_109], %392 {strides = array<i32>} : memref<64x128xf32, #tpu.memory_space<vmem>>, vector<8x128xf32>,
    %c8_i32_110 = arith.constant 8 : i32
    %c0_111 = arith.constant 0 : index
    %c0_112 = arith.constant 0 : index
    %395 = vector.load %arg14[%c0_111, %c0_112] : memref<8x128xf32, #tpu.memory_space<vmem>>, vector<8x128xf32>
    tpu.vector_store %arg14[%c0_111, %c0_112], %371 {strides = array<i32>} : memref<8x128xf32, #tpu.memory_space<vmem>>, vector<8x128xf32>,
    %c0_113 = arith.constant 0 : index
    %c0_114 = arith.constant 0 : index
    %396 = vector.load %arg15[%c0_113, %c0_114] : memref<8x128xf32, #tpu.memory_space<vmem>>, vector<8x128xf32>
    tpu.vector_store %arg15[%c0_113, %c0_114], %369 {strides = array<i32>} : memref<8x128xf32, #tpu.memory_space<vmem>>, vector<8x128xf32>,
    %c0_115 = arith.constant 0 : index
    %c0_116 = arith.constant 0 : index
    %397 = vector.load %arg16[%c0_115, %c0_116] : memref<8x128xf32, #tpu.memory_space<vmem>>, vector<8x128xf32>
    tpu.vector_store %arg16[%c0_115, %c0_116], %392 {strides = array<i32>} : memref<8x128xf32, #tpu.memory_space<vmem>>, vector<8x128xf32>,
    %c0_117 = arith.constant 0 : index
    %c0_118 = arith.constant 0 : index
    %398 = vector.load %arg17[%c0_117, %c0_118] : memref<8x128xf32, #tpu.memory_space<vmem>>, vector<8x128xf32>
    tpu.vector_store %arg17[%c0_117, %c0_118], %390 {strides = array<i32>} : memref<8x128xf32, #tpu.memory_space<vmem>>, vector<8x128xf32>,
    %c0_119 = arith.constant 0 : index
    %c0_120 = arith.constant 0 : index
    %399 = vector.load %arg19[%c0_119, %c0_120] : memref<64x128xf32, #tpu.memory_space<vmem>>, vector<64x128xf32>
    %c0_121 = arith.constant 0 : index
    %c0_122 = arith.constant 0 : index
    %400 = vector.load %arg7[%c0_121, %c0_122] : memref<128x128xf32, #tpu.memory_space<vmem>>, vector<128x128xf32>
    %cst_123 = arith.constant dense<0.000000e+00> : vector<64x128xf32>
    %401 = tpu.matmul %399, %400, %cst_123 {dimension_numbers = #tpu.dot_dimension_numbers<[1], [0], [0], [1], [0, 0, 1, 1], [], []>} : vector<64x128xf32>, vector<128x128xf32>, vector<64x128xf32> -> vector<64x128xf32>
    %c0_124 = arith.constant 0 : index
    %c0_125 = arith.constant 0 : index
    %402 = vector.load %arg8[%c0_124, %c0_125] : memref<1x128xf32, #tpu.memory_space<vmem>>, vector<1x128xf32>
    %403 = vector.broadcast %402 : vector<1x128xf32> to vector<64x128xf32>
    %404 = arith.addf %401, %403 : vector<64x128xf32>
    %cst_126 = arith.constant 0.000000e+00 : f32
    %405 = vector.broadcast %cst_126 : f32 to vector<64x128xf32>
    %406 = arith.maximumf %404, %405 : vector<64x128xf32>
    %c0_127 = arith.constant 0 : index
    %c0_128 = arith.constant 0 : index
    %407 = vector.load %arg9[%c0_127, %c0_128] : memref<128x64xf32, #tpu.memory_space<vmem>>, vector<128x64xf32>
    %cst_129 = arith.constant dense<0.000000e+00> : vector<64x64xf32>
    %408 = tpu.matmul %406, %407, %cst_129 {dimension_numbers = #tpu.dot_dimension_numbers<[1], [0], [0], [1], [0, 0, 1, 1], [], []>} : vector<64x128xf32>, vector<128x64xf32>, vector<64x64xf32> -> vector<64x64xf32>
    %c0_130 = arith.constant 0 : index
    %c0_131 = arith.constant 0 : index
    %409 = vector.load %arg10[%c0_130, %c0_131] : memref<1x64xf32, #tpu.memory_space<vmem>>, vector<1x64xf32>
    %410 = vector.broadcast %409 : vector<1x64xf32> to vector<64x64xf32>
    %411 = arith.addf %408, %410 : vector<64x64xf32>
    %cst_132 = arith.constant 0.000000e+00 : f32
    %412 = vector.broadcast %cst_132 : f32 to vector<64x64xf32>
    %413 = arith.maximumf %411, %412 : vector<64x64xf32>
    %c0_133 = arith.constant 0 : index
    %c0_134 = arith.constant 0 : index
    %414 = vector.load %arg11[%c0_133, %c0_134] : memref<64x128xf32, #tpu.memory_space<vmem>>, vector<64x128xf32>
    %cst_135 = arith.constant dense<0.000000e+00> : vector<64x128xf32>
    %415 = tpu.matmul %413, %414, %cst_135 {dimension_numbers = #tpu.dot_dimension_numbers<[1], [0], [0], [1], [0, 0, 1, 1], [], []>} : vector<64x64xf32>, vector<64x128xf32>, vector<64x128xf32> -> vector<64x128xf32>
    %c0_136 = arith.constant 0 : index
    %c0_137 = arith.constant 0 : index
    %416 = vector.load %arg12[%c0_136, %c0_137] : memref<1x128xf32, #tpu.memory_space<vmem>>, vector<1x128xf32>
    %417 = vector.broadcast %416 : vector<1x128xf32> to vector<64x128xf32>
    %418 = arith.addf %415, %417 : vector<64x128xf32>
    %c0_138 = arith.constant 0 : index
    %c0_139 = arith.constant 0 : index
    %419 = vector.load %arg13[%c0_138, %c0_139] : memref<64x128xf32, #tpu.memory_space<vmem>>, vector<64x128xf32>
    tpu.vector_store %arg13[%c0_138, %c0_139], %418 {strides = array<i32>} : memref<64x128xf32, #tpu.memory_space<vmem>>, vector<64x128xf32>,
    return
  }
  func.func @transform_0(%arg0: i32) -> (i32, i32) {
    %c0_i32 = arith.constant 0 : i32
    %c0_i32_0 = arith.constant 0 : i32
    return %arg0, %c0_i32 : i32, i32
  }
  func.func @transform_1(%arg0: i32) -> (i32, i32) {
    %c0_i32 = arith.constant 0 : i32
    %c0_i32_0 = arith.constant 0 : i32
    %c0_i32_1 = arith.constant 0 : i32
    return %c0_i32, %c0_i32_0 : i32, i32
  }
  func.func @transform_2(%arg0: i32) -> (i32, i32) {
    %c0_i32 = arith.constant 0 : i32
    %c0_i32_0 = arith.constant 0 : i32
    %c0_i32_1 = arith.constant 0 : i32
    return %c0_i32, %c0_i32_0 : i32, i32
  }
  func.func @transform_3(%arg0: i32) -> (i32, i32) {
    %c0_i32 = arith.constant 0 : i32
    %c0_i32_0 = arith.constant 0 : i32
    %c0_i32_1 = arith.constant 0 : i32
    return %c0_i32, %c0_i32_0 : i32, i32
  }
  func.func @transform_4(%arg0: i32) -> (i32, i32) {
    %c0_i32 = arith.constant 0 : i32
    %c0_i32_0 = arith.constant 0 : i32
    %c0_i32_1 = arith.constant 0 : i32
    return %c0_i32, %c0_i32_0 : i32, i32
  }
  func.func @transform_5(%arg0: i32) -> (i32, i32) {
    %c0_i32 = arith.constant 0 : i32
    %c0_i32_0 = arith.constant 0 : i32
    %c0_i32_1 = arith.constant 0 : i32
    return %c0_i32, %c0_i32_0 : i32, i32
  }
  func.func @transform_6(%arg0: i32) -> (i32, i32) {
    %c0_i32 = arith.constant 0 : i32
    %c0_i32_0 = arith.constant 0 : i32
    %c0_i32_1 = arith.constant 0 : i32
    return %c0_i32, %c0_i32_0 : i32, i32
  }
  func.func @transform_7(%arg0: i32) -> (i32, i32) {
    %c0_i32 = arith.constant 0 : i32
    %c0_i32_0 = arith.constant 0 : i32
    %c0_i32_1 = arith.constant 0 : i32
    return %c0_i32, %c0_i32_0 : i32, i32
  }
  func.func @transform_8(%arg0: i32) -> (i32, i32) {
    %c0_i32 = arith.constant 0 : i32
    %c0_i32_0 = arith.constant 0 : i32
    %c0_i32_1 = arith.constant 0 : i32
    return %c0_i32, %c0_i32_0 : i32, i32
  }
  func.func @transform_9(%arg0: i32) -> (i32, i32) {
    %c0_i32 = arith.constant 0 : i32
    %c0_i32_0 = arith.constant 0 : i32
    %c0_i32_1 = arith.constant 0 : i32
    return %c0_i32, %c0_i32_0 : i32, i32
  }
  func.func @transform_10(%arg0: i32) -> (i32, i32) {
    %c0_i32 = arith.constant 0 : i32
    %c0_i32_0 = arith.constant 0 : i32
    %c0_i32_1 = arith.constant 0 : i32
    return %c0_i32, %c0_i32_0 : i32, i32
  }
  func.func @transform_11(%arg0: i32) -> (i32, i32) {
    %c0_i32 = arith.constant 0 : i32
    %c0_i32_0 = arith.constant 0 : i32
    %c0_i32_1 = arith.constant 0 : i32
    return %c0_i32, %c0_i32_0 : i32, i32
  }
  func.func @transform_12(%arg0: i32) -> (i32, i32) {
    %c0_i32 = arith.constant 0 : i32
    %c0_i32_0 = arith.constant 0 : i32
    return %arg0, %c0_i32 : i32, i32
  }
}

</mosaic_0001>

<bundles_post_ra>
// kernel: pos_model_forward.1
= control target key start
LH: loop header
LB: loop body
LE: loop exit
PB: predicated region body
PF: predicated region fallthrough
CT: control target
= control target key end

     0   :  { %17 = vsyncpa [#allocation9], 0  ;;  %s7415_s0 = inlined_call_operand.vmem [shape: f32[64,32], index: 0, kind: input, shape index: {}]   ;;  %s7416_s1 = inlined_call_operand.vmem [shape: f32[32,512], index: 1, kind: input, shape index: {}]   ;;  %s7417_s2 = inlined_call_operand.hbm [shape: f32[128,512], index: 2, kind: input, shape index: {}]   ;;  %s7418_s3 = inlined_call_operand.vmem [shape: f32[1,512], index: 3, kind: input, shape index: {}]   ;;  %s7419_s4 = inlined_call_operand.hbm [shape: f32[256,512], index: 4, kind: input, shape index: {}]   ;;  %s7420_s5 = inlined_call_operand.vmem [shape: f32[1,512], index: 5, kind: input, shape index: {}]   ;;  %s7421_s6 = inlined_call_operand.vmem [shape: f32[128,128], index: 6, kind: input, shape index: {}]   ;;  %s7422_s7 = inlined_call_operand.vmem [shape: f32[1,128], index: 7, kind: input, shape index: {}]   ;;  %s7423_s8 = inlined_call_operand.vmem [shape: f32[128,64], index: 8, kind: input, shape index: {}]   ;;  %s7424_s9 = inlined_call_operand.vmem [shape: f32[1,64], index: 9, kind: input, shape index: {}]   ;;  %s7425_s10 = inlined_call_operand.vmem [shape: f32[64,128], index: 10, kind: input, shape index: {}]   ;;  %s7426_s11 = inlined_call_operand.vmem [shape: f32[1,128], index: 11, kind: input, shape index: {}]   ;;  %s7427_s12 = inlined_call_operand.vmem [shape: f32[64,128], index: 12, kind: output, shape index: {}]  }
   0x1   :  { %18 = vsyncpa [#allocation11], 0  ;;  %s5861_s21 = smov [#allocation8]   ;;  %s5813_s25 = scalar_lea.hbm %s7417_s2, 8192 }
   0x2   :  { %s28_s22 = sshll.u32 %s5861_s21, 4  ;;  %p5814_p0 = scmp.ne.s32.totalorder %s7417_s2, %s5813_s25  ;;  %s29_s22 = int_to_ptr.vmem [resolvable:$true] %s28_s22 }
   0x3   :  { %p5817_p1 = scmp.lt.u32.totalorder %s5813_s25, %s7417_s2 }
   0x5   :  { %p5819_p2 = pnand %p5817_p1, %p5814_p0 }
   0x7   :  { %5822 = shalt.err (!%p5819_p2)
}
   0x8   :  { %s5823_s30 = scalar_lea.vmem %s29_s22, 8192  ;;  %p5828_p4 = scmp.lt.s32.totalorder %s29_s22, %s29_s22 }
   0x9   :  { %p5824_p3 = scmp.ne.s32.totalorder %s29_s22, %s5823_s30  ;;  %p5829_p5 = scmp.lt.s32.totalorder %s5823_s30, %s5823_s30 }
   0xb   :  { %p5830_p6 = por %p5829_p5, %p5828_p4 }
   0xd   :  { %p5831_p7 = pnand %p5830_p6, %p5824_p3 }
   0xf   :  { %5834 = shalt.err (!%p5831_p7)
}
  0x10   :  { %s5862_s13 = smov 512   ;;  %s5863_s14 = smov 32  }
  0x11   :  { %34 = dma.hbm_to_vmem [thread:$0]  %s7417_s2, 8192, %s29_s22, [#allocation9], %s5862_s13, %s5862_s13, %s5863_s14  }
  0x12   :  { %s5864_s17 = smov [#allocation10]   ;;  %s5835_s21 = scalar_lea.hbm %s7419_s4, 16384 }
  0x13   :  { %s42_s18 = sshll.u32 %s5864_s17, 4  ;;  %p5836_p8 = scmp.ne.s32.totalorder %s7419_s4, %s5835_s21  ;;  %s43_s18 = int_to_ptr.vmem [resolvable:$true] %s42_s18 }
  0x14   :  { %p5839_p9 = scmp.lt.u32.totalorder %s5835_s21, %s7419_s4 }
  0x16   :  { %p5841_p10 = pnand %p5839_p9, %p5836_p8 }
  0x18   :  { %5844 = shalt.err (!%p5841_p10)
}
  0x19   :  { %s5845_s27 = scalar_lea.vmem %s43_s18, 16384  ;;  %p5850_p12 = scmp.lt.s32.totalorder %s43_s18, %s43_s18 }
  0x1a   :  { %p5846_p11 = scmp.ne.s32.totalorder %s43_s18, %s5845_s27  ;;  %p5851_p13 = scmp.lt.s32.totalorder %s5845_s27, %s5845_s27 }
  0x1c   :  { %p5852_p0 = por %p5851_p13, %p5850_p12 }
  0x1e   :  { %p5853_p1 = pnand %p5852_p0, %p5846_p11 }
  0x20   :  { %5856 = shalt.err (!%p5853_p1)
}
  0x21   :  { %48 = dma.hbm_to_vmem [thread:$0]  %s7419_s4, 16384, %s43_s18, [#allocation11], %s5862_s13, %s5862_s13, %s5863_s14  }
  0x22   :  { %5857 = dma.done.wait [#allocation9], 8192  }
  0x23   :  { %5858 = vsyncadd [#allocation9], 4294959104 }
  0x24   :  { %5859 = dma.done.wait [#allocation11], 16384  }
  0x25   :  { %5860 = vsyncadd [#allocation11], 4294950912  ;;  %v7428_v0 = vmov 0.0   ;;  %v86_v1 = vld [vmem:[%s7416_s1 + $0x8] sm:$0xff]  ;;  %v88_v3 = vld [vmem:[%s7416_s1 + $0x18] sm:$0xff]  ;;  %vm123_vm0 = vcmask 261120  }
  0x26   :  { %212 = vmatprep.mubr.f32.mxu0 %v7428_v0  ;;  %325 = vmatprep.mubr.f32.mxu1 %v7428_v0  ;;  %v90_v2 = vld [vmem:[%s7416_s1 + $0x28] sm:$0xff]  ;;  %v92_v5 = vld [vmem:[%s7416_s1 + $0x38] sm:$0xff]  ;;  %v85_v6 = vld [vmem:[%s7416_s1] sm:$0xff]  ;;  %vm3586_vm1 = vcmask 523264  }
  0x27   :  { %v3944_v4 = vpack.c.bf16 %v90_v2, %v86_v1  ;;  %v89_v7 = vld [vmem:[%s7416_s1 + $0x20] sm:$0xff]  ;;  %v3952_v8 = vpack.c.bf16 %v92_v5, %v88_v3  ;;  %v87_v10 = vld [vmem:[%s7416_s1 + $0x10] sm:$0xff]  ;;  %v94_v12 = vld [vmem:[%s7416_s1 + $0x48] sm:$0xff] }
  0x28   :  { %v3946_v9 = vpack.c.bf16 %v89_v7, %v85_v6  ;;  %v91_v11 = vld [vmem:[%s7416_s1 + $0x30] sm:$0xff]  ;;  %v98_v14 = vld [vmem:[%s7416_s1 + $0x68] sm:$0xff]  ;;  %v96_v15 = vld [vmem:[%s7416_s1 + $0x58] sm:$0xff] }
  0x29   :  { %3945 = vmatprep.subr.bf16.mxu0 %v3944_v4  ;;  %v3954_v13 = vpack.c.bf16 %v91_v11, %v87_v10  ;;  %v100_v16 = vld [vmem:[%s7416_s1 + $0x78] sm:$0xff]  ;;  %3953 = vmatprep.subr.bf16.mxu1 %v3952_v8  ;;  %v3948_v17 = vpack.c.bf16 %v98_v14, %v94_v12  ;;  %v93_v19 = vld [vmem:[%s7416_s1 + $0x40] sm:$0xff]  ;;  %v95_v21 = vld [vmem:[%s7416_s1 + $0x50] sm:$0xff] }
  0x2a   :  { %3947 = vmatpush1.bf16.msra.mxu0 %v3946_v9  ;;  %v3956_v18 = vpack.c.bf16 %v100_v16, %v96_v15  ;;  %v97_v20 = vld [vmem:[%s7416_s1 + $0x60] sm:$0xff]  ;;  %v99_v23 = vld [vmem:[%s7416_s1 + $0x70] sm:$0xff]  ;;  %v407_v24 = vld [vmem:[#allocation8 + $0x8] sm:$0xff] }
  0x2b   :  { %3955 = vmatpush1.bf16.msra.mxu1 %v3954_v13  ;;  %v3950_v22 = vpack.c.bf16 %v97_v20, %v93_v19  ;;  %3949 = vmatprep.subr.bf16.mxu0 %v3948_v17  ;;  %v3958_v25 = vpack.c.bf16 %v99_v23, %v95_v21  ;;  %v411_v26 = vld [vmem:[#allocation8 + $0x28] sm:$0xff]  ;;  %v409_v27 = vld [vmem:[#allocation8 + $0x18] sm:$0xff]  ;;  %v406_v31 = vld [vmem:[#allocation8] sm:$0xff] }
  0x2c   :  { %3957 = vmatprep.subr.bf16.mxu1 %v3956_v18  ;;  %v413_v28 = vld [vmem:[#allocation8 + $0x38] sm:$0xff]  ;;  %v6005_v29 = vpack.c.bf16 %v411_v26, %v407_v24  ;;  %v410_v32 = vld [vmem:[#allocation8 + $0x20] sm:$0xff]  ;;  %v408_v33 = vld [vmem:[#allocation8 + $0x10] sm:$0xff] }
  0x2d   :  { %v6007_v30 = vpack.c.bf16 %v413_v28, %v409_v27  ;;  %v77_v34 = vld [vmem:[%s7415_s0] sm:$0xff]  ;;  %v6012_v35 = vpack.c.bf16 %v410_v32, %v406_v31  ;;  %v412_v36 = vld [vmem:[#allocation8 + $0x30] sm:$0xff]  ;;  %v415_v37 = vld [vmem:[#allocation8 + $0x48] sm:$0xff] }
  0x2e   :  { %7571 = vst [vmem:[#allocation14_spill] sm:$0xff] %v6005_v29  ;;  %3951 = vmatpush1.bf16.msra.mxu0 %v3950_v22  ;;  %v6015_v38 = vpack.c.bf16 %v412_v36, %v408_v33  ;;  %v419_v39 = vld [vmem:[#allocation8 + $0x68] sm:$0xff]  ;;  %v417_v40 = vld [vmem:[#allocation8 + $0x58] sm:$0xff]  ;;  %v414_v43 = vld [vmem:[#allocation8 + $0x40] sm:$0xff] }
  0x2f   :  { %7572 = vst [vmem:[#allocation15_spill] sm:$0xff] %v6007_v30  ;;  %3959 = vmatpush1.bf16.msra.mxu1 %v3958_v25  ;;  %3961 = vmatprep.subr.bf16.mxu0 %v6005_v29  ;;  %v421_v41 = vld [vmem:[#allocation8 + $0x78] sm:$0xff]  ;;  %v6018_v42 = vpack.c.bf16 %v419_v39, %v415_v37  ;;  %v418_v44 = vld [vmem:[#allocation8 + $0x60] sm:$0xff]  ;;  %v416_v45 = vld [vmem:[#allocation8 + $0x50] sm:$0xff] }
  0x30   :  { %3993 = vmatprep.subr.bf16.mxu1 %v6007_v30  ;;  %v78_v46 = vld [vmem:[%s7415_s0 + $0x8] sm:$0xff]  ;;  %v6024_v47 = vpack.c.bf16 %v421_v41, %v417_v40  ;;  %v420_v48 = vld [vmem:[#allocation8 + $0x70] sm:$0xff]  ;;  %v6028_v50 = vpack.c.bf16 %v418_v44, %v414_v43  ;;  %v425_v52 = vld [vmem:[#allocation8 + $0x98] sm:$0xff] }
  0x31   :  { %3737 = vmatmul.mubr.msk.f32.vlgmr.msra.gmra.mrb[0].mxu0 %vm123_vm0, %v77_v34  ;;  %v423_v49 = vld [vmem:[#allocation8 + $0x88] sm:$0xff]  ;;  %v429_v53 = vld [vmem:[#allocation8 + $0xb8] sm:$0xff]  ;;  %v6032_v54 = vpack.c.bf16 %v420_v48, %v416_v45  ;;  %v422_v55 = vld [vmem:[#allocation8 + $0x80] sm:$0xff] }
  0x32   :  { %3745 = vmatmul.mubr.msk.f32.vlgmr.msra.gmra.mrb[0].mxu1 %vm123_vm0, %v77_v34  ;;  %3963 = vmatpush1.bf16.msra.mxu0 %v6012_v35  ;;  %v427_v51 = vld [vmem:[#allocation8 + $0xa8] sm:$0xff]  ;;  %v426_v56 = vld [vmem:[#allocation8 + $0xa0] sm:$0xff]  ;;  %v424_v58 = vld [vmem:[#allocation8 + $0x90] sm:$0xff]  ;;  %v6040_v60 = vpack.c.bf16 %v429_v53, %v425_v52 }
  0x33   :  { %3995 = vmatpush1.bf16.msra.mxu1 %v6015_v38  ;;  %218 = vmatprep.mubr.f32.mxu0 %v7428_v0  ;;  %v6036_v57 = vpack.c.bf16 %v427_v51, %v423_v49  ;;  %v428_v59 = vld [vmem:[#allocation8 + $0xb0] sm:$0xff]  ;;  %v431_v61 = vld [vmem:[#allocation8 + $0xc8] sm:$0xff]  ;;  %v6047_v1 = vpack.c.bf16 %v426_v56, %v422_v55  ;;  %v433_v2 = vld [vmem:[#allocation8 + $0xd8] sm:$0xff] }
  0x34   :  { %331 = vmatprep.mubr.f32.mxu1 %v7428_v0  ;;  %3965 = vmatprep.subr.bf16.mxu0 %v6018_v42  ;;  %v435_v62 = vld [vmem:[#allocation8 + $0xe8] sm:$0xff]  ;;  %v79_v63 = vld [vmem:[%s7415_s0 + $0x10] sm:$0xff]  ;;  %v437_v3 = vld [vmem:[#allocation8 + $0xf8] sm:$0xff]  ;;  %v6051_v4 = vpack.c.bf16 %v428_v59, %v424_v58 }
  0x35   :  { %3738 = vmatmul.mubr.msk.f32.gmra.mrb[2].mxu0 %vm123_vm0, %v78_v46  ;;  %3997 = vmatprep.subr.bf16.mxu1 %v6024_v47  ;;  %v430_v5 = vld [vmem:[#allocation8 + $0xc0] sm:$0xff]  ;;  %v6055_v7 = vpack.c.bf16 %v435_v62, %v431_v61  ;;  %v432_v8 = vld [vmem:[#allocation8 + $0xd0] sm:$0xff]  ;;  %v6059_v10 = vpack.c.bf16 %v437_v3, %v433_v2  ;;  %v439_v11 = vld [vmem:[#allocation8 + $0x108] sm:$0xff] }
  0x36   :  { %3746 = vmatmul.mubr.msk.f32.gmra.mrb[2].mxu1 %vm123_vm0, %v78_v46  ;;  %3967 = vmatpush1.bf16.msra.mxu0 %v6028_v50  ;;  %v434_v6 = vld [vmem:[#allocation8 + $0xe0] sm:$0xff]  ;;  %v436_v9 = vld [vmem:[#allocation8 + $0xf0] sm:$0xff]  ;;  %v443_v12 = vld [vmem:[#allocation8 + $0x128] sm:$0xff] }
  0x37   :  { %3999 = vmatpush1.bf16.msra.mxu1 %v6032_v54  ;;  %224 = vmatprep.mubr.f32.mxu0 %v7428_v0  ;;  %v80_v13 = vld [vmem:[%s7415_s0 + $0x18] sm:$0xff]  ;;  %v6066_v14 = vpack.c.bf16 %v434_v6, %v430_v5  ;;  %v6070_v17 = vpack.c.bf16 %v436_v9, %v432_v8  ;;  %v438_v18 = vld [vmem:[#allocation8 + $0x100] sm:$0xff]  ;;  %v6074_v20 = vpack.c.bf16 %v443_v12, %v439_v11  ;;  %v440_v21 = vld [vmem:[#allocation8 + $0x110] sm:$0xff] }
  0x38   :  { %337 = vmatprep.mubr.f32.mxu1 %v7428_v0  ;;  %3969 = vmatprep.subr.bf16.mxu0 %v6036_v57  ;;  %v441_v15 = vld [vmem:[#allocation8 + $0x118] sm:$0xff]  ;;  %v442_v19 = vld [vmem:[#allocation8 + $0x120] sm:$0xff]  ;;  %v444_v22 = vld [vmem:[#allocation8 + $0x130] sm:$0xff] }
  0x39   :  { %3739 = vmatmul.mubr.msk.f32.gmra.mrb[4].mxu0 %vm123_vm0, %v79_v63  ;;  %4001 = vmatprep.subr.bf16.mxu1 %v6040_v60  ;;  %v445_v16 = vld [vmem:[#allocation8 + $0x138] sm:$0xff]  ;;  %v447_v24 = vld [vmem:[#allocation8 + $0x148] sm:$0xff]  ;;  %v81_v26 = vld [vmem:[%s7415_s0 + $0x20] sm:$0xff]  ;;  %v6085_v27 = vpack.c.bf16 %v442_v19, %v438_v18  ;;  %v6089_v32 = vpack.c.bf16 %v444_v22, %v440_v21 }
  0x3a   :  { %3747 = vmatmul.mubr.msk.f32.gmra.mrb[4].mxu1 %vm123_vm0, %v79_v63  ;;  %3971 = vmatpush1.bf16.msra.mxu0 %v6047_v1  ;;  %v6078_v23 = vpack.c.bf16 %v445_v16, %v441_v15  ;;  %v451_v25 = vld [vmem:[#allocation8 + $0x168] sm:$0xff]  ;;  %v449_v28 = vld [vmem:[#allocation8 + $0x158] sm:$0xff]  ;;  %v446_v33 = vld [vmem:[#allocation8 + $0x140] sm:$0xff] }
  0x3b   :  { %4003 = vmatpush1.bf16.msra.mxu1 %v6051_v4  ;;  %230 = vmatprep.mubr.f32.mxu0 %v7428_v0  ;;  %v453_v31 = vld [vmem:[#allocation8 + $0x178] sm:$0xff]  ;;  %v450_v34 = vld [vmem:[#allocation8 + $0x160] sm:$0xff]  ;;  %v6093_v36 = vpack.c.bf16 %v451_v25, %v447_v24  ;;  %v448_v37 = vld [vmem:[#allocation8 + $0x150] sm:$0xff] }
  0x3c   :  { %343 = vmatprep.mubr.f32.mxu1 %v7428_v0  ;;  %3973 = vmatprep.subr.bf16.mxu0 %v6055_v7  ;;  %v452_v39 = vld [vmem:[#allocation8 + $0x170] sm:$0xff]  ;;  %v6097_v40 = vpack.c.bf16 %v453_v31, %v449_v28  ;;  %v455_v41 = vld [vmem:[#allocation8 + $0x188] sm:$0xff]  ;;  %v6104_v45 = vpack.c.bf16 %v450_v34, %v446_v33  ;;  %v457_v46 = vld [vmem:[#allocation8 + $0x198] sm:$0xff] }
  0x3d   :  { %3740 = vmatmul.mubr.msk.f32.gmra.mrb[6].mxu0 %vm123_vm0, %v80_v13  ;;  %4005 = vmatprep.subr.bf16.mxu1 %v6059_v10  ;;  %v459_v43 = vld [vmem:[#allocation8 + $0x1a8] sm:$0xff]  ;;  %v461_v48 = vld [vmem:[#allocation8 + $0x1b8] sm:$0xff]  ;;  %v6108_v49 = vpack.c.bf16 %v452_v39, %v448_v37  ;;  %v454_v51 = vld [vmem:[#allocation8 + $0x180] sm:$0xff] }
  0x3e   :  { %3748 = vmatmul.mubr.msk.f32.gmra.mrb[6].mxu1 %vm123_vm0, %v80_v13  ;;  %3975 = vmatpush1.bf16.msra.mxu0 %v6066_v14  ;;  %v82_v44 = vld [vmem:[%s7415_s0 + $0x28] sm:$0xff]  ;;  %v458_v52 = vld [vmem:[#allocation8 + $0x1a0] sm:$0xff]  ;;  %v6112_v53 = vpack.c.bf16 %v459_v43, %v455_v41  ;;  %v456_v55 = vld [vmem:[#allocation8 + $0x190] sm:$0xff]  ;;  %v6116_v58 = vpack.c.bf16 %v461_v48, %v457_v46 }
  0x3f   :  { %4007 = vmatpush1.bf16.msra.mxu1 %v6070_v17  ;;  %236 = vmatprep.mubr.f32.mxu0 %v7428_v0  ;;  %v460_v56 = vld [vmem:[#allocation8 + $0x1b0] sm:$0xff]  ;;  %v463_v59 = vld [vmem:[#allocation8 + $0x1c8] sm:$0xff]  ;;  %v6123_v63 = vpack.c.bf16 %v458_v52, %v454_v51  ;;  %v465_v2 = vld [vmem:[#allocation8 + $0x1d8] sm:$0xff] }
  0x40   :  { %349 = vmatprep.mubr.f32.mxu1 %v7428_v0  ;;  %3977 = vmatprep.subr.bf16.mxu0 %v6074_v20  ;;  %v467_v61 = vld [vmem:[#allocation8 + $0x1e8] sm:$0xff]  ;;  %v83_v62 = vld [vmem:[%s7415_s0 + $0x30] sm:$0xff]  ;;  %v469_v3 = vld [vmem:[#allocation8 + $0x1f8] sm:$0xff]  ;;  %v6127_v5 = vpack.c.bf16 %v460_v56, %v456_v55 }
  0x41   :  { %3741 = vmatmul.mubr.msk.f32.gmra.mrb[8].mxu0 %vm123_vm0, %v81_v26  ;;  %4009 = vmatprep.subr.bf16.mxu1 %v6078_v23  ;;  %v462_v6 = vld [vmem:[#allocation8 + $0x1c0] sm:$0xff]  ;;  %v6131_v9 = vpack.c.bf16 %v467_v61, %v463_v59  ;;  %v464_v11 = vld [vmem:[#allocation8 + $0x1d0] sm:$0xff]  ;;  %v6135_v13 = vpack.c.bf16 %v469_v3, %v465_v2  ;;  %v471_v15 = vld [vmem:[#allocation10 + $0x8] sm:$0xff] }
  0x42   :  { %3749 = vmatmul.mubr.msk.f32.gmra.mrb[8].mxu1 %vm123_vm0, %v81_v26  ;;  %3979 = vmatpush1.bf16.msra.mxu0 %v6085_v27  ;;  %v466_v8 = vld [vmem:[#allocation8 + $0x1e0] sm:$0xff]  ;;  %v468_v12 = vld [vmem:[#allocation8 + $0x1f0] sm:$0xff]  ;;  %v475_v16 = vld [vmem:[#allocation10 + $0x28] sm:$0xff] }
  0x43   :  { %4011 = vmatpush1.bf16.msra.mxu1 %v6089_v32  ;;  %242 = vmatprep.mubr.f32.mxu0 %v7428_v0  ;;  %v84_v18 = vld [vmem:[%s7415_s0 + $0x38] sm:$0xff]  ;;  %v6142_v19 = vpack.c.bf16 %v466_v8, %v462_v6  ;;  %v6146_v24 = vpack.c.bf16 %v468_v12, %v464_v11  ;;  %v470_v25 = vld [vmem:[#allocation10] sm:$0xff]  ;;  %v472_v28 = vld [vmem:[#allocation10 + $0x10] sm:$0xff]  ;;  %v6150_v31 = vpack.c.bf16 %v475_v16, %v471_v15 }
  0x44   :  { %355 = vmatprep.mubr.f32.mxu1 %v7428_v0  ;;  %3981 = vmatprep.subr.bf16.mxu0 %v6093_v36  ;;  %v473_v21 = vld [vmem:[#allocation10 + $0x18] sm:$0xff]  ;;  %v474_v26 = vld [vmem:[#allocation10 + $0x20] sm:$0xff]  ;;  %v476_v33 = vld [vmem:[#allocation10 + $0x30] sm:$0xff] }
  0x45   :  { %3742 = vmatmul.mubr.msk.f32.gmra.mrb[10].mxu0 %vm123_vm0, %v82_v44  ;;  %4013 = vmatprep.subr.bf16.mxu1 %v6097_v40  ;;  %v477_v22 = vld [vmem:[#allocation10 + $0x38] sm:$0xff]  ;;  %v479_v34 = vld [vmem:[#allocation10 + $0x48] sm:$0xff]  ;;  %v6162_v46 = vpack.c.bf16 %v476_v33, %v472_v28  ;;  %v478_v51 = vld [vmem:[#allocation10 + $0x40] sm:$0xff] }
  0x46   :  { %3750 = vmatmul.mubr.msk.f32.gmra.mrb[10].mxu1 %vm123_vm0, %v82_v44  ;;  %3983 = vmatpush1.bf16.msra.mxu0 %v6104_v45  ;;  %v483_v37 = vld [vmem:[#allocation10 + $0x68] sm:$0xff]  ;;  %v6154_v39 = vpack.c.bf16 %v477_v22, %v473_v21  ;;  %v481_v41 = vld [vmem:[#allocation10 + $0x58] sm:$0xff]  ;;  %v6158_v44 = vpack.c.bf16 %v474_v26, %v470_v25  ;;  %v482_v52 = vld [vmem:[#allocation10 + $0x60] sm:$0xff] }
  0x47   :  { %4015 = vmatpush1.bf16.msra.mxu1 %v6108_v49  ;;  %248 = vmatprep.mubr.f32.mxu0 %v7428_v0  ;;  %v485_v43 = vld [vmem:[#allocation10 + $0x78] sm:$0xff]  ;;  %v6164_v48 = vpack.c.bf16 %v483_v37, %v479_v34  ;;  %v480_v55 = vld [vmem:[#allocation10 + $0x50] sm:$0xff]  ;;  %v487_v61 = vld [vmem:[#allocation10 + $0x88] sm:$0xff]  ;;  %v6174_v6 = vpack.c.bf16 %v482_v52, %v478_v51 }
  0x48   :  { %361 = vmatprep.mubr.f32.mxu1 %v7428_v0  ;;  %3985 = vmatprep.subr.bf16.mxu0 %v6112_v53  ;;  %v6168_v56 = vpack.c.bf16 %v485_v43, %v481_v41  ;;  %v484_v59 = vld [vmem:[#allocation10 + $0x70] sm:$0xff]  ;;  %v489_v2 = vld [vmem:[#allocation10 + $0x98] sm:$0xff]  ;;  %v486_v12 = vld [vmem:[#allocation10 + $0x80] sm:$0xff] }
  0x49   :  { %3743 = vmatmul.mubr.msk.f32.gmra.mrb[12].mxu0 %vm123_vm0, %v83_v62  ;;  %4017 = vmatprep.subr.bf16.mxu1 %v6116_v58  ;;  %v493_v3 = vld [vmem:[#allocation10 + $0xb8] sm:$0xff]  ;;  %7573 = vst [vmem:[#allocation16_spill] sm:$0xff] %v6174_v6  ;;  %v6178_v8 = vpack.c.bf16 %v484_v59, %v480_v55  ;;  %v490_v15 = vld [vmem:[#allocation10 + $0xa0] sm:$0xff]  ;;  %v488_v16 = vld [vmem:[#allocation10 + $0x90] sm:$0xff] }
  0x4a   :  { %3751 = vmatmul.mubr.msk.f32.gmra.mrb[12].mxu1 %vm123_vm0, %v83_v62  ;;  %3987 = vmatpush1.bf16.msra.mxu0 %v6123_v63  ;;  %v491_v62 = vld [vmem:[#allocation10 + $0xa8] sm:$0xff]  ;;  %v492_v21 = vld [vmem:[#allocation10 + $0xb0] sm:$0xff]  ;;  %v497_v26 = vld [vmem:[#allocation10 + $0xd8] sm:$0xff]  ;;  %v6188_v33 = vpack.c.bf16 %v490_v15, %v486_v12 }
  0x4b   :  { %4019 = vmatpush1.bf16.msra.mxu1 %v6127_v5  ;;  %254 = vmatprep.mubr.f32.mxu0 %v7428_v0  ;;  %7574 = vst [vmem:[#allocation17_spill] sm:$0xff] %v6178_v8  ;;  %v6180_v11 = vpack.c.bf16 %v491_v62, %v487_v61  ;;  %v495_v22 = vld [vmem:[#allocation10 + $0xc8] sm:$0xff]  ;;  %v501_v28 = vld [vmem:[#allocation10 + $0xf8] sm:$0xff]  ;;  %v6192_v34 = vpack.c.bf16 %v492_v21, %v488_v16  ;;  %v494_v41 = vld [vmem:[#allocation10 + $0xc0] sm:$0xff] }
  0x4c   :  { %367 = vmatprep.mubr.f32.mxu1 %v7428_v0  ;;  %3989 = vmatprep.subr.bf16.mxu0 %v6131_v9  ;;  %v499_v25 = vld [vmem:[#allocation10 + $0xe8] sm:$0xff]  ;;  %7577 = vst [vmem:[#allocation20_spill] sm:$0xff] %v6188_v33  ;;  %v498_v43 = vld [vmem:[#allocation10 + $0xe0] sm:$0xff]  ;;  %v496_v51 = vld [vmem:[#allocation10 + $0xd0] sm:$0xff]  ;;  %v6197_v52 = vpack.c.bf16 %v501_v28, %v497_v26 }
  0x4d   :  { %3744 = vmatmul.mubr.msk.f32.gmra.mrb[14].mxu0 %vm123_vm0, %v84_v18  ;;  %4021 = vmatprep.subr.bf16.mxu1 %v6135_v13  ;;  %7575 = vst [vmem:[#allocation18_spill] sm:$0xff] %v6180_v11  ;;  %7578 = vst [vmem:[#allocation21_spill] sm:$0xff] %v6192_v34  ;;  %v6194_v37 = vpack.c.bf16 %v499_v25, %v495_v22  ;;  %v500_v55 = vld [vmem:[#allocation10 + $0xf0] sm:$0xff]  ;;  %v503_v59 = vld [vmem:[#allocation10 + $0x108] sm:$0xff] }
  0x4e   :  { %3752 = vmatmul.mubr.msk.f32.gmra.mrb[14].mxu1 %vm123_vm0, %v84_v18  ;;  %3991 = vmatpush1.bf16.msra.mxu0 %v6142_v19  ;;  %v6183_v18 = vpack.c.bf16 %v493_v3, %v489_v2  ;;  %7580 = vst [vmem:[#allocation23_spill] sm:$0xff] %v6197_v52  ;;  %v507_v61 = vld [vmem:[#allocation10 + $0x128] sm:$0xff]  ;;  %v505_v62 = vld [vmem:[#allocation10 + $0x118] sm:$0xff]  ;;  %v6200_v3 = vpack.c.bf16 %v498_v43, %v494_v41  ;;  %v502_v16 = vld [vmem:[#allocation10 + $0x100] sm:$0xff] }
  0x4f   :  { %4023 = vmatpush1.bf16.msra.mxu1 %v6146_v24  ;;  %695 = vmatprep.mubr.f32.mxu0 %v7428_v0  ;;  %7579 = vst [vmem:[#allocation22_spill] sm:$0xff] %v6194_v37  ;;  %v509_v2 = vld [vmem:[#allocation10 + $0x138] sm:$0xff]  ;;  %v6204_v12 = vpack.c.bf16 %v500_v55, %v496_v51  ;;  %v6206_v15 = vpack.c.bf16 %v507_v61, %v503_v59  ;;  %v506_v21 = vld [vmem:[#allocation10 + $0x120] sm:$0xff]  ;;  %v504_v22 = vld [vmem:[#allocation10 + $0x110] sm:$0xff] }
  0x50   :  { %766 = vmatprep.mubr.f32.mxu1 %v7428_v0  ;;  %4025 = vmatprep.subr.bf16.mxu0 %v6150_v31  ;;  %7576 = vst [vmem:[#allocation19_spill] sm:$0xff] %v6183_v18  ;;  %7581 = vst [vmem:[#allocation24_spill] sm:$0xff] %v6200_v3  ;;  %v6209_v25 = vpack.c.bf16 %v509_v2, %v505_v62  ;;  %v508_v26 = vld [vmem:[#allocation10 + $0x130] sm:$0xff]  ;;  %v511_v28 = vld [vmem:[#allocation10 + $0x148] sm:$0xff] }
  0x51   :  { %696 = vmatmul.mubr.f32.vlgmr.msra.gmra.mrb[0].mxu0 %v7428_v0  ;;  %4089 = vmatprep.subr.bf16.mxu1 %v6154_v39  ;;  %7582 = vst [vmem:[#allocation25_spill] sm:$0xff] %v6204_v12  ;;  %7583 = vst [vmem:[#allocation26_spill] sm:$0xff] %v6206_v15  ;;  %v513_v41 = vld [vmem:[#allocation10 + $0x158] sm:$0xff]  ;;  %v6216_v51 = vpack.c.bf16 %v508_v26, %v504_v22  ;;  %v510_v59 = vld [vmem:[#allocation10 + $0x140] sm:$0xff] }
  0x52   :  { %767 = vmatmul.mubr.f32.vlgmr.msra.gmra.mrb[0].mxu1 %v7428_v0  ;;  %4027 = vmatpush1.bf16.msra.mxu0 %v6158_v44  ;;  %7584 = vst [vmem:[#allocation27_spill] sm:$0xff] %v6209_v25  ;;  %v517_v43 = vld [vmem:[#allocation10 + $0x178] sm:$0xff]  ;;  %v514_v61 = vld [vmem:[#allocation10 + $0x160] sm:$0xff]  ;;  %v512_v62 = vld [vmem:[#allocation10 + $0x150] sm:$0xff] }
  0x53   :  { %4091 = vmatpush1.bf16.msra.mxu1 %v6162_v46  ;;  %4029 = vmatprep.subr.bf16.mxu0 %v6164_v48  ;;  %7586 = vst [vmem:[#allocation29_spill] sm:$0xff] %v6216_v51  ;;  %v6221_v2 = vpack.c.bf16 %v517_v43, %v513_v41  ;;  %v518_v26 = vld [vmem:[#allocation10 + $0x180] sm:$0xff]  ;;  %v520_v43 = vld [vmem:[#allocation10 + $0x190] sm:$0xff] }
  0x54   :  { %4093 = vmatprep.subr.bf16.mxu1 %v6168_v56  ;;  %859 = vmatprep.mubr.f32.mxu0 %v7428_v0 }
  0x55   :  { %930 = vmatprep.mubr.f32.mxu1 %v7428_v0  ;;  %v515_v0 = vld [vmem:[#allocation10 + $0x168] sm:$0xff]  ;;  %7588 = vst [vmem:[#allocation31_spill] sm:$0xff] %v6221_v2 }
  0x56   :  { %4031 = vmatpush1.bf16.msra.mxu0 %v6174_v6  ;;  %v6218_v55 = vpack.c.bf16 %v515_v0, %v511_v28  ;;  %v522_v28 = vld [vmem:[#allocation10 + $0x1a0] sm:$0xff] }
  0x57   :  { %4095 = vmatpush1.bf16.msra.mxu1 %v6178_v8  ;;  %4033 = vmatprep.subr.bf16.mxu0 %v6180_v11 }
  0x58   :  { %4097 = vmatprep.subr.bf16.mxu1 %v6183_v18  ;;  %7587 = vst [vmem:[#allocation30_spill] sm:$0xff] %v6218_v55 }
  0x5a   :  { %4035 = vmatpush1.bf16.msra.mxu0 %v6188_v33 }
  0x5b   :  { %4099 = vmatpush1.bf16.msra.mxu1 %v6192_v34  ;;  %4037 = vmatprep.subr.bf16.mxu0 %v6194_v37  ;;  %v6212_v34 = vpack.c.bf16 %v506_v21, %v502_v16  ;;  %v519_v37 = vld [vmem:[#allocation10 + $0x188] sm:$0xff]  ;;  %v521_v16 = vld [vmem:[#allocation10 + $0x198] sm:$0xff] }
  0x5c   :  { %4101 = vmatprep.subr.bf16.mxu1 %v6197_v52  ;;  %v516_v52 = vld [vmem:[#allocation10 + $0x170] sm:$0xff]  ;;  %v525_v21 = vld [vmem:[#allocation10 + $0x1b8] sm:$0xff] }
  0x5d   :  { %7585 = vst [vmem:[#allocation28_spill] sm:$0xff] %v6212_v34  ;;  %v6228_v0 = vpack.c.bf16 %v516_v52, %v512_v62  ;;  %v6233_v41 = vpack.c.bf16 %v525_v21, %v521_v16  ;;  %v533_v16 = vld [vmem:[#allocation10 + $0x1f8] sm:$0xff]  ;;  %v526_v21 = vld [vmem:[#allocation10 + $0x1c0] sm:$0xff] }
  0x5e   :  { %4039 = vmatpush1.bf16.msra.mxu0 %v6200_v3  ;;  %v523_v3 = vld [vmem:[#allocation10 + $0x1a8] sm:$0xff] }
  0x5f   :  { %4103 = vmatpush1.bf16.msra.mxu1 %v6204_v12  ;;  %4041 = vmatprep.subr.bf16.mxu0 %v6206_v15  ;;  %v6224_v12 = vpack.c.bf16 %v514_v61, %v510_v59  ;;  %7590 = vst [vmem:[#allocation33_spill] sm:$0xff] %v6228_v0  ;;  %v6230_v22 = vpack.c.bf16 %v523_v3, %v519_v37  ;;  %7592 = vst [vmem:[#allocation35_spill] sm:$0xff] %v6233_v41  ;;  %v527_v37 = vld [vmem:[#allocation10 + $0x1c8] sm:$0xff]  ;;  %v529_v61 = vld [vmem:[#allocation10 + $0x1d8] sm:$0xff] }
  0x60   :  { %4105 = vmatprep.subr.bf16.mxu1 %v6209_v25  ;;  %v524_v25 = vld [vmem:[#allocation10 + $0x1b0] sm:$0xff]  ;;  %v6236_v59 = vpack.c.bf16 %v522_v28, %v518_v26  ;;  %v531_v3 = vld [vmem:[#allocation10 + $0x1e8] sm:$0xff]  ;;  %v530_v26 = vld [vmem:[#allocation10 + $0x1e0] sm:$0xff]  ;;  %v6247_v28 = vpack.c.bf16 %v533_v16, %v529_v61 }
  0x61   :  { %7589 = vst [vmem:[#allocation32_spill] sm:$0xff] %v6224_v12  ;;  %7591 = vst [vmem:[#allocation34_spill] sm:$0xff] %v6230_v22  ;;  %v6240_v52 = vpack.c.bf16 %v524_v25, %v520_v43  ;;  %v6245_v62 = vpack.c.bf16 %v531_v3, %v527_v37  ;;  %v528_v25 = vld [vmem:[#allocation10 + $0x1d0] sm:$0xff]  ;;  %v539_v37 = vld [vmem:[#allocation10 + $0x228] sm:$0xff] }
  0x62   :  { %4043 = vmatpush1.bf16.msra.mxu0 %v6212_v34  ;;  %7593 = vst [vmem:[#allocation36_spill] sm:$0xff] %v6236_v59  ;;  %7596 = vst [vmem:[#allocation39_spill] sm:$0xff] %v6247_v28  ;;  %v532_v43 = vld [vmem:[#allocation10 + $0x1f0] sm:$0xff]  ;;  %v537_v3 = vld [vmem:[#allocation10 + $0x218] sm:$0xff] }
  0x63   :  { %4107 = vmatpush1.bf16.msra.mxu1 %v6216_v51  ;;  %4045 = vmatprep.subr.bf16.mxu0 %v6218_v55  ;;  %7594 = vst [vmem:[#allocation37_spill] sm:$0xff] %v6240_v52  ;;  %7595 = vst [vmem:[#allocation38_spill] sm:$0xff] %v6245_v62  ;;  %v541_v61 = vld [vmem:[#allocation10 + $0x238] sm:$0xff]  ;;  %v534_v16 = vld [vmem:[#allocation10 + $0x200] sm:$0xff] }
  0x64   :  { %4109 = vmatprep.subr.bf16.mxu1 %v6221_v2  ;;  %v589_v2 = vld [vmem:[#allocation10 + $0x3b8] sm:$0xff] }
  0x66   :  { %4047 = vmatpush1.bf16.msra.mxu0 %v6224_v12  ;;  %v585_v12 = vld [vmem:[#allocation10 + $0x398] sm:$0xff] }
  0x67   :  { %4111 = vmatpush1.bf16.msra.mxu1 %v6228_v0  ;;  %4049 = vmatprep.subr.bf16.mxu0 %v6230_v22  ;;  %v6249_v0 = vpack.c.bf16 %v530_v26, %v526_v21  ;;  %v538_v21 = vld [vmem:[#allocation10 + $0x220] sm:$0xff]  ;;  %v6259_v26 = vpack.c.bf16 %v541_v61, %v537_v3  ;;  %v549_v3 = vld [vmem:[#allocation10 + $0x278] sm:$0xff] }
  0x68   :  { %4113 = vmatprep.subr.bf16.mxu1 %v6233_v41  ;;  %v6252_v41 = vpack.c.bf16 %v532_v43, %v528_v25  ;;  %v6261_v22 = vpack.c.bf16 %v538_v21, %v534_v16  ;;  %v536_v25 = vld [vmem:[#allocation10 + $0x210] sm:$0xff]  ;;  %v542_v61 = vld [vmem:[#allocation10 + $0x240] sm:$0xff] }
  0x69   :  { %7597 = vst [vmem:[#allocation40_spill] sm:$0xff] %v6249_v0  ;;  %7600 = vst [vmem:[#allocation43_spill] sm:$0xff] %v6259_v26  ;;  %v540_v43 = vld [vmem:[#allocation10 + $0x230] sm:$0xff]  ;;  %v546_v16 = vld [vmem:[#allocation10 + $0x260] sm:$0xff] }
  0x6a   :  { %4051 = vmatpush1.bf16.msra.mxu0 %v6236_v59  ;;  %7598 = vst [vmem:[#allocation41_spill] sm:$0xff] %v6252_v41  ;;  %7601 = vst [vmem:[#allocation44_spill] sm:$0xff] %v6261_v22 }
  0x6b   :  { %4115 = vmatpush1.bf16.msra.mxu1 %v6240_v52  ;;  %4053 = vmatprep.subr.bf16.mxu0 %v6245_v62  ;;  %v535_v52 = vld [vmem:[#allocation10 + $0x208] sm:$0xff]  ;;  %v6273_v62 = vpack.c.bf16 %v546_v16, %v542_v61  ;;  %v554_v61 = vld [vmem:[#allocation10 + $0x2a0] sm:$0xff] }
  0x6c   :  { %4117 = vmatprep.subr.bf16.mxu1 %v6247_v28  ;;  %v6257_v59 = vpack.c.bf16 %v539_v37, %v535_v52  ;;  %v6264_v28 = vpack.c.bf16 %v540_v43, %v536_v25  ;;  %v547_v52 = vld [vmem:[#allocation10 + $0x268] sm:$0xff]  ;;  %v545_v37 = vld [vmem:[#allocation10 + $0x258] sm:$0xff]  ;;  %v544_v25 = vld [vmem:[#allocation10 + $0x250] sm:$0xff] }
  0x6d   :  { %v6271_v21 = vpack.c.bf16 %v549_v3, %v545_v37  ;;  %7605 = vst [vmem:[#allocation48_spill] sm:$0xff] %v6273_v62  ;;  %v548_v43 = vld [vmem:[#allocation10 + $0x270] sm:$0xff]  ;;  %v557_v37 = vld [vmem:[#allocation10 + $0x2b8] sm:$0xff]  ;;  %v550_v3 = vld [vmem:[#allocation10 + $0x280] sm:$0xff] }
  0x6e   :  { %4055 = vmatpush1.bf16.msra.mxu0 %v6249_v0  ;;  %7599 = vst [vmem:[#allocation42_spill] sm:$0xff] %v6257_v59  ;;  %7602 = vst [vmem:[#allocation45_spill] sm:$0xff] %v6264_v28 }
  0x6f   :  { %4119 = vmatpush1.bf16.msra.mxu1 %v6252_v41  ;;  %4057 = vmatprep.subr.bf16.mxu0 %v6257_v59  ;;  %v543_v41 = vld [vmem:[#allocation10 + $0x248] sm:$0xff]  ;;  %7604 = vst [vmem:[#allocation47_spill] sm:$0xff] %v6271_v21  ;;  %v6285_v59 = vpack.c.bf16 %v554_v61, %v550_v3  ;;  %v562_v3 = vld [vmem:[#allocation10 + $0x2e0] sm:$0xff] }
  0x70   :  { %4121 = vmatprep.subr.bf16.mxu1 %v6259_v26  ;;  %v6269_v0 = vpack.c.bf16 %v547_v52, %v543_v41  ;;  %v6276_v26 = vpack.c.bf16 %v548_v43, %v544_v25  ;;  %v555_v41 = vld [vmem:[#allocation10 + $0x2a8] sm:$0xff]  ;;  %v553_v52 = vld [vmem:[#allocation10 + $0x298] sm:$0xff]  ;;  %v552_v25 = vld [vmem:[#allocation10 + $0x290] sm:$0xff] }
  0x71   :  { %v6283_v16 = vpack.c.bf16 %v557_v37, %v553_v52  ;;  %7609 = vst [vmem:[#allocation52_spill] sm:$0xff] %v6285_v59  ;;  %v556_v43 = vld [vmem:[#allocation10 + $0x2b0] sm:$0xff]  ;;  %v565_v52 = vld [vmem:[#allocation10 + $0x2f8] sm:$0xff]  ;;  %v558_v37 = vld [vmem:[#allocation10 + $0x2c0] sm:$0xff] }
  0x72   :  { %4059 = vmatpush1.bf16.msra.mxu0 %v6261_v22  ;;  %7603 = vst [vmem:[#allocation46_spill] sm:$0xff] %v6269_v0  ;;  %7606 = vst [vmem:[#allocation49_spill] sm:$0xff] %v6276_v26 }
  0x73   :  { %4123 = vmatpush1.bf16.msra.mxu1 %v6264_v28  ;;  %4061 = vmatprep.subr.bf16.mxu0 %v6269_v0  ;;  %v551_v28 = vld [vmem:[#allocation10 + $0x288] sm:$0xff]  ;;  %7608 = vst [vmem:[#allocation51_spill] sm:$0xff] %v6283_v16  ;;  %v6297_v0 = vpack.c.bf16 %v562_v3, %v558_v37  ;;  %v570_v37 = vld [vmem:[#allocation10 + $0x320] sm:$0xff] }
  0x74   :  { %4125 = vmatprep.subr.bf16.mxu1 %v6271_v21  ;;  %v6281_v22 = vpack.c.bf16 %v555_v41, %v551_v28  ;;  %v6288_v21 = vpack.c.bf16 %v556_v43, %v552_v25  ;;  %v563_v28 = vld [vmem:[#allocation10 + $0x2e8] sm:$0xff]  ;;  %v561_v41 = vld [vmem:[#allocation10 + $0x2d8] sm:$0xff]  ;;  %v560_v25 = vld [vmem:[#allocation10 + $0x2d0] sm:$0xff] }
  0x75   :  { %v6295_v61 = vpack.c.bf16 %v565_v52, %v561_v41  ;;  %7613 = vst [vmem:[#allocation56_spill] sm:$0xff] %v6297_v0  ;;  %v564_v43 = vld [vmem:[#allocation10 + $0x2f0] sm:$0xff]  ;;  %v573_v41 = vld [vmem:[#allocation10 + $0x338] sm:$0xff]  ;;  %v566_v52 = vld [vmem:[#allocation10 + $0x300] sm:$0xff] }
  0x76   :  { %4063 = vmatpush1.bf16.msra.mxu0 %v6273_v62  ;;  %7607 = vst [vmem:[#allocation50_spill] sm:$0xff] %v6281_v22  ;;  %7610 = vst [vmem:[#allocation53_spill] sm:$0xff] %v6288_v21 }
  0x77   :  { %4127 = vmatpush1.bf16.msra.mxu1 %v6276_v26  ;;  %4065 = vmatprep.subr.bf16.mxu0 %v6281_v22  ;;  %v559_v26 = vld [vmem:[#allocation10 + $0x2c8] sm:$0xff]  ;;  %7612 = vst [vmem:[#allocation55_spill] sm:$0xff] %v6295_v61  ;;  %v6309_v22 = vpack.c.bf16 %v570_v37, %v566_v52  ;;  %v578_v52 = vld [vmem:[#allocation10 + $0x360] sm:$0xff] }
  0x78   :  { %4129 = vmatprep.subr.bf16.mxu1 %v6283_v16  ;;  %v6293_v62 = vpack.c.bf16 %v563_v28, %v559_v26  ;;  %v6300_v16 = vpack.c.bf16 %v564_v43, %v560_v25  ;;  %v571_v26 = vld [vmem:[#allocation10 + $0x328] sm:$0xff]  ;;  %v569_v28 = vld [vmem:[#allocation10 + $0x318] sm:$0xff]  ;;  %v568_v25 = vld [vmem:[#allocation10 + $0x310] sm:$0xff] }
  0x79   :  { %v6307_v3 = vpack.c.bf16 %v573_v41, %v569_v28  ;;  %7617 = vst [vmem:[#allocation60_spill] sm:$0xff] %v6309_v22  ;;  %v572_v43 = vld [vmem:[#allocation10 + $0x330] sm:$0xff]  ;;  %v581_v28 = vld [vmem:[#allocation10 + $0x378] sm:$0xff]  ;;  %v574_v41 = vld [vmem:[#allocation10 + $0x340] sm:$0xff] }
  0x7a   :  { %4067 = vmatpush1.bf16.msra.mxu0 %v6285_v59  ;;  %7611 = vst [vmem:[#allocation54_spill] sm:$0xff] %v6293_v62  ;;  %7614 = vst [vmem:[#allocation57_spill] sm:$0xff] %v6300_v16 }
  0x7b   :  { %4131 = vmatpush1.bf16.msra.mxu1 %v6288_v21  ;;  %4069 = vmatprep.subr.bf16.mxu0 %v6293_v62  ;;  %v567_v21 = vld [vmem:[#allocation10 + $0x308] sm:$0xff]  ;;  %7616 = vst [vmem:[#allocation59_spill] sm:$0xff] %v6307_v3  ;;  %v6321_v62 = vpack.c.bf16 %v578_v52, %v574_v41  ;;  %v584_v41 = vld [vmem:[#allocation10 + $0x390] sm:$0xff] }
  0x7c   :  { %4133 = vmatprep.subr.bf16.mxu1 %v6295_v61  ;;  %v6305_v59 = vpack.c.bf16 %v571_v26, %v567_v21  ;;  %v6312_v61 = vpack.c.bf16 %v572_v43, %v568_v25  ;;  %v579_v21 = vld [vmem:[#allocation10 + $0x368] sm:$0xff]  ;;  %v577_v26 = vld [vmem:[#allocation10 + $0x358] sm:$0xff]  ;;  %v576_v25 = vld [vmem:[#allocation10 + $0x350] sm:$0xff] }
  0x7d   :  { %v6319_v37 = vpack.c.bf16 %v581_v28, %v577_v26  ;;  %7621 = vst [vmem:[#allocation64_spill] sm:$0xff] %v6321_v62  ;;  %v580_v43 = vld [vmem:[#allocation10 + $0x370] sm:$0xff]  ;;  %v582_v26 = vld [vmem:[#allocation10 + $0x380] sm:$0xff] }
  0x7e   :  { %4071 = vmatpush1.bf16.msra.mxu0 %v6297_v0  ;;  %7615 = vst [vmem:[#allocation58_spill] sm:$0xff] %v6305_v59  ;;  %7618 = vst [vmem:[#allocation61_spill] sm:$0xff] %v6312_v61  ;;  %v586_v28 = vld [vmem:[#allocation10 + $0x3a0] sm:$0xff] }
  0x7f   :  { %4135 = vmatpush1.bf16.msra.mxu1 %v6300_v16  ;;  %4073 = vmatprep.subr.bf16.mxu0 %v6305_v59  ;;  %v575_v16 = vld [vmem:[#allocation10 + $0x348] sm:$0xff]  ;;  %7620 = vst [vmem:[#allocation63_spill] sm:$0xff] %v6319_v37  ;;  %v6333_v52 = vpack.c.bf16 %v586_v28, %v582_v26  ;;  %v596_v26 = vld [vmem:[#allocation10 + $0x3f0] sm:$0xff] }
  0x80   :  { %4137 = vmatprep.subr.bf16.mxu1 %v6307_v3  ;;  %v6317_v0 = vpack.c.bf16 %v579_v21, %v575_v16  ;;  %v583_v59 = vld [vmem:[#allocation10 + $0x388] sm:$0xff]  ;;  %v6330_v21 = vpack.c.bf16 %v589_v2, %v585_v12  ;;  %v593_v12 = vld [vmem:[#allocation10 + $0x3d8] sm:$0xff] }
  0x81   :  { %v587_v3 = vld [vmem:[#allocation10 + $0x3a8] sm:$0xff]  ;;  %7625 = vst [vmem:[#allocation68_spill] sm:$0xff] %v6333_v52  ;;  %v597_v2 = vld [vmem:[#allocation10 + $0x3f8] sm:$0xff] }
  0x82   :  { %4075 = vmatpush1.bf16.msra.mxu0 %v6309_v22  ;;  %7619 = vst [vmem:[#allocation62_spill] sm:$0xff] %v6317_v0  ;;  %v6324_v22 = vpack.c.bf16 %v580_v43, %v576_v25  ;;  %v6328_v16 = vpack.c.bf16 %v587_v3, %v583_v59  ;;  %7624 = vst [vmem:[#allocation67_spill] sm:$0xff] %v6330_v21  ;;  %v588_v25 = vld [vmem:[#allocation10 + $0x3b0] sm:$0xff]  ;;  %v591_v43 = vld [vmem:[#allocation10 + $0x3c8] sm:$0xff] }
  0x83   :  { %4139 = vmatpush1.bf16.msra.mxu1 %v6312_v61  ;;  %4077 = vmatprep.subr.bf16.mxu0 %v6317_v0  ;;  %v595_v0 = vld [vmem:[#allocation10 + $0x3e8] sm:$0xff]  ;;  %v590_v3 = vld [vmem:[#allocation10 + $0x3c0] sm:$0xff] }
  0x84   :  { %7622 = vst [vmem:[#allocation65_spill] sm:$0xff] %v6324_v22  ;;  %4141 = vmatprep.subr.bf16.mxu1 %v6319_v37  ;;  %7623 = vst [vmem:[#allocation66_spill] sm:$0xff] %v6328_v16  ;;  %v6337_v37 = vpack.c.bf16 %v588_v25, %v584_v41  ;;  %v6339_v59 = vpack.c.bf16 %v595_v0, %v591_v43  ;;  %v594_v61 = vld [vmem:[#allocation10 + $0x3e0] sm:$0xff]  ;;  %v103_v0 = vlaneseq }
  0x85   :  { %v6344_v28 = vpack.c.bf16 %v594_v61, %v590_v3 }
  0x86   :  { %4079 = vmatpush1.bf16.msra.mxu0 %v6321_v62  ;;  %7626 = vst [vmem:[#allocation69_spill] sm:$0xff] %v6337_v37  ;;  %7627 = vst [vmem:[#allocation70_spill] sm:$0xff] %v6339_v59  ;;  %v6341_v62 = vpack.c.bf16 %v597_v2, %v593_v12  ;;  %v6355_v25 = vshrl.u32 %v103_v0, 7 }
  0x87   :  { %4143 = vmatpush1.bf16.msra.mxu1 %v6324_v22  ;;  %4081 = vmatprep.subr.bf16.mxu0 %v6328_v16  ;;  %v592_v22 = vld [vmem:[#allocation10 + $0x3d0] sm:$0xff]  ;;  %7629 = vst [vmem:[#allocation72_spill] sm:$0xff] %v6344_v28 }
  0x88   :  { %4145 = vmatprep.subr.bf16.mxu1 %v6330_v21  ;;  %7628 = vst [vmem:[#allocation71_spill] sm:$0xff] %v6341_v62  ;;  %v6348_v41 = vpack.c.bf16 %v596_v26, %v592_v22  ;;  %v7520_v61 = vsub.s32 0, %v6355_v25  ;;  %v101_v22 = vld [vmem:[%s7418_s3] sm:$0xf]  ;;  %v7527_v43 = vsub.s32 1, %v6355_v25  ;;  %v7530_v2 = vsub.s32 3, %v6355_v25 }
  0x8a   :  { %4083 = vmatpush1.bf16.msra.mxu0 %v6333_v52  ;;  %7630 = vst [vmem:[#allocation73_spill] sm:$0xff] %v6348_v41  ;;  %v6364_v12 = vrot.slane %v101_v22, %v7520_v61  ;;  %v6369_v3 = vrot.slane %v101_v22, %v7527_v43 }
  0x8b   :  { %4147 = vmatpush1.bf16.msra.mxu1 %v6337_v37  ;;  %4085 = vmatprep.subr.bf16.mxu0 %v6339_v59 }
  0x8c   :  { %4149 = vmatprep.subr.bf16.mxu1 %v6341_v62  ;;  %7631 = vst [vmem:[#allocation74_spill] sm:$0xff] %v6364_v12  ;;  %7632 = vst [vmem:[#allocation75_spill] sm:$0xff] %v6369_v3 }
  0x8e   :  { %4087 = vmatpush1.bf16.msra.mxu0 %v6344_v28  ;;  %v7541_v28 = vsub.s32 2, %v6355_v25 }
  0x8f   :  { %4151 = vmatpush1.bf16.msra.mxu1 %v6348_v41  ;;  %4153 = vmatprep.subr.bf16.mxu0 %v6005_v29  ;;  %v6374_v41 = vrot.slane %v101_v22, %v7530_v2 }
  0x90   :  { %4185 = vmatprep.subr.bf16.mxu1 %v6007_v30  ;;  %v6381_v52 = vrot.slane %v101_v22, %v7541_v28 }
 0x124   :  { %v697_v26 = vpop.f32.mrb[0].mxu0 }
 0x125   :  { %v5584_v0 = vadd.f32 %v697_v26, %v6364_v12  ;;  %v768_v30 = vpop.f32.mrb[0].mxu1  ;;  %v699_v29 = vpop.f32.mrb[1].mxu0 }
 0x126   :  { %v5585_v61 = vadd.f32 %v699_v29, %v6369_v3  ;;  %v770_v62 = vpop.f32.mrb[1].mxu1  ;;  %v5600_v26 = vadd.f32 %v768_v30, %v6381_v52 }
 0x127   :  { %v777_v59 = vmul.f32 0.5, %v5584_v0  ;;  %v5601_v43 = vadd.f32 %v770_v62, %v6374_v41 }
 0x128   :  { %v778_v37 = vmul.f32 0.5, %v5585_v61  ;;  %v779_v2 = vmul.f32 0.5, %v5600_v26  ;;  %v7640_v26 = vld [vmem:[#allocation30_spill] sm:$0xff] }
 0x129   :  { %5653 = vtanh.f32 %v777_v59 }
 0x12a   :  { %5655 = vtanh.f32 %v778_v37 }
 0x12b   :  { %5657 = vtanh.f32 %v5601_v43 }
 0x12c   :  { %5659 = vtanh.f32 %v779_v2  ;;  %v7638_v2 = vld [vmem:[#allocation25_spill] sm:$0xff] }
 0x133   :  { %v5654_v12 = vpop.eup %5653 }
 0x134   :  { %v783_v21 = vadd.f32 1.0, %v5654_v12  ;;  %v5656_v16 = vpop.eup %5655  ;;  %v7637_v12 = vld [vmem:[#allocation24_spill] sm:$0xff] }
 0x135   :  { %v784_v29 = vadd.f32 1.0, %v5656_v16  ;;  %v5658_v0 = vpop.eup %5657  ;;  %v7634_v16 = vld [vmem:[#allocation21_spill] sm:$0xff] }
 0x136   :  { %v786_v55 = vmul.f32 0.5, %v783_v21  ;;  %v5660_v22 = vpop.eup %5659  ;;  %v7635_v21 = vld [vmem:[#allocation22_spill] sm:$0xff] }
 0x137   :  { %v787_v61 = vmul.f32 0.5, %v784_v29  ;;  %v785_v37 = vadd.f32 1.0, %v5660_v22  ;;  %v7641_v29 = vld [vmem:[#allocation31_spill] sm:$0xff] }
 0x138   :  { %v791_v59 = vmul.f32 %v5658_v0, %v786_v55  ;;  %v7633_v55 = vmov 0.0   ;;  %v7642_v0 = vld [vmem:[#allocation32_spill] sm:$0xff]  ;;  %v7645_v22 = vld [vmem:[#allocation35_spill] sm:$0xff] }
 0x139   :  { %v790_v3 = vmul.f32 0.0, %v787_v61  ;;  %v788_v43 = vmul.f32 0.5, %v785_v37  ;;  %v7643_v61 = vld [vmem:[#allocation33_spill] sm:$0xff]  ;;  %v7646_v37 = vld [vmem:[#allocation36_spill] sm:$0xff] }
 0x13b   :  { %v6384_v62 = vadd.f32 %v791_v59, %v790_v3  ;;  %v7639_v3 = vld [vmem:[#allocation27_spill] sm:$0xff]  ;;  %v7644_v59 = vld [vmem:[#allocation34_spill] sm:$0xff] }
 0x13d   :  { %5661 = vtanh.f32 %v6384_v62 }
 0x147   :  { %v5662_v28 = vpop.eup %5661 }
 0x148   :  { %v794_v30 = vmul.f32 %v5662_v28, %v788_v43  ;;  %v7636_v28 = vld [vmem:[#allocation23_spill] sm:$0xff]  ;;  %v7647_v43 = vld [vmem:[#allocation37_spill] sm:$0xff] }
 0x14a   :  { %860 = vmatmul.mubr.f32.vlgmr.msra.gmra.mrb[16].mxu0 %v794_v30  ;;  %931 = vmatmul.mubr.f32.vlgmr.msra.gmra.mrb[16].mxu1 %v794_v30 }
 0x14b   :  { %4155 = vmatpush1.bf16.msra.mxu0 %v6012_v35  ;;  %4187 = vmatpush1.bf16.msra.mxu1 %v6015_v38 }
 0x14c   :  { %4157 = vmatprep.subr.bf16.mxu0 %v6018_v42  ;;  %4189 = vmatprep.subr.bf16.mxu1 %v6024_v47 }
 0x14d   :  { %1027 = vmatprep.mubr.f32.mxu0 %v7633_v55  ;;  %1098 = vmatprep.mubr.f32.mxu1 %v7633_v55 }
 0x14f   :  { %4159 = vmatpush1.bf16.msra.mxu0 %v6028_v50  ;;  %4191 = vmatpush1.bf16.msra.mxu1 %v6032_v54 }
 0x150   :  { %4161 = vmatprep.subr.bf16.mxu0 %v6036_v57  ;;  %4193 = vmatprep.subr.bf16.mxu1 %v6040_v60 }
 0x153   :  { %4163 = vmatpush1.bf16.msra.mxu0 %v6047_v1  ;;  %4195 = vmatpush1.bf16.msra.mxu1 %v6051_v4 }
 0x154   :  { %4165 = vmatprep.subr.bf16.mxu0 %v6055_v7  ;;  %4197 = vmatprep.subr.bf16.mxu1 %v6059_v10 }
 0x157   :  { %4167 = vmatpush1.bf16.msra.mxu0 %v6066_v14  ;;  %4199 = vmatpush1.bf16.msra.mxu1 %v6070_v17 }
 0x158   :  { %4169 = vmatprep.subr.bf16.mxu0 %v6074_v20  ;;  %4201 = vmatprep.subr.bf16.mxu1 %v6078_v23 }
 0x15b   :  { %4171 = vmatpush1.bf16.msra.mxu0 %v6085_v27  ;;  %4203 = vmatpush1.bf16.msra.mxu1 %v6089_v32 }
 0x15c   :  { %4173 = vmatprep.subr.bf16.mxu0 %v6093_v36  ;;  %4205 = vmatprep.subr.bf16.mxu1 %v6097_v40 }
 0x15f   :  { %4175 = vmatpush1.bf16.msra.mxu0 %v6104_v45  ;;  %4207 = vmatpush1.bf16.msra.mxu1 %v6108_v49 }
 0x160   :  { %4177 = vmatprep.subr.bf16.mxu0 %v6112_v53  ;;  %4209 = vmatprep.subr.bf16.mxu1 %v6116_v58 }
 0x163   :  { %4179 = vmatpush1.bf16.msra.mxu0 %v6123_v63  ;;  %4211 = vmatpush1.bf16.msra.mxu1 %v6127_v5 }
 0x164   :  { %4181 = vmatprep.subr.bf16.mxu0 %v6131_v9  ;;  %4213 = vmatprep.subr.bf16.mxu1 %v6135_v13 }
 0x167   :  { %4183 = vmatpush1.bf16.msra.mxu0 %v6142_v19  ;;  %4215 = vmatpush1.bf16.msra.mxu1 %v6146_v24 }
 0x168   :  { %4217 = vmatprep.subr.bf16.mxu0 %v6150_v31  ;;  %4281 = vmatprep.subr.bf16.mxu1 %v6154_v39 }
 0x16a   :  { %1028 = vmatmul.mubr.f32.vlgmr.msra.gmra.mrb[2].mxu0 %v794_v30  ;;  %1099 = vmatmul.mubr.f32.vlgmr.msra.gmra.mrb[2].mxu1 %v794_v30  ;;  %v7648_v30 = vld [vmem:[#allocation38_spill] sm:$0xff] }
 0x16b   :  { %4219 = vmatpush1.bf16.msra.mxu0 %v6158_v44  ;;  %4283 = vmatpush1.bf16.msra.mxu1 %v6162_v46 }
 0x16c   :  { %4221 = vmatprep.subr.bf16.mxu0 %v6164_v48  ;;  %4285 = vmatprep.subr.bf16.mxu1 %v6168_v56 }
 0x16f   :  { %4223 = vmatpush1.bf16.msra.mxu0 %v6174_v6  ;;  %4287 = vmatpush1.bf16.msra.mxu1 %v6178_v8 }
 0x170   :  { %4225 = vmatprep.subr.bf16.mxu0 %v6180_v11  ;;  %4289 = vmatprep.subr.bf16.mxu1 %v6183_v18 }
 0x173   :  { %4227 = vmatpush1.bf16.msra.mxu0 %v6188_v33  ;;  %4291 = vmatpush1.bf16.msra.mxu1 %v7634_v16 }
 0x174   :  { %4229 = vmatprep.subr.bf16.mxu0 %v7635_v21  ;;  %4293 = vmatprep.subr.bf16.mxu1 %v7636_v28 }
 0x177   :  { %4231 = vmatpush1.bf16.msra.mxu0 %v7637_v12  ;;  %4295 = vmatpush1.bf16.msra.mxu1 %v7638_v2 }
 0x178   :  { %4233 = vmatprep.subr.bf16.mxu0 %v6206_v15  ;;  %4297 = vmatprep.subr.bf16.mxu1 %v7639_v3 }
 0x17b   :  { %4235 = vmatpush1.bf16.msra.mxu0 %v6212_v34  ;;  %4299 = vmatpush1.bf16.msra.mxu1 %v6216_v51  ;;  %v7649_v34 = vld [vmem:[#allocation39_spill] sm:$0xff]  ;;  %v7650_v51 = vld [vmem:[#allocation40_spill] sm:$0xff] }
 0x17c   :  { %4237 = vmatprep.subr.bf16.mxu0 %v7640_v26  ;;  %4301 = vmatprep.subr.bf16.mxu1 %v7641_v29  ;;  %v7651_v26 = vld [vmem:[#allocation41_spill] sm:$0xff]  ;;  %v7652_v29 = vld [vmem:[#allocation42_spill] sm:$0xff] }
 0x17f   :  { %4239 = vmatpush1.bf16.msra.mxu0 %v7642_v0  ;;  %4303 = vmatpush1.bf16.msra.mxu1 %v7643_v61  ;;  %v7653_v0 = vld [vmem:[#allocation43_spill] sm:$0xff]  ;;  %v7654_v61 = vld [vmem:[#allocation44_spill] sm:$0xff] }
 0x180   :  { %4241 = vmatprep.subr.bf16.mxu0 %v7644_v59  ;;  %4305 = vmatprep.subr.bf16.mxu1 %v7645_v22  ;;  %v7655_v59 = vld [vmem:[#allocation45_spill] sm:$0xff]  ;;  %v7656_v22 = vld [vmem:[#allocation46_spill] sm:$0xff] }
 0x183   :  { %4243 = vmatpush1.bf16.msra.mxu0 %v7646_v37  ;;  %4307 = vmatpush1.bf16.msra.mxu1 %v7647_v43  ;;  %v7657_v37 = vld [vmem:[#allocation47_spill] sm:$0xff]  ;;  %v7658_v43 = vld [vmem:[#allocation48_spill] sm:$0xff] }
 0x184   :  { %4245 = vmatprep.subr.bf16.mxu0 %v7648_v30  ;;  %4309 = vmatprep.subr.bf16.mxu1 %v7649_v34  ;;  %v7659_v30 = vld [vmem:[#allocation49_spill] sm:$0xff]  ;;  %v7660_v34 = vld [vmem:[#allocation50_spill] sm:$0xff] }
 0x187   :  { %4247 = vmatpush1.bf16.msra.mxu0 %v7650_v51  ;;  %4311 = vmatpush1.bf16.msra.mxu1 %v7651_v26  ;;  %v7661_v51 = vld [vmem:[#allocation51_spill] sm:$0xff]  ;;  %v7662_v26 = vld [vmem:[#allocation52_spill] sm:$0xff] }
 0x188   :  { %4249 = vmatprep.subr.bf16.mxu0 %v7652_v29  ;;  %4313 = vmatprep.subr.bf16.mxu1 %v7653_v0  ;;  %v7663_v29 = vld [vmem:[#allocation53_spill] sm:$0xff]  ;;  %v7664_v0 = vld [vmem:[#allocation54_spill] sm:$0xff] }
 0x18b   :  { %4251 = vmatpush1.bf16.msra.mxu0 %v7654_v61  ;;  %4315 = vmatpush1.bf16.msra.mxu1 %v7655_v59  ;;  %v7665_v61 = vld [vmem:[#allocation55_spill] sm:$0xff]  ;;  %v7666_v59 = vld [vmem:[#allocation56_spill] sm:$0xff] }
 0x18c   :  { %4253 = vmatprep.subr.bf16.mxu0 %v7656_v22  ;;  %4317 = vmatprep.subr.bf16.mxu1 %v7657_v37  ;;  %v7667_v22 = vld [vmem:[#allocation57_spill] sm:$0xff]  ;;  %v7668_v37 = vld [vmem:[#allocation58_spill] sm:$0xff] }
 0x18f   :  { %4255 = vmatpush1.bf16.msra.mxu0 %v7658_v43  ;;  %4319 = vmatpush1.bf16.msra.mxu1 %v7659_v30  ;;  %v7669_v43 = vld [vmem:[#allocation59_spill] sm:$0xff]  ;;  %v7670_v30 = vld [vmem:[#allocation60_spill] sm:$0xff] }
 0x190   :  { %4257 = vmatprep.subr.bf16.mxu0 %v7660_v34  ;;  %4321 = vmatprep.subr.bf16.mxu1 %v7661_v51  ;;  %v7671_v34 = vld [vmem:[#allocation61_spill] sm:$0xff]  ;;  %v7672_v51 = vld [vmem:[#allocation62_spill] sm:$0xff] }
 0x193   :  { %4259 = vmatpush1.bf16.msra.mxu0 %v7662_v26  ;;  %4323 = vmatpush1.bf16.msra.mxu1 %v7663_v29  ;;  %v7673_v26 = vld [vmem:[#allocation63_spill] sm:$0xff]  ;;  %v7674_v29 = vld [vmem:[#allocation64_spill] sm:$0xff] }
 0x194   :  { %4261 = vmatprep.subr.bf16.mxu0 %v7664_v0  ;;  %4325 = vmatprep.subr.bf16.mxu1 %v7665_v61  ;;  %v7675_v0 = vld [vmem:[#allocation65_spill] sm:$0xff]  ;;  %v7676_v61 = vld [vmem:[#allocation66_spill] sm:$0xff] }
 0x197   :  { %4263 = vmatpush1.bf16.msra.mxu0 %v7666_v59  ;;  %4327 = vmatpush1.bf16.msra.mxu1 %v7667_v22  ;;  %v7677_v59 = vld [vmem:[#allocation67_spill] sm:$0xff]  ;;  %v7678_v22 = vld [vmem:[#allocation68_spill] sm:$0xff] }
 0x198   :  { %4265 = vmatprep.subr.bf16.mxu0 %v7668_v37  ;;  %4329 = vmatprep.subr.bf16.mxu1 %v7669_v43  ;;  %v7679_v37 = vld [vmem:[#allocation69_spill] sm:$0xff]  ;;  %v7680_v43 = vld [vmem:[#allocation70_spill] sm:$0xff] }
 0x19b   :  { %4267 = vmatpush1.bf16.msra.mxu0 %v7670_v30  ;;  %4331 = vmatpush1.bf16.msra.mxu1 %v7671_v34  ;;  %v7681_v30 = vld [vmem:[#allocation71_spill] sm:$0xff]  ;;  %v7682_v34 = vld [vmem:[#allocation72_spill] sm:$0xff] }
 0x19c   :  { %4269 = vmatprep.subr.bf16.mxu0 %v7672_v51  ;;  %4333 = vmatprep.subr.bf16.mxu1 %v7673_v26  ;;  %v7683_v51 = vld [vmem:[#allocation73_spill] sm:$0xff]  ;;  %v7684_v26 = vld [vmem:[#allocation14_spill] sm:$0xff] }
 0x19f   :  { %4271 = vmatpush1.bf16.msra.mxu0 %v7674_v29  ;;  %4335 = vmatpush1.bf16.msra.mxu1 %v7675_v0  ;;  %v7685_v29 = vld [vmem:[#allocation15_spill] sm:$0xff] }
 0x1a0   :  { %4273 = vmatprep.subr.bf16.mxu0 %v7676_v61  ;;  %4337 = vmatprep.subr.bf16.mxu1 %v7677_v59  ;;  %v598_v59 = vld [vmem:[%s7420_s5] sm:$0xf] }
 0x1a3   :  { %4275 = vmatpush1.bf16.msra.mxu0 %v7678_v22  ;;  %4339 = vmatpush1.bf16.msra.mxu1 %v7679_v37  ;;  %v7686_v22 = vsub.s32 0, %v6355_v25 }
 0x1a4   :  { %4277 = vmatprep.subr.bf16.mxu0 %v7680_v43  ;;  %4341 = vmatprep.subr.bf16.mxu1 %v7681_v30  ;;  %v7688_v43 = vsub.s32 1, %v6355_v25 }
 0x1a5   :  { %v6490_v61 = vrot.slane %v598_v59, %v7686_v22 }
 0x1a6   :  { %v6494_v37 = vrot.slane %v598_v59, %v7688_v43  ;;  %v7692_v43 = vsub.s32 2, %v6355_v25 }
 0x1a7   :  { %4279 = vmatpush1.bf16.msra.mxu0 %v7682_v34  ;;  %4343 = vmatpush1.bf16.msra.mxu1 %v7683_v51  ;;  %7687 = vst [vmem:[#allocation76_spill] sm:$0xff] %v6490_v61 }
 0x1a8   :  { %4345 = vmatprep.subr.bf16.mxu0 %v7684_v26  ;;  %4377 = vmatprep.subr.bf16.mxu1 %v7685_v29  ;;  %7689 = vst [vmem:[#allocation77_spill] sm:$0xff] %v6494_v37  ;;  %v7690_v26 = vsub.s32 3, %v6355_v25  ;;  %v6505_v28 = vrot.slane %v598_v59, %v7692_v43 }
 0x1aa   :  { %v6499_v29 = vrot.slane %v598_v59, %v7690_v26  ;;  %7693 = vst [vmem:[#allocation79_spill] sm:$0xff] %v6505_v28 }
 0x1ac   :  { %7691 = vst [vmem:[#allocation78_spill] sm:$0xff] %v6499_v29 }
 0x21d   :  { %v861_v30 = vpop.f32.mrb[16].mxu0  ;;  %v932_v34 = vpop.f32.mrb[16].mxu1 }
 0x21e   :  { %v862_v51 = vadd.f32 %v861_v30, %v6490_v61  ;;  %v863_v0 = vpop.f32.mrb[17].mxu0  ;;  %v934_v3 = vpop.f32.mrb[17].mxu1  ;;  %v933_v30 = vadd.f32 %v932_v34, %v6505_v28  ;;  %v7694_v34 = vld [vmem:[#allocation74_spill] sm:$0xff]  ;;  %v7695_v28 = vld [vmem:[#allocation75_spill] sm:$0xff] }
 0x21f   :  { %v864_v15 = vadd.f32 %v863_v0, %v6494_v37  ;;  %v935_v22 = vadd.f32 %v934_v3, %v6499_v29 }
 0x220   :  { %v937_v2 = vmul.f32 0.5, %v862_v51  ;;  %v939_v61 = vmul.f32 0.5, %v933_v30 }
 0x221   :  { %v938_v12 = vmul.f32 0.5, %v864_v15 }
 0x222   :  { %5663 = vtanh.f32 %v937_v2 }
 0x223   :  { %5665 = vtanh.f32 %v938_v12 }
 0x224   :  { %5667 = vtanh.f32 %v935_v22 }
 0x225   :  { %5669 = vtanh.f32 %v939_v61 }
 0x22c   :  { %v5664_v21 = vpop.eup %5663 }
 0x22d   :  { %v943_v26 = vadd.f32 1.0, %v5664_v21  ;;  %v5666_v16 = vpop.eup %5665 }
 0x22e   :  { %v944_v0 = vadd.f32 1.0, %v5666_v16  ;;  %v5668_v51 = vpop.eup %5667 }
 0x22f   :  { %v946_v33 = vmul.f32 0.5, %v943_v26  ;;  %v5670_v25 = vpop.eup %5669 }
 0x230   :  { %v947_v15 = vmul.f32 0.5, %v944_v0  ;;  %v945_v12 = vadd.f32 1.0, %v5670_v25 }
 0x231   :  { %v951_v2 = vmul.f32 %v5668_v51, %v946_v33 }
 0x232   :  { %v950_v37 = vmul.f32 0.0, %v947_v15  ;;  %v948_v61 = vmul.f32 0.5, %v945_v12 }
 0x234   :  { %v6508_v3 = vadd.f32 %v951_v2, %v950_v37 }
 0x236   :  { %5671 = vtanh.f32 %v6508_v3 }
 0x23d   :  { %v1029_v59 = vpop.f32.mrb[2].mxu0  ;;  %v1100_v22 = vpop.f32.mrb[2].mxu1 }
 0x23e   :  { %v5586_v43 = vadd.f32 %v1029_v59, %v7694_v34  ;;  %v1031_v30 = vpop.f32.mrb[3].mxu0  ;;  %v1102_v21 = vpop.f32.mrb[3].mxu1  ;;  %v5602_v51 = vadd.f32 %v1100_v22, %v6381_v52 }
 0x23f   :  { %v5587_v26 = vadd.f32 %v1031_v30, %v7695_v28  ;;  %v5603_v33 = vadd.f32 %v1102_v21, %v6374_v41 }
 0x240   :  { %v1109_v16 = vmul.f32 0.5, %v5586_v43  ;;  %v5672_v29 = vpop.eup %5671  ;;  %v1111_v15 = vmul.f32 0.5, %v5602_v51 }
 0x241   :  { %v1110_v0 = vmul.f32 0.5, %v5587_v26  ;;  %v6514_v37 = vmul.f32 %v5672_v29, %v948_v61 }
 0x242   :  { %5673 = vtanh.f32 %v1109_v16 }
 0x243   :  { %7696 = vst [vmem:[#allocation74_spill] sm:$0xff] %v6514_v37  ;;  %5675 = vtanh.f32 %v1110_v0  ;;  %1191 = vmatprep.mubr.f32.mxu0 %v6514_v37  ;;  %1262 = vmatprep.mubr.f32.mxu1 %v6514_v37  ;;  %v7713_v37 = vld [vmem:[#allocation36_spill] sm:$0xff] }
 0x244   :  { %5677 = vtanh.f32 %v5603_v33 }
 0x245   :  { %5679 = vtanh.f32 %v1111_v15  ;;  %v7698_v15 = vld [vmem:[#allocation21_spill] sm:$0xff] }
 0x24c   :  { %v5674_v2 = vpop.eup %5673 }
 0x24d   :  { %v1115_v25 = vadd.f32 1.0, %v5674_v2  ;;  %v5676_v12 = vpop.eup %5675  ;;  %v7699_v2 = vld [vmem:[#allocation22_spill] sm:$0xff] }
 0x24e   :  { %v1116_v43 = vadd.f32 1.0, %v5676_v12  ;;  %v5678_v30 = vpop.eup %5677  ;;  %v7701_v12 = vld [vmem:[#allocation24_spill] sm:$0xff] }
 0x24f   :  { %v1118_v59 = vmul.f32 0.5, %v1115_v25  ;;  %v5680_v16 = vpop.eup %5679  ;;  %v7700_v25 = vld [vmem:[#allocation23_spill] sm:$0xff] }
 0x250   :  { %v1119_v26 = vmul.f32 0.5, %v1116_v43  ;;  %v1117_v0 = vadd.f32 1.0, %v5680_v16  ;;  %v7703_v43 = vld [vmem:[#allocation26_spill] sm:$0xff]  ;;  %v7708_v16 = vld [vmem:[#allocation31_spill] sm:$0xff] }
 0x251   :  { %v1123_v21 = vmul.f32 %v5678_v30, %v1118_v59  ;;  %v7702_v59 = vld [vmem:[#allocation25_spill] sm:$0xff]  ;;  %v7704_v30 = vld [vmem:[#allocation27_spill] sm:$0xff] }
 0x252   :  { %v1122_v29 = vmul.f32 %v1119_v26, %v6384_v62  ;;  %v1120_v33 = vmul.f32 0.5, %v1117_v0  ;;  %v7697_v62 = vld [vmem:[#allocation20_spill] sm:$0xff] }
 0x253   :  { %v7705_v26 = vld [vmem:[#allocation28_spill] sm:$0xff] }
 0x254   :  { %v6520_v61 = vadd.f32 %v1123_v21, %v1122_v29  ;;  %v7706_v21 = vld [vmem:[#allocation29_spill] sm:$0xff]  ;;  %v7707_v29 = vld [vmem:[#allocation30_spill] sm:$0xff]  ;;  %v7709_v0 = vld [vmem:[#allocation32_spill] sm:$0xff] }
 0x256   :  { %5681 = vtanh.f32 %v6520_v61 }
 0x260   :  { %v5682_v22 = vpop.eup %5681 }
 0x261   :  { %v1126_v51 = vmul.f32 %v5682_v22, %v1120_v33  ;;  %v7710_v33 = vld [vmem:[#allocation33_spill] sm:$0xff]  ;;  %v7711_v22 = vld [vmem:[#allocation34_spill] sm:$0xff] }
 0x263   :  { %1192 = vmatmul.mubr.f32.vlgmr.msra.gmra.mrb[18].mxu0 %v1126_v51  ;;  %1263 = vmatmul.mubr.f32.vlgmr.msra.gmra.mrb[18].mxu1 %v1126_v51 }
 0x264   :  { %4347 = vmatpush1.bf16.msra.mxu0 %v6012_v35  ;;  %4379 = vmatpush1.bf16.msra.mxu1 %v6015_v38 }
 0x265   :  { %4349 = vmatprep.subr.bf16.mxu0 %v6018_v42  ;;  %4381 = vmatprep.subr.bf16.mxu1 %v6024_v47 }
 0x266   :  { %1360 = vmatprep.mubr.f32.mxu0 %v7633_v55  ;;  %1431 = vmatprep.mubr.f32.mxu1 %v7633_v55 }
 0x268   :  { %4351 = vmatpush1.bf16.msra.mxu0 %v6028_v50  ;;  %4383 = vmatpush1.bf16.msra.mxu1 %v6032_v54 }
 0x269   :  { %4353 = vmatprep.subr.bf16.mxu0 %v6036_v57  ;;  %4385 = vmatprep.subr.bf16.mxu1 %v6040_v60 }
 0x26c   :  { %4355 = vmatpush1.bf16.msra.mxu0 %v6047_v1  ;;  %4387 = vmatpush1.bf16.msra.mxu1 %v6051_v4 }
 0x26d   :  { %4357 = vmatprep.subr.bf16.mxu0 %v6055_v7  ;;  %4389 = vmatprep.subr.bf16.mxu1 %v6059_v10 }
 0x270   :  { %4359 = vmatpush1.bf16.msra.mxu0 %v6066_v14  ;;  %4391 = vmatpush1.bf16.msra.mxu1 %v6070_v17 }
 0x271   :  { %4361 = vmatprep.subr.bf16.mxu0 %v6074_v20  ;;  %4393 = vmatprep.subr.bf16.mxu1 %v6078_v23 }
 0x274   :  { %4363 = vmatpush1.bf16.msra.mxu0 %v6085_v27  ;;  %4395 = vmatpush1.bf16.msra.mxu1 %v6089_v32 }
 0x275   :  { %4365 = vmatprep.subr.bf16.mxu0 %v6093_v36  ;;  %4397 = vmatprep.subr.bf16.mxu1 %v6097_v40 }
 0x278   :  { %4367 = vmatpush1.bf16.msra.mxu0 %v6104_v45  ;;  %4399 = vmatpush1.bf16.msra.mxu1 %v6108_v49 }
 0x279   :  { %4369 = vmatprep.subr.bf16.mxu0 %v6112_v53  ;;  %4401 = vmatprep.subr.bf16.mxu1 %v6116_v58 }
 0x27c   :  { %4371 = vmatpush1.bf16.msra.mxu0 %v6123_v63  ;;  %4403 = vmatpush1.bf16.msra.mxu1 %v6127_v5 }
 0x27d   :  { %4373 = vmatprep.subr.bf16.mxu0 %v6131_v9  ;;  %4405 = vmatprep.subr.bf16.mxu1 %v6135_v13 }
 0x280   :  { %4375 = vmatpush1.bf16.msra.mxu0 %v6142_v19  ;;  %4407 = vmatpush1.bf16.msra.mxu1 %v6146_v24 }
 0x281   :  { %4409 = vmatprep.subr.bf16.mxu0 %v6150_v31  ;;  %4473 = vmatprep.subr.bf16.mxu1 %v6154_v39 }
 0x283   :  { %1361 = vmatmul.mubr.f32.vlgmr.msra.gmra.mrb[4].mxu0 %v1126_v51  ;;  %1432 = vmatmul.mubr.f32.vlgmr.msra.gmra.mrb[4].mxu1 %v1126_v51  ;;  %v7712_v51 = vld [vmem:[#allocation35_spill] sm:$0xff] }
 0x284   :  { %4411 = vmatpush1.bf16.msra.mxu0 %v6158_v44  ;;  %4475 = vmatpush1.bf16.msra.mxu1 %v6162_v46 }
 0x285   :  { %4413 = vmatprep.subr.bf16.mxu0 %v6164_v48  ;;  %4477 = vmatprep.subr.bf16.mxu1 %v6168_v56 }
 0x288   :  { %4415 = vmatpush1.bf16.msra.mxu0 %v6174_v6  ;;  %4479 = vmatpush1.bf16.msra.mxu1 %v6178_v8 }
 0x289   :  { %4417 = vmatprep.subr.bf16.mxu0 %v6180_v11  ;;  %4481 = vmatprep.subr.bf16.mxu1 %v6183_v18 }
 0x28c   :  { %4419 = vmatpush1.bf16.msra.mxu0 %v7697_v62  ;;  %4483 = vmatpush1.bf16.msra.mxu1 %v7698_v15 }
 0x28d   :  { %4421 = vmatprep.subr.bf16.mxu0 %v7699_v2  ;;  %4485 = vmatprep.subr.bf16.mxu1 %v7700_v25  ;;  %v7754_v25 = vld [vmem:[#allocation77_spill] sm:$0xff] }
 0x290   :  { %4423 = vmatpush1.bf16.msra.mxu0 %v7701_v12  ;;  %4487 = vmatpush1.bf16.msra.mxu1 %v7702_v59  ;;  %v7753_v59 = vld [vmem:[#allocation76_spill] sm:$0xff] }
 0x291   :  { %4425 = vmatprep.subr.bf16.mxu0 %v7703_v43  ;;  %4489 = vmatprep.subr.bf16.mxu1 %v7704_v30  ;;  %v7714_v43 = vld [vmem:[#allocation37_spill] sm:$0xff]  ;;  %v7715_v30 = vld [vmem:[#allocation38_spill] sm:$0xff] }
 0x294   :  { %4427 = vmatpush1.bf16.msra.mxu0 %v7705_v26  ;;  %4491 = vmatpush1.bf16.msra.mxu1 %v7706_v21  ;;  %v7716_v26 = vld [vmem:[#allocation39_spill] sm:$0xff]  ;;  %v7717_v21 = vld [vmem:[#allocation40_spill] sm:$0xff] }
 0x295   :  { %4429 = vmatprep.subr.bf16.mxu0 %v7707_v29  ;;  %4493 = vmatprep.subr.bf16.mxu1 %v7708_v16  ;;  %v7718_v29 = vld [vmem:[#allocation41_spill] sm:$0xff]  ;;  %v7719_v16 = vld [vmem:[#allocation42_spill] sm:$0xff] }
 0x298   :  { %4431 = vmatpush1.bf16.msra.mxu0 %v7709_v0  ;;  %4495 = vmatpush1.bf16.msra.mxu1 %v7710_v33  ;;  %v7720_v0 = vld [vmem:[#allocation43_spill] sm:$0xff]  ;;  %v7721_v33 = vld [vmem:[#allocation44_spill] sm:$0xff] }
 0x299   :  { %4433 = vmatprep.subr.bf16.mxu0 %v7711_v22  ;;  %4497 = vmatprep.subr.bf16.mxu1 %v7712_v51  ;;  %v7722_v22 = vld [vmem:[#allocation45_spill] sm:$0xff]  ;;  %v7723_v51 = vld [vmem:[#allocation46_spill] sm:$0xff] }
 0x29c   :  { %4435 = vmatpush1.bf16.msra.mxu0 %v7713_v37  ;;  %4499 = vmatpush1.bf16.msra.mxu1 %v7714_v43  ;;  %v7724_v37 = vld [vmem:[#allocation47_spill] sm:$0xff]  ;;  %v7725_v43 = vld [vmem:[#allocation48_spill] sm:$0xff] }
 0x29d   :  { %4437 = vmatprep.subr.bf16.mxu0 %v7715_v30  ;;  %4501 = vmatprep.subr.bf16.mxu1 %v7716_v26  ;;  %v7726_v30 = vld [vmem:[#allocation49_spill] sm:$0xff]  ;;  %v7727_v26 = vld [vmem:[#allocation50_spill] sm:$0xff] }
 0x2a0   :  { %4439 = vmatpush1.bf16.msra.mxu0 %v7717_v21  ;;  %4503 = vmatpush1.bf16.msra.mxu1 %v7718_v29  ;;  %v7728_v21 = vld [vmem:[#allocation51_spill] sm:$0xff]  ;;  %v7729_v29 = vld [vmem:[#allocation52_spill] sm:$0xff] }
 0x2a1   :  { %4441 = vmatprep.subr.bf16.mxu0 %v7719_v16  ;;  %4505 = vmatprep.subr.bf16.mxu1 %v7720_v0  ;;  %v7730_v16 = vld [vmem:[#allocation53_spill] sm:$0xff]  ;;  %v7731_v0 = vld [vmem:[#allocation54_spill] sm:$0xff] }
 0x2a4   :  { %4443 = vmatpush1.bf16.msra.mxu0 %v7721_v33  ;;  %4507 = vmatpush1.bf16.msra.mxu1 %v7722_v22  ;;  %v7732_v33 = vld [vmem:[#allocation55_spill] sm:$0xff]  ;;  %v7733_v22 = vld [vmem:[#allocation56_spill] sm:$0xff] }
 0x2a5   :  { %4445 = vmatprep.subr.bf16.mxu0 %v7723_v51  ;;  %4509 = vmatprep.subr.bf16.mxu1 %v7724_v37  ;;  %v7734_v51 = vld [vmem:[#allocation57_spill] sm:$0xff]  ;;  %v7735_v37 = vld [vmem:[#allocation58_spill] sm:$0xff] }
 0x2a8   :  { %4447 = vmatpush1.bf16.msra.mxu0 %v7725_v43  ;;  %4511 = vmatpush1.bf16.msra.mxu1 %v7726_v30  ;;  %v7736_v43 = vld [vmem:[#allocation59_spill] sm:$0xff]  ;;  %v7737_v30 = vld [vmem:[#allocation60_spill] sm:$0xff] }
 0x2a9   :  { %4449 = vmatprep.subr.bf16.mxu0 %v7727_v26  ;;  %4513 = vmatprep.subr.bf16.mxu1 %v7728_v21  ;;  %v7738_v26 = vld [vmem:[#allocation61_spill] sm:$0xff]  ;;  %v7739_v21 = vld [vmem:[#allocation62_spill] sm:$0xff] }
 0x2ac   :  { %4451 = vmatpush1.bf16.msra.mxu0 %v7729_v29  ;;  %4515 = vmatpush1.bf16.msra.mxu1 %v7730_v16  ;;  %v7740_v29 = vld [vmem:[#allocation63_spill] sm:$0xff]  ;;  %v7741_v16 = vld [vmem:[#allocation64_spill] sm:$0xff] }
 0x2ad   :  { %4453 = vmatprep.subr.bf16.mxu0 %v7731_v0  ;;  %4517 = vmatprep.subr.bf16.mxu1 %v7732_v33  ;;  %v7742_v0 = vld [vmem:[#allocation65_spill] sm:$0xff]  ;;  %v7743_v33 = vld [vmem:[#allocation66_spill] sm:$0xff] }
 0x2b0   :  { %4455 = vmatpush1.bf16.msra.mxu0 %v7733_v22  ;;  %4519 = vmatpush1.bf16.msra.mxu1 %v7734_v51  ;;  %v7744_v22 = vld [vmem:[#allocation67_spill] sm:$0xff]  ;;  %v7745_v51 = vld [vmem:[#allocation68_spill] sm:$0xff] }
 0x2b1   :  { %4457 = vmatprep.subr.bf16.mxu0 %v7735_v37  ;;  %4521 = vmatprep.subr.bf16.mxu1 %v7736_v43  ;;  %v7746_v37 = vld [vmem:[#allocation69_spill] sm:$0xff]  ;;  %v7747_v43 = vld [vmem:[#allocation70_spill] sm:$0xff] }
 0x2b4   :  { %4459 = vmatpush1.bf16.msra.mxu0 %v7737_v30  ;;  %4523 = vmatpush1.bf16.msra.mxu1 %v7738_v26  ;;  %v7748_v30 = vld [vmem:[#allocation71_spill] sm:$0xff]  ;;  %v7749_v26 = vld [vmem:[#allocation72_spill] sm:$0xff] }
 0x2b5   :  { %4461 = vmatprep.subr.bf16.mxu0 %v7739_v21  ;;  %4525 = vmatprep.subr.bf16.mxu1 %v7740_v29  ;;  %v7750_v21 = vld [vmem:[#allocation73_spill] sm:$0xff]  ;;  %v7751_v29 = vld [vmem:[#allocation14_spill] sm:$0xff] }
 0x2b8   :  { %4463 = vmatpush1.bf16.msra.mxu0 %v7741_v16  ;;  %4527 = vmatpush1.bf16.msra.mxu1 %v7742_v0  ;;  %v7752_v16 = vld [vmem:[#allocation15_spill] sm:$0xff] }
 0x2b9   :  { %4465 = vmatprep.subr.bf16.mxu0 %v7743_v33  ;;  %4529 = vmatprep.subr.bf16.mxu1 %v7744_v22 }
 0x2bc   :  { %4467 = vmatpush1.bf16.msra.mxu0 %v7745_v51  ;;  %4531 = vmatpush1.bf16.msra.mxu1 %v7746_v37 }
 0x2bd   :  { %4469 = vmatprep.subr.bf16.mxu0 %v7747_v43  ;;  %4533 = vmatprep.subr.bf16.mxu1 %v7748_v30  ;;  %v7755_v30 = vld [vmem:[#allocation78_spill] sm:$0xff] }
 0x2c0   :  { %4471 = vmatpush1.bf16.msra.mxu0 %v7749_v26  ;;  %4535 = vmatpush1.bf16.msra.mxu1 %v7750_v21  ;;  %v7756_v21 = vld [vmem:[#allocation79_spill] sm:$0xff] }
 0x2c1   :  { %4537 = vmatprep.subr.bf16.mxu0 %v7751_v29  ;;  %4569 = vmatprep.subr.bf16.mxu1 %v7752_v16 }
 0x336   :  { %v1193_v0 = vpop.f32.mrb[18].mxu0  ;;  %v1264_v33 = vpop.f32.mrb[18].mxu1 }
 0x337   :  { %v1194_v22 = vadd.f32 %v1193_v0, %v7753_v59  ;;  %v1195_v12 = vpop.f32.mrb[19].mxu0  ;;  %v1266_v51 = vpop.f32.mrb[19].mxu1  ;;  %v1265_v26 = vadd.f32 %v1264_v33, %v7756_v21 }
 0x338   :  { %v1196_v37 = vadd.f32 %v1195_v12, %v7754_v25  ;;  %v1267_v15 = vadd.f32 %v1266_v51, %v7755_v30 }
 0x339   :  { %v1269_v2 = vmul.f32 0.5, %v1194_v22  ;;  %v1271_v29 = vmul.f32 0.5, %v1265_v26 }
 0x33a   :  { %v1270_v43 = vmul.f32 0.5, %v1196_v37 }
 0x33b   :  { %5683 = vtanh.f32 %v1269_v2 }
 0x33c   :  { %5685 = vtanh.f32 %v1270_v43 }
 0x33d   :  { %5687 = vtanh.f32 %v1267_v15 }
 0x33e   :  { %5689 = vtanh.f32 %v1271_v29 }
 0x345   :  { %v5684_v62 = vpop.eup %5683 }
 0x346   :  { %v1275_v16 = vadd.f32 1.0, %v5684_v62  ;;  %v5686_v18 = vpop.eup %5685 }
 0x347   :  { %v1276_v0 = vadd.f32 1.0, %v5686_v18  ;;  %v5688_v59 = vpop.eup %5687 }
 0x348   :  { %v1278_v11 = vmul.f32 0.5, %v1275_v16  ;;  %v5690_v2 = vpop.eup %5689 }
 0x349   :  { %v1279_v8 = vmul.f32 0.5, %v1276_v0  ;;  %v1277_v15 = vadd.f32 1.0, %v5690_v2 }
 0x34a   :  { %v1283_v6 = vmul.f32 %v5688_v59, %v1278_v11 }
 0x34b   :  { %v1282_v12 = vmul.f32 %v1279_v8, %v6508_v3  ;;  %v1280_v18 = vmul.f32 0.5, %v1277_v15 }
 0x34d   :  { %v6626_v37 = vadd.f32 %v1283_v6, %v1282_v12 }
 0x34f   :  { %5691 = vtanh.f32 %v6626_v37 }
 0x356   :  { %v1362_v43 = vpop.f32.mrb[4].mxu0  ;;  %v1433_v33 = vpop.f32.mrb[4].mxu1 }
 0x357   :  { %v5588_v26 = vadd.f32 %v1362_v43, %v7694_v34  ;;  %v1364_v62 = vpop.f32.mrb[5].mxu0  ;;  %v1435_v22 = vpop.f32.mrb[5].mxu1  ;;  %v5604_v3 = vadd.f32 %v1433_v33, %v6381_v52 }
 0x358   :  { %v5589_v29 = vadd.f32 %v1364_v62, %v7695_v28  ;;  %v5605_v6 = vadd.f32 %v1435_v22, %v6374_v41 }
 0x359   :  { %v1442_v16 = vmul.f32 0.5, %v5588_v26  ;;  %v5692_v51 = vpop.eup %5691  ;;  %v1444_v59 = vmul.f32 0.5, %v5604_v3  ;;  %v7759_v3 = vld [vmem:[#allocation17_spill] sm:$0xff] }
 0x35a   :  { %v1443_v11 = vmul.f32 0.5, %v5589_v29  ;;  %v6632_v8 = vmul.f32 %v5692_v51, %v1280_v18 }
 0x35b   :  { %5693 = vtanh.f32 %v1442_v16 }
 0x35c   :  { %7757 = vst [vmem:[#allocation75_spill] sm:$0xff] %v6632_v8  ;;  %5695 = vtanh.f32 %v1443_v11  ;;  %1524 = vmatprep.mubr.f32.mxu0 %v6632_v8  ;;  %1595 = vmatprep.mubr.f32.mxu1 %v6632_v8  ;;  %v7775_v8 = vld [vmem:[#allocation33_spill] sm:$0xff] }
 0x35d   :  { %5697 = vtanh.f32 %v5605_v6 }
 0x35e   :  { %5699 = vtanh.f32 %v1444_v59  ;;  %v7760_v59 = vld [vmem:[#allocation18_spill] sm:$0xff] }
 0x365   :  { %v5694_v0 = vpop.eup %5693 }
 0x366   :  { %v1448_v12 = vadd.f32 1.0, %v5694_v0  ;;  %v5696_v2 = vpop.eup %5695  ;;  %v7761_v0 = vld [vmem:[#allocation19_spill] sm:$0xff] }
 0x367   :  { %v1449_v43 = vadd.f32 1.0, %v5696_v2  ;;  %v5698_v26 = vpop.eup %5697  ;;  %v7763_v2 = vld [vmem:[#allocation21_spill] sm:$0xff] }
 0x368   :  { %v1451_v15 = vmul.f32 0.5, %v1448_v12  ;;  %v5700_v16 = vpop.eup %5699  ;;  %v7762_v12 = vld [vmem:[#allocation20_spill] sm:$0xff] }
 0x369   :  { %v1452_v62 = vmul.f32 0.5, %v1449_v43  ;;  %v1450_v51 = vadd.f32 1.0, %v5700_v16  ;;  %v7765_v43 = vld [vmem:[#allocation23_spill] sm:$0xff]  ;;  %v7770_v16 = vld [vmem:[#allocation28_spill] sm:$0xff] }
 0x36a   :  { %v1456_v22 = vmul.f32 %v5698_v26, %v1451_v15  ;;  %v7764_v15 = vld [vmem:[#allocation22_spill] sm:$0xff]  ;;  %v7766_v26 = vld [vmem:[#allocation24_spill] sm:$0xff] }
 0x36b   :  { %v1455_v29 = vmul.f32 %v1452_v62, %v6520_v61  ;;  %v1453_v11 = vmul.f32 0.5, %v1450_v51  ;;  %v7758_v61 = vld [vmem:[#allocation16_spill] sm:$0xff]  ;;  %v7767_v62 = vld [vmem:[#allocation25_spill] sm:$0xff] }
 0x36c   :  { %v7771_v51 = vld [vmem:[#allocation29_spill] sm:$0xff] }
 0x36d   :  { %v6638_v18 = vadd.f32 %v1456_v22, %v1455_v29  ;;  %v7768_v22 = vld [vmem:[#allocation26_spill] sm:$0xff]  ;;  %v7769_v29 = vld [vmem:[#allocation27_spill] sm:$0xff] }
 0x36f   :  { %5701 = vtanh.f32 %v6638_v18 }
 0x379   :  { %v5702_v33 = vpop.eup %5701 }
 0x37a   :  { %v1459_v6 = vmul.f32 %v5702_v33, %v1453_v11  ;;  %v7772_v11 = vld [vmem:[#allocation30_spill] sm:$0xff]  ;;  %v7773_v33 = vld [vmem:[#allocation31_spill] sm:$0xff] }
 0x37c   :  { %1525 = vmatmul.mubr.f32.vlgmr.msra.gmra.mrb[20].mxu0 %v1459_v6  ;;  %1596 = vmatmul.mubr.f32.vlgmr.msra.gmra.mrb[20].mxu1 %v1459_v6 }
 0x37d   :  { %4539 = vmatpush1.bf16.msra.mxu0 %v6012_v35  ;;  %4571 = vmatpush1.bf16.msra.mxu1 %v6015_v38 }
 0x37e   :  { %4541 = vmatprep.subr.bf16.mxu0 %v6018_v42  ;;  %4573 = vmatprep.subr.bf16.mxu1 %v6024_v47 }
 0x37f   :  { %1693 = vmatprep.mubr.f32.mxu0 %v7633_v55  ;;  %1764 = vmatprep.mubr.f32.mxu1 %v7633_v55 }
 0x381   :  { %4543 = vmatpush1.bf16.msra.mxu0 %v6028_v50  ;;  %4575 = vmatpush1.bf16.msra.mxu1 %v6032_v54 }
 0x382   :  { %4545 = vmatprep.subr.bf16.mxu0 %v6036_v57  ;;  %4577 = vmatprep.subr.bf16.mxu1 %v6040_v60 }
 0x385   :  { %4547 = vmatpush1.bf16.msra.mxu0 %v6047_v1  ;;  %4579 = vmatpush1.bf16.msra.mxu1 %v6051_v4 }
 0x386   :  { %4549 = vmatprep.subr.bf16.mxu0 %v6055_v7  ;;  %4581 = vmatprep.subr.bf16.mxu1 %v6059_v10 }
 0x389   :  { %4551 = vmatpush1.bf16.msra.mxu0 %v6066_v14  ;;  %4583 = vmatpush1.bf16.msra.mxu1 %v6070_v17 }
 0x38a   :  { %4553 = vmatprep.subr.bf16.mxu0 %v6074_v20  ;;  %4585 = vmatprep.subr.bf16.mxu1 %v6078_v23 }
 0x38d   :  { %4555 = vmatpush1.bf16.msra.mxu0 %v6085_v27  ;;  %4587 = vmatpush1.bf16.msra.mxu1 %v6089_v32 }
 0x38e   :  { %4557 = vmatprep.subr.bf16.mxu0 %v6093_v36  ;;  %4589 = vmatprep.subr.bf16.mxu1 %v6097_v40 }
 0x391   :  { %4559 = vmatpush1.bf16.msra.mxu0 %v6104_v45  ;;  %4591 = vmatpush1.bf16.msra.mxu1 %v6108_v49 }
 0x392   :  { %4561 = vmatprep.subr.bf16.mxu0 %v6112_v53  ;;  %4593 = vmatprep.subr.bf16.mxu1 %v6116_v58 }
 0x395   :  { %4563 = vmatpush1.bf16.msra.mxu0 %v6123_v63  ;;  %4595 = vmatpush1.bf16.msra.mxu1 %v6127_v5 }
 0x396   :  { %4565 = vmatprep.subr.bf16.mxu0 %v6131_v9  ;;  %4597 = vmatprep.subr.bf16.mxu1 %v6135_v13 }
 0x399   :  { %4567 = vmatpush1.bf16.msra.mxu0 %v6142_v19  ;;  %4599 = vmatpush1.bf16.msra.mxu1 %v6146_v24 }
 0x39a   :  { %4601 = vmatprep.subr.bf16.mxu0 %v6150_v31  ;;  %4665 = vmatprep.subr.bf16.mxu1 %v6154_v39 }
 0x39c   :  { %1694 = vmatmul.mubr.f32.vlgmr.msra.gmra.mrb[6].mxu0 %v1459_v6  ;;  %1765 = vmatmul.mubr.f32.vlgmr.msra.gmra.mrb[6].mxu1 %v1459_v6  ;;  %v7774_v6 = vld [vmem:[#allocation32_spill] sm:$0xff] }
 0x39d   :  { %4603 = vmatpush1.bf16.msra.mxu0 %v6158_v44  ;;  %4667 = vmatpush1.bf16.msra.mxu1 %v6162_v46 }
 0x39e   :  { %4605 = vmatprep.subr.bf16.mxu0 %v6164_v48  ;;  %4669 = vmatprep.subr.bf16.mxu1 %v6168_v56 }
 0x3a1   :  { %4607 = vmatpush1.bf16.msra.mxu0 %v7758_v61  ;;  %4671 = vmatpush1.bf16.msra.mxu1 %v7759_v3 }
 0x3a2   :  { %4609 = vmatprep.subr.bf16.mxu0 %v7760_v59  ;;  %4673 = vmatprep.subr.bf16.mxu1 %v7761_v0 }
 0x3a5   :  { %4611 = vmatpush1.bf16.msra.mxu0 %v7762_v12  ;;  %4675 = vmatpush1.bf16.msra.mxu1 %v7763_v2 }
 0x3a6   :  { %4613 = vmatprep.subr.bf16.mxu0 %v7764_v15  ;;  %4677 = vmatprep.subr.bf16.mxu1 %v7765_v43  ;;  %v7776_v43 = vld [vmem:[#allocation34_spill] sm:$0xff]  ;;  %v7818_v15 = vld [vmem:[#allocation76_spill] sm:$0xff] }
 0x3a9   :  { %4615 = vmatpush1.bf16.msra.mxu0 %v7766_v26  ;;  %4679 = vmatpush1.bf16.msra.mxu1 %v7767_v62  ;;  %v7777_v26 = vld [vmem:[#allocation35_spill] sm:$0xff]  ;;  %v7778_v62 = vld [vmem:[#allocation36_spill] sm:$0xff] }
 0x3aa   :  { %4617 = vmatprep.subr.bf16.mxu0 %v7768_v22  ;;  %4681 = vmatprep.subr.bf16.mxu1 %v7769_v29  ;;  %v7779_v22 = vld [vmem:[#allocation37_spill] sm:$0xff]  ;;  %v7780_v29 = vld [vmem:[#allocation38_spill] sm:$0xff] }
 0x3ad   :  { %4619 = vmatpush1.bf16.msra.mxu0 %v7770_v16  ;;  %4683 = vmatpush1.bf16.msra.mxu1 %v7771_v51  ;;  %v7781_v16 = vld [vmem:[#allocation39_spill] sm:$0xff]  ;;  %v7782_v51 = vld [vmem:[#allocation40_spill] sm:$0xff] }
 0x3ae   :  { %4621 = vmatprep.subr.bf16.mxu0 %v7772_v11  ;;  %4685 = vmatprep.subr.bf16.mxu1 %v7773_v33  ;;  %v7783_v11 = vld [vmem:[#allocation41_spill] sm:$0xff]  ;;  %v7784_v33 = vld [vmem:[#allocation42_spill] sm:$0xff] }
 0x3b1   :  { %4623 = vmatpush1.bf16.msra.mxu0 %v7774_v6  ;;  %4687 = vmatpush1.bf16.msra.mxu1 %v7775_v8  ;;  %v7785_v6 = vld [vmem:[#allocation43_spill] sm:$0xff]  ;;  %v7786_v8 = vld [vmem:[#allocation44_spill] sm:$0xff] }
 0x3b2   :  { %4625 = vmatprep.subr.bf16.mxu0 %v7776_v43  ;;  %4689 = vmatprep.subr.bf16.mxu1 %v7777_v26  ;;  %v7787_v43 = vld [vmem:[#allocation45_spill] sm:$0xff]  ;;  %v7788_v26 = vld [vmem:[#allocation46_spill] sm:$0xff] }
 0x3b5   :  { %4627 = vmatpush1.bf16.msra.mxu0 %v7778_v62  ;;  %4691 = vmatpush1.bf16.msra.mxu1 %v7779_v22  ;;  %v7789_v62 = vld [vmem:[#allocation47_spill] sm:$0xff]  ;;  %v7790_v22 = vld [vmem:[#allocation48_spill] sm:$0xff] }
 0x3b6   :  { %4629 = vmatprep.subr.bf16.mxu0 %v7780_v29  ;;  %4693 = vmatprep.subr.bf16.mxu1 %v7781_v16  ;;  %v7791_v29 = vld [vmem:[#allocation49_spill] sm:$0xff]  ;;  %v7792_v16 = vld [vmem:[#allocation50_spill] sm:$0xff] }
 0x3b9   :  { %4631 = vmatpush1.bf16.msra.mxu0 %v7782_v51  ;;  %4695 = vmatpush1.bf16.msra.mxu1 %v7783_v11  ;;  %v7793_v51 = vld [vmem:[#allocation51_spill] sm:$0xff]  ;;  %v7794_v11 = vld [vmem:[#allocation52_spill] sm:$0xff] }
 0x3ba   :  { %4633 = vmatprep.subr.bf16.mxu0 %v7784_v33  ;;  %4697 = vmatprep.subr.bf16.mxu1 %v7785_v6  ;;  %v7795_v33 = vld [vmem:[#allocation53_spill] sm:$0xff]  ;;  %v7796_v6 = vld [vmem:[#allocation54_spill] sm:$0xff] }
 0x3bd   :  { %4635 = vmatpush1.bf16.msra.mxu0 %v7786_v8  ;;  %4699 = vmatpush1.bf16.msra.mxu1 %v7787_v43  ;;  %v7797_v8 = vld [vmem:[#allocation55_spill] sm:$0xff]  ;;  %v7798_v43 = vld [vmem:[#allocation56_spill] sm:$0xff] }
 0x3be   :  { %4637 = vmatprep.subr.bf16.mxu0 %v7788_v26  ;;  %4701 = vmatprep.subr.bf16.mxu1 %v7789_v62  ;;  %v7799_v26 = vld [vmem:[#allocation57_spill] sm:$0xff]  ;;  %v7800_v62 = vld [vmem:[#allocation58_spill] sm:$0xff] }
 0x3c1   :  { %4639 = vmatpush1.bf16.msra.mxu0 %v7790_v22  ;;  %4703 = vmatpush1.bf16.msra.mxu1 %v7791_v29  ;;  %v7801_v22 = vld [vmem:[#allocation59_spill] sm:$0xff]  ;;  %v7802_v29 = vld [vmem:[#allocation60_spill] sm:$0xff] }
 0x3c2   :  { %4641 = vmatprep.subr.bf16.mxu0 %v7792_v16  ;;  %4705 = vmatprep.subr.bf16.mxu1 %v7793_v51  ;;  %v7803_v16 = vld [vmem:[#allocation61_spill] sm:$0xff]  ;;  %v7804_v51 = vld [vmem:[#allocation62_spill] sm:$0xff] }
 0x3c5   :  { %4643 = vmatpush1.bf16.msra.mxu0 %v7794_v11  ;;  %4707 = vmatpush1.bf16.msra.mxu1 %v7795_v33  ;;  %v7805_v11 = vld [vmem:[#allocation63_spill] sm:$0xff]  ;;  %v7806_v33 = vld [vmem:[#allocation64_spill] sm:$0xff] }
 0x3c6   :  { %4645 = vmatprep.subr.bf16.mxu0 %v7796_v6  ;;  %4709 = vmatprep.subr.bf16.mxu1 %v7797_v8  ;;  %v7807_v6 = vld [vmem:[#allocation65_spill] sm:$0xff]  ;;  %v7808_v8 = vld [vmem:[#allocation66_spill] sm:$0xff] }
 0x3c9   :  { %4647 = vmatpush1.bf16.msra.mxu0 %v7798_v43  ;;  %4711 = vmatpush1.bf16.msra.mxu1 %v7799_v26  ;;  %v7809_v43 = vld [vmem:[#allocation67_spill] sm:$0xff]  ;;  %v7810_v26 = vld [vmem:[#allocation68_spill] sm:$0xff] }
 0x3ca   :  { %4649 = vmatprep.subr.bf16.mxu0 %v7800_v62  ;;  %4713 = vmatprep.subr.bf16.mxu1 %v7801_v22  ;;  %v7811_v62 = vld [vmem:[#allocation69_spill] sm:$0xff]  ;;  %v7812_v22 = vld [vmem:[#allocation70_spill] sm:$0xff] }
 0x3cd   :  { %4651 = vmatpush1.bf16.msra.mxu0 %v7802_v29  ;;  %4715 = vmatpush1.bf16.msra.mxu1 %v7803_v16  ;;  %v7813_v29 = vld [vmem:[#allocation71_spill] sm:$0xff]  ;;  %v7814_v16 = vld [vmem:[#allocation72_spill] sm:$0xff] }
 0x3ce   :  { %4653 = vmatprep.subr.bf16.mxu0 %v7804_v51  ;;  %4717 = vmatprep.subr.bf16.mxu1 %v7805_v11  ;;  %v7815_v51 = vld [vmem:[#allocation73_spill] sm:$0xff]  ;;  %v7816_v11 = vld [vmem:[#allocation14_spill] sm:$0xff] }
 0x3d1   :  { %4655 = vmatpush1.bf16.msra.mxu0 %v7806_v33  ;;  %4719 = vmatpush1.bf16.msra.mxu1 %v7807_v6  ;;  %v7817_v33 = vld [vmem:[#allocation15_spill] sm:$0xff] }
 0x3d2   :  { %4657 = vmatprep.subr.bf16.mxu0 %v7808_v8  ;;  %4721 = vmatprep.subr.bf16.mxu1 %v7809_v43 }
 0x3d5   :  { %4659 = vmatpush1.bf16.msra.mxu0 %v7810_v26  ;;  %4723 = vmatpush1.bf16.msra.mxu1 %v7811_v62 }
 0x3d6   :  { %4661 = vmatprep.subr.bf16.mxu0 %v7812_v22  ;;  %4725 = vmatprep.subr.bf16.mxu1 %v7813_v29 }
 0x3d9   :  { %4663 = vmatpush1.bf16.msra.mxu0 %v7814_v16  ;;  %4727 = vmatpush1.bf16.msra.mxu1 %v7815_v51 }
 0x3da   :  { %4729 = vmatprep.subr.bf16.mxu0 %v7816_v11  ;;  %4761 = vmatprep.subr.bf16.mxu1 %v7817_v33 }
 0x44f   :  { %v1526_v6 = vpop.f32.mrb[20].mxu0  ;;  %v1597_v8 = vpop.f32.mrb[20].mxu1 }
 0x450   :  { %v1527_v43 = vadd.f32 %v1526_v6, %v7818_v15  ;;  %v1528_v2 = vpop.f32.mrb[21].mxu0  ;;  %v1599_v26 = vpop.f32.mrb[21].mxu1  ;;  %v1598_v51 = vadd.f32 %v1597_v8, %v7756_v21 }
 0x451   :  { %v1529_v62 = vadd.f32 %v1528_v2, %v7754_v25  ;;  %v1600_v29 = vadd.f32 %v1599_v26, %v7755_v30 }
 0x452   :  { %v1602_v12 = vmul.f32 0.5, %v1527_v43  ;;  %v1604_v11 = vmul.f32 0.5, %v1598_v51 }
 0x453   :  { %v1603_v22 = vmul.f32 0.5, %v1529_v62 }
 0x454   :  { %5703 = vtanh.f32 %v1602_v12 }
 0x455   :  { %5705 = vtanh.f32 %v1603_v22 }
 0x456   :  { %5707 = vtanh.f32 %v1600_v29 }
 0x457   :  { %5709 = vtanh.f32 %v1604_v11 }
 0x45e   :  { %v5704_v16 = vpop.eup %5703 }
 0x45f   :  { %v1608_v33 = vadd.f32 1.0, %v5704_v16  ;;  %v5706_v0 = vpop.eup %5705 }
 0x460   :  { %v1609_v6 = vadd.f32 1.0, %v5706_v0  ;;  %v5708_v15 = vpop.eup %5707 }
 0x461   :  { %v1611_v59 = vmul.f32 0.5, %v1608_v33  ;;  %v5710_v12 = vpop.eup %5709 }
 0x462   :  { %v1612_v3 = vmul.f32 0.5, %v1609_v6  ;;  %v1610_v26 = vadd.f32 1.0, %v5710_v12 }
 0x463   :  { %v1616_v61 = vmul.f32 %v5708_v15, %v1611_v59 }
 0x464   :  { %v1615_v2 = vmul.f32 %v1612_v3, %v6626_v37  ;;  %v1613_v0 = vmul.f32 0.5, %v1610_v26 }
 0x466   :  { %v6744_v43 = vadd.f32 %v1616_v61, %v1615_v2 }
 0x468   :  { %5711 = vtanh.f32 %v6744_v43 }
 0x46f   :  { %v1695_v62 = vpop.f32.mrb[6].mxu0  ;;  %v1766_v8 = vpop.f32.mrb[6].mxu1 }
 0x470   :  { %v5590_v22 = vadd.f32 %v1695_v62, %v7694_v34  ;;  %v1697_v29 = vpop.f32.mrb[7].mxu0  ;;  %v1768_v16 = vpop.f32.mrb[7].mxu1  ;;  %v5606_v3 = vadd.f32 %v1766_v8, %v6381_v52 }
 0x471   :  { %v5591_v51 = vadd.f32 %v1697_v29, %v7695_v28  ;;  %v5607_v37 = vadd.f32 %v1768_v16, %v6374_v41 }
 0x472   :  { %v1775_v11 = vmul.f32 0.5, %v5590_v22  ;;  %v5712_v33 = vpop.eup %5711  ;;  %v1777_v15 = vmul.f32 0.5, %v5606_v3  ;;  %v7821_v3 = vld [vmem:[#allocation17_spill] sm:$0xff] }
 0x473   :  { %v1776_v59 = vmul.f32 0.5, %v5591_v51  ;;  %v6750_v61 = vmul.f32 %v5712_v33, %v1613_v0 }
 0x474   :  { %5713 = vtanh.f32 %v1775_v11 }
 0x475   :  { %7819 = vst [vmem:[#allocation77_spill] sm:$0xff] %v6750_v61  ;;  %5715 = vtanh.f32 %v1776_v59  ;;  %1857 = vmatprep.mubr.f32.mxu0 %v6750_v61  ;;  %1928 = vmatprep.mubr.f32.mxu1 %v6750_v61  ;;  %v7837_v61 = vld [vmem:[#allocation33_spill] sm:$0xff] }
 0x476   :  { %5717 = vtanh.f32 %v5607_v37 }
 0x477   :  { %5719 = vtanh.f32 %v1777_v15  ;;  %v7822_v15 = vld [vmem:[#allocation18_spill] sm:$0xff] }
 0x47e   :  { %v5714_v6 = vpop.eup %5713 }
 0x47f   :  { %v1781_v2 = vadd.f32 1.0, %v5714_v6  ;;  %v5716_v12 = vpop.eup %5715  ;;  %v7823_v6 = vld [vmem:[#allocation19_spill] sm:$0xff] }
 0x480   :  { %v1782_v62 = vadd.f32 1.0, %v5716_v12  ;;  %v5718_v22 = vpop.eup %5717  ;;  %v7825_v12 = vld [vmem:[#allocation21_spill] sm:$0xff] }
 0x481   :  { %v1784_v26 = vmul.f32 0.5, %v1781_v2  ;;  %v5720_v11 = vpop.eup %5719  ;;  %v7824_v2 = vld [vmem:[#allocation20_spill] sm:$0xff] }
 0x482   :  { %v1785_v29 = vmul.f32 0.5, %v1782_v62  ;;  %v1783_v33 = vadd.f32 1.0, %v5720_v11  ;;  %v7827_v62 = vld [vmem:[#allocation23_spill] sm:$0xff]  ;;  %v7832_v11 = vld [vmem:[#allocation28_spill] sm:$0xff] }
 0x483   :  { %v1789_v16 = vmul.f32 %v5718_v22, %v1784_v26  ;;  %v7826_v26 = vld [vmem:[#allocation22_spill] sm:$0xff]  ;;  %v7828_v22 = vld [vmem:[#allocation24_spill] sm:$0xff] }
 0x484   :  { %v1788_v51 = vmul.f32 %v1785_v29, %v6638_v18  ;;  %v1786_v59 = vmul.f32 0.5, %v1783_v33  ;;  %v7820_v18 = vld [vmem:[#allocation16_spill] sm:$0xff]  ;;  %v7829_v29 = vld [vmem:[#allocation25_spill] sm:$0xff] }
 0x485   :  { %v7833_v33 = vld [vmem:[#allocation29_spill] sm:$0xff] }
 0x486   :  { %v6756_v0 = vadd.f32 %v1789_v16, %v1788_v51  ;;  %v7830_v16 = vld [vmem:[#allocation26_spill] sm:$0xff]  ;;  %v7831_v51 = vld [vmem:[#allocation27_spill] sm:$0xff] }
 0x488   :  { %5721 = vtanh.f32 %v6756_v0 }
 0x492   :  { %v5722_v8 = vpop.eup %5721 }
 0x493   :  { %v1792_v37 = vmul.f32 %v5722_v8, %v1786_v59  ;;  %v7834_v59 = vld [vmem:[#allocation30_spill] sm:$0xff]  ;;  %v7835_v8 = vld [vmem:[#allocation31_spill] sm:$0xff] }
 0x495   :  { %1858 = vmatmul.mubr.f32.vlgmr.msra.gmra.mrb[22].mxu0 %v1792_v37  ;;  %1929 = vmatmul.mubr.f32.vlgmr.msra.gmra.mrb[22].mxu1 %v1792_v37 }
 0x496   :  { %4731 = vmatpush1.bf16.msra.mxu0 %v6012_v35  ;;  %4763 = vmatpush1.bf16.msra.mxu1 %v6015_v38 }
 0x497   :  { %4733 = vmatprep.subr.bf16.mxu0 %v6018_v42  ;;  %4765 = vmatprep.subr.bf16.mxu1 %v6024_v47 }
 0x498   :  { %2026 = vmatprep.mubr.f32.mxu0 %v7633_v55  ;;  %2097 = vmatprep.mubr.f32.mxu1 %v7633_v55 }
 0x49a   :  { %4735 = vmatpush1.bf16.msra.mxu0 %v6028_v50  ;;  %4767 = vmatpush1.bf16.msra.mxu1 %v6032_v54 }
 0x49b   :  { %4737 = vmatprep.subr.bf16.mxu0 %v6036_v57  ;;  %4769 = vmatprep.subr.bf16.mxu1 %v6040_v60 }
 0x49e   :  { %4739 = vmatpush1.bf16.msra.mxu0 %v6047_v1  ;;  %4771 = vmatpush1.bf16.msra.mxu1 %v6051_v4 }
 0x49f   :  { %4741 = vmatprep.subr.bf16.mxu0 %v6055_v7  ;;  %4773 = vmatprep.subr.bf16.mxu1 %v6059_v10 }
 0x4a2   :  { %4743 = vmatpush1.bf16.msra.mxu0 %v6066_v14  ;;  %4775 = vmatpush1.bf16.msra.mxu1 %v6070_v17 }
 0x4a3   :  { %4745 = vmatprep.subr.bf16.mxu0 %v6074_v20  ;;  %4777 = vmatprep.subr.bf16.mxu1 %v6078_v23 }
 0x4a6   :  { %4747 = vmatpush1.bf16.msra.mxu0 %v6085_v27  ;;  %4779 = vmatpush1.bf16.msra.mxu1 %v6089_v32 }
 0x4a7   :  { %4749 = vmatprep.subr.bf16.mxu0 %v6093_v36  ;;  %4781 = vmatprep.subr.bf16.mxu1 %v6097_v40 }
 0x4aa   :  { %4751 = vmatpush1.bf16.msra.mxu0 %v6104_v45  ;;  %4783 = vmatpush1.bf16.msra.mxu1 %v6108_v49 }
 0x4ab   :  { %4753 = vmatprep.subr.bf16.mxu0 %v6112_v53  ;;  %4785 = vmatprep.subr.bf16.mxu1 %v6116_v58 }
 0x4ae   :  { %4755 = vmatpush1.bf16.msra.mxu0 %v6123_v63  ;;  %4787 = vmatpush1.bf16.msra.mxu1 %v6127_v5 }
 0x4af   :  { %4757 = vmatprep.subr.bf16.mxu0 %v6131_v9  ;;  %4789 = vmatprep.subr.bf16.mxu1 %v6135_v13 }
 0x4b2   :  { %4759 = vmatpush1.bf16.msra.mxu0 %v6142_v19  ;;  %4791 = vmatpush1.bf16.msra.mxu1 %v6146_v24 }
 0x4b3   :  { %4793 = vmatprep.subr.bf16.mxu0 %v6150_v31  ;;  %4857 = vmatprep.subr.bf16.mxu1 %v6154_v39 }
 0x4b5   :  { %2027 = vmatmul.mubr.f32.vlgmr.msra.gmra.mrb[8].mxu0 %v1792_v37  ;;  %2098 = vmatmul.mubr.f32.vlgmr.msra.gmra.mrb[8].mxu1 %v1792_v37  ;;  %v7836_v37 = vld [vmem:[#allocation32_spill] sm:$0xff] }
 0x4b6   :  { %4795 = vmatpush1.bf16.msra.mxu0 %v6158_v44  ;;  %4859 = vmatpush1.bf16.msra.mxu1 %v6162_v46 }
 0x4b7   :  { %4797 = vmatprep.subr.bf16.mxu0 %v6164_v48  ;;  %4861 = vmatprep.subr.bf16.mxu1 %v6168_v56 }
 0x4ba   :  { %4799 = vmatpush1.bf16.msra.mxu0 %v7820_v18  ;;  %4863 = vmatpush1.bf16.msra.mxu1 %v7821_v3 }
 0x4bb   :  { %4801 = vmatprep.subr.bf16.mxu0 %v7822_v15  ;;  %4865 = vmatprep.subr.bf16.mxu1 %v7823_v6 }
 0x4be   :  { %4803 = vmatpush1.bf16.msra.mxu0 %v7824_v2  ;;  %4867 = vmatpush1.bf16.msra.mxu1 %v7825_v12 }
 0x4bf   :  { %4805 = vmatprep.subr.bf16.mxu0 %v7826_v26  ;;  %4869 = vmatprep.subr.bf16.mxu1 %v7827_v62  ;;  %v7838_v62 = vld [vmem:[#allocation34_spill] sm:$0xff]  ;;  %v7880_v26 = vld [vmem:[#allocation76_spill] sm:$0xff] }
 0x4c2   :  { %4807 = vmatpush1.bf16.msra.mxu0 %v7828_v22  ;;  %4871 = vmatpush1.bf16.msra.mxu1 %v7829_v29  ;;  %v7839_v22 = vld [vmem:[#allocation35_spill] sm:$0xff]  ;;  %v7840_v29 = vld [vmem:[#allocation36_spill] sm:$0xff] }
 0x4c3   :  { %4809 = vmatprep.subr.bf16.mxu0 %v7830_v16  ;;  %4873 = vmatprep.subr.bf16.mxu1 %v7831_v51  ;;  %v7841_v16 = vld [vmem:[#allocation37_spill] sm:$0xff]  ;;  %v7842_v51 = vld [vmem:[#allocation38_spill] sm:$0xff] }
 0x4c6   :  { %4811 = vmatpush1.bf16.msra.mxu0 %v7832_v11  ;;  %4875 = vmatpush1.bf16.msra.mxu1 %v7833_v33  ;;  %v7843_v11 = vld [vmem:[#allocation39_spill] sm:$0xff]  ;;  %v7844_v33 = vld [vmem:[#allocation40_spill] sm:$0xff] }
 0x4c7   :  { %4813 = vmatprep.subr.bf16.mxu0 %v7834_v59  ;;  %4877 = vmatprep.subr.bf16.mxu1 %v7835_v8  ;;  %v7845_v59 = vld [vmem:[#allocation41_spill] sm:$0xff]  ;;  %v7846_v8 = vld [vmem:[#allocation42_spill] sm:$0xff] }
 0x4ca   :  { %4815 = vmatpush1.bf16.msra.mxu0 %v7836_v37  ;;  %4879 = vmatpush1.bf16.msra.mxu1 %v7837_v61  ;;  %v7847_v37 = vld [vmem:[#allocation43_spill] sm:$0xff]  ;;  %v7848_v61 = vld [vmem:[#allocation44_spill] sm:$0xff] }
 0x4cb   :  { %4817 = vmatprep.subr.bf16.mxu0 %v7838_v62  ;;  %4881 = vmatprep.subr.bf16.mxu1 %v7839_v22  ;;  %v7849_v62 = vld [vmem:[#allocation45_spill] sm:$0xff]  ;;  %v7850_v22 = vld [vmem:[#allocation46_spill] sm:$0xff] }
 0x4ce   :  { %4819 = vmatpush1.bf16.msra.mxu0 %v7840_v29  ;;  %4883 = vmatpush1.bf16.msra.mxu1 %v7841_v16  ;;  %v7851_v29 = vld [vmem:[#allocation47_spill] sm:$0xff]  ;;  %v7852_v16 = vld [vmem:[#allocation48_spill] sm:$0xff] }
 0x4cf   :  { %4821 = vmatprep.subr.bf16.mxu0 %v7842_v51  ;;  %4885 = vmatprep.subr.bf16.mxu1 %v7843_v11  ;;  %v7853_v51 = vld [vmem:[#allocation49_spill] sm:$0xff]  ;;  %v7854_v11 = vld [vmem:[#allocation50_spill] sm:$0xff] }
 0x4d2   :  { %4823 = vmatpush1.bf16.msra.mxu0 %v7844_v33  ;;  %4887 = vmatpush1.bf16.msra.mxu1 %v7845_v59  ;;  %v7855_v33 = vld [vmem:[#allocation51_spill] sm:$0xff]  ;;  %v7856_v59 = vld [vmem:[#allocation52_spill] sm:$0xff] }
 0x4d3   :  { %4825 = vmatprep.subr.bf16.mxu0 %v7846_v8  ;;  %4889 = vmatprep.subr.bf16.mxu1 %v7847_v37  ;;  %v7857_v8 = vld [vmem:[#allocation53_spill] sm:$0xff]  ;;  %v7858_v37 = vld [vmem:[#allocation54_spill] sm:$0xff] }
 0x4d6   :  { %4827 = vmatpush1.bf16.msra.mxu0 %v7848_v61  ;;  %4891 = vmatpush1.bf16.msra.mxu1 %v7849_v62  ;;  %v7859_v61 = vld [vmem:[#allocation55_spill] sm:$0xff]  ;;  %v7860_v62 = vld [vmem:[#allocation56_spill] sm:$0xff] }
 0x4d7   :  { %4829 = vmatprep.subr.bf16.mxu0 %v7850_v22  ;;  %4893 = vmatprep.subr.bf16.mxu1 %v7851_v29  ;;  %v7861_v22 = vld [vmem:[#allocation57_spill] sm:$0xff]  ;;  %v7862_v29 = vld [vmem:[#allocation58_spill] sm:$0xff] }
 0x4da   :  { %4831 = vmatpush1.bf16.msra.mxu0 %v7852_v16  ;;  %4895 = vmatpush1.bf16.msra.mxu1 %v7853_v51  ;;  %v7863_v16 = vld [vmem:[#allocation59_spill] sm:$0xff]  ;;  %v7864_v51 = vld [vmem:[#allocation60_spill] sm:$0xff] }
 0x4db   :  { %4833 = vmatprep.subr.bf16.mxu0 %v7854_v11  ;;  %4897 = vmatprep.subr.bf16.mxu1 %v7855_v33  ;;  %v7865_v11 = vld [vmem:[#allocation61_spill] sm:$0xff]  ;;  %v7866_v33 = vld [vmem:[#allocation62_spill] sm:$0xff] }
 0x4de   :  { %4835 = vmatpush1.bf16.msra.mxu0 %v7856_v59  ;;  %4899 = vmatpush1.bf16.msra.mxu1 %v7857_v8  ;;  %v7867_v59 = vld [vmem:[#allocation63_spill] sm:$0xff]  ;;  %v7868_v8 = vld [vmem:[#allocation64_spill] sm:$0xff] }
 0x4df   :  { %4837 = vmatprep.subr.bf16.mxu0 %v7858_v37  ;;  %4901 = vmatprep.subr.bf16.mxu1 %v7859_v61  ;;  %v7869_v37 = vld [vmem:[#allocation65_spill] sm:$0xff]  ;;  %v7870_v61 = vld [vmem:[#allocation66_spill] sm:$0xff] }
 0x4e2   :  { %4839 = vmatpush1.bf16.msra.mxu0 %v7860_v62  ;;  %4903 = vmatpush1.bf16.msra.mxu1 %v7861_v22  ;;  %v7871_v62 = vld [vmem:[#allocation67_spill] sm:$0xff]  ;;  %v7872_v22 = vld [vmem:[#allocation68_spill] sm:$0xff] }
 0x4e3   :  { %4841 = vmatprep.subr.bf16.mxu0 %v7862_v29  ;;  %4905 = vmatprep.subr.bf16.mxu1 %v7863_v16  ;;  %v7873_v29 = vld [vmem:[#allocation69_spill] sm:$0xff]  ;;  %v7874_v16 = vld [vmem:[#allocation70_spill] sm:$0xff] }
 0x4e6   :  { %4843 = vmatpush1.bf16.msra.mxu0 %v7864_v51  ;;  %4907 = vmatpush1.bf16.msra.mxu1 %v7865_v11  ;;  %v7875_v51 = vld [vmem:[#allocation71_spill] sm:$0xff]  ;;  %v7876_v11 = vld [vmem:[#allocation72_spill] sm:$0xff] }
 0x4e7   :  { %4845 = vmatprep.subr.bf16.mxu0 %v7866_v33  ;;  %4909 = vmatprep.subr.bf16.mxu1 %v7867_v59  ;;  %v7877_v33 = vld [vmem:[#allocation73_spill] sm:$0xff]  ;;  %v7878_v59 = vld [vmem:[#allocation14_spill] sm:$0xff] }
 0x4ea   :  { %4847 = vmatpush1.bf16.msra.mxu0 %v7868_v8  ;;  %4911 = vmatpush1.bf16.msra.mxu1 %v7869_v37  ;;  %v7879_v8 = vld [vmem:[#allocation15_spill] sm:$0xff] }
 0x4eb   :  { %4849 = vmatprep.subr.bf16.mxu0 %v7870_v61  ;;  %4913 = vmatprep.subr.bf16.mxu1 %v7871_v62 }
 0x4ee   :  { %4851 = vmatpush1.bf16.msra.mxu0 %v7872_v22  ;;  %4915 = vmatpush1.bf16.msra.mxu1 %v7873_v29 }
 0x4ef   :  { %4853 = vmatprep.subr.bf16.mxu0 %v7874_v16  ;;  %4917 = vmatprep.subr.bf16.mxu1 %v7875_v51 }
 0x4f2   :  { %4855 = vmatpush1.bf16.msra.mxu0 %v7876_v11  ;;  %4919 = vmatpush1.bf16.msra.mxu1 %v7877_v33 }
 0x4f3   :  { %4921 = vmatprep.subr.bf16.mxu0 %v7878_v59  ;;  %4953 = vmatprep.subr.bf16.mxu1 %v7879_v8 }
 0x568   :  { %v1859_v37 = vpop.f32.mrb[22].mxu0  ;;  %v1930_v61 = vpop.f32.mrb[22].mxu1 }
 0x569   :  { %v1860_v62 = vadd.f32 %v1859_v37, %v7880_v26  ;;  %v1861_v12 = vpop.f32.mrb[23].mxu0  ;;  %v1932_v22 = vpop.f32.mrb[23].mxu1  ;;  %v1931_v33 = vadd.f32 %v1930_v61, %v7756_v21 }
 0x56a   :  { %v1862_v29 = vadd.f32 %v1861_v12, %v7754_v25  ;;  %v1933_v51 = vadd.f32 %v1932_v22, %v7755_v30 }
 0x56b   :  { %v1935_v2 = vmul.f32 0.5, %v1860_v62  ;;  %v1937_v59 = vmul.f32 0.5, %v1931_v33 }
 0x56c   :  { %v1936_v16 = vmul.f32 0.5, %v1862_v29 }
 0x56d   :  { %5723 = vtanh.f32 %v1935_v2 }
 0x56e   :  { %5725 = vtanh.f32 %v1936_v16 }
 0x56f   :  { %5727 = vtanh.f32 %v1933_v51 }
 0x570   :  { %5729 = vtanh.f32 %v1937_v59 }
 0x577   :  { %v5724_v11 = vpop.eup %5723 }
 0x578   :  { %v1941_v8 = vadd.f32 1.0, %v5724_v11  ;;  %v5726_v6 = vpop.eup %5725 }
 0x579   :  { %v1942_v37 = vadd.f32 1.0, %v5726_v6  ;;  %v5728_v26 = vpop.eup %5727 }
 0x57a   :  { %v1944_v15 = vmul.f32 0.5, %v1941_v8  ;;  %v5730_v2 = vpop.eup %5729 }
 0x57b   :  { %v1945_v3 = vmul.f32 0.5, %v1942_v37  ;;  %v1943_v22 = vadd.f32 1.0, %v5730_v2 }
 0x57c   :  { %v1949_v18 = vmul.f32 %v5728_v26, %v1944_v15 }
 0x57d   :  { %v1948_v12 = vmul.f32 %v1945_v3, %v6744_v43  ;;  %v1946_v6 = vmul.f32 0.5, %v1943_v22 }
 0x57f   :  { %v6862_v62 = vadd.f32 %v1949_v18, %v1948_v12 }
 0x581   :  { %5731 = vtanh.f32 %v6862_v62 }
 0x588   :  { %v2028_v29 = vpop.f32.mrb[8].mxu0  ;;  %v2099_v61 = vpop.f32.mrb[8].mxu1 }
 0x589   :  { %v5592_v16 = vadd.f32 %v2028_v29, %v7694_v34  ;;  %v2030_v51 = vpop.f32.mrb[9].mxu0  ;;  %v2101_v11 = vpop.f32.mrb[9].mxu1  ;;  %v5608_v3 = vadd.f32 %v2099_v61, %v6381_v52 }
 0x58a   :  { %v5593_v33 = vadd.f32 %v2030_v51, %v7695_v28  ;;  %v5609_v43 = vadd.f32 %v2101_v11, %v6374_v41 }
 0x58b   :  { %v2108_v59 = vmul.f32 0.5, %v5592_v16  ;;  %v5732_v8 = vpop.eup %5731  ;;  %v2110_v26 = vmul.f32 0.5, %v5608_v3  ;;  %v7883_v3 = vld [vmem:[#allocation17_spill] sm:$0xff] }
 0x58c   :  { %v2109_v15 = vmul.f32 0.5, %v5593_v33  ;;  %v6868_v18 = vmul.f32 %v5732_v8, %v1946_v6 }
 0x58d   :  { %5733 = vtanh.f32 %v2108_v59 }
 0x58e   :  { %7881 = vst [vmem:[#allocation78_spill] sm:$0xff] %v6868_v18  ;;  %5735 = vtanh.f32 %v2109_v15  ;;  %2190 = vmatprep.mubr.f32.mxu0 %v6868_v18  ;;  %2261 = vmatprep.mubr.f32.mxu1 %v6868_v18  ;;  %v7899_v18 = vld [vmem:[#allocation33_spill] sm:$0xff] }
 0x58f   :  { %5737 = vtanh.f32 %v5609_v43 }
 0x590   :  { %5739 = vtanh.f32 %v2110_v26  ;;  %v7884_v26 = vld [vmem:[#allocation18_spill] sm:$0xff] }
 0x597   :  { %v5734_v37 = vpop.eup %5733 }
 0x598   :  { %v2114_v12 = vadd.f32 1.0, %v5734_v37  ;;  %v5736_v2 = vpop.eup %5735  ;;  %v7885_v37 = vld [vmem:[#allocation19_spill] sm:$0xff] }
 0x599   :  { %v2115_v29 = vadd.f32 1.0, %v5736_v2  ;;  %v5738_v16 = vpop.eup %5737  ;;  %v7887_v2 = vld [vmem:[#allocation21_spill] sm:$0xff] }
 0x59a   :  { %v2117_v22 = vmul.f32 0.5, %v2114_v12  ;;  %v5740_v59 = vpop.eup %5739  ;;  %v7886_v12 = vld [vmem:[#allocation20_spill] sm:$0xff] }
 0x59b   :  { %v2118_v51 = vmul.f32 0.5, %v2115_v29  ;;  %v2116_v8 = vadd.f32 1.0, %v5740_v59  ;;  %v7889_v29 = vld [vmem:[#allocation23_spill] sm:$0xff]  ;;  %v7894_v59 = vld [vmem:[#allocation28_spill] sm:$0xff] }
 0x59c   :  { %v2122_v11 = vmul.f32 %v5738_v16, %v2117_v22  ;;  %v7888_v22 = vld [vmem:[#allocation22_spill] sm:$0xff]  ;;  %v7890_v16 = vld [vmem:[#allocation24_spill] sm:$0xff] }
 0x59d   :  { %v2121_v33 = vmul.f32 %v2118_v51, %v6756_v0  ;;  %v2119_v15 = vmul.f32 0.5, %v2116_v8  ;;  %v7882_v0 = vld [vmem:[#allocation16_spill] sm:$0xff]  ;;  %v7891_v51 = vld [vmem:[#allocation25_spill] sm:$0xff] }
 0x59e   :  { %v7895_v8 = vld [vmem:[#allocation29_spill] sm:$0xff] }
 0x59f   :  { %v6874_v6 = vadd.f32 %v2122_v11, %v2121_v33  ;;  %v7892_v11 = vld [vmem:[#allocation26_spill] sm:$0xff]  ;;  %v7893_v33 = vld [vmem:[#allocation27_spill] sm:$0xff] }
 0x5a1   :  { %5741 = vtanh.f32 %v6874_v6 }
 0x5ab   :  { %v5742_v61 = vpop.eup %5741 }
 0x5ac   :  { %v2125_v43 = vmul.f32 %v5742_v61, %v2119_v15  ;;  %v7896_v15 = vld [vmem:[#allocation30_spill] sm:$0xff]  ;;  %v7897_v61 = vld [vmem:[#allocation31_spill] sm:$0xff] }
 0x5ae   :  { %2191 = vmatmul.mubr.f32.vlgmr.msra.gmra.mrb[24].mxu0 %v2125_v43  ;;  %2262 = vmatmul.mubr.f32.vlgmr.msra.gmra.mrb[24].mxu1 %v2125_v43 }
 0x5af   :  { %4923 = vmatpush1.bf16.msra.mxu0 %v6012_v35  ;;  %4955 = vmatpush1.bf16.msra.mxu1 %v6015_v38 }
 0x5b0   :  { %4925 = vmatprep.subr.bf16.mxu0 %v6018_v42  ;;  %4957 = vmatprep.subr.bf16.mxu1 %v6024_v47 }
 0x5b1   :  { %2359 = vmatprep.mubr.f32.mxu0 %v7633_v55  ;;  %2430 = vmatprep.mubr.f32.mxu1 %v7633_v55 }
 0x5b3   :  { %4927 = vmatpush1.bf16.msra.mxu0 %v6028_v50  ;;  %4959 = vmatpush1.bf16.msra.mxu1 %v6032_v54 }
 0x5b4   :  { %4929 = vmatprep.subr.bf16.mxu0 %v6036_v57  ;;  %4961 = vmatprep.subr.bf16.mxu1 %v6040_v60 }
 0x5b7   :  { %4931 = vmatpush1.bf16.msra.mxu0 %v6047_v1  ;;  %4963 = vmatpush1.bf16.msra.mxu1 %v6051_v4 }
 0x5b8   :  { %4933 = vmatprep.subr.bf16.mxu0 %v6055_v7  ;;  %4965 = vmatprep.subr.bf16.mxu1 %v6059_v10 }
 0x5bb   :  { %4935 = vmatpush1.bf16.msra.mxu0 %v6066_v14  ;;  %4967 = vmatpush1.bf16.msra.mxu1 %v6070_v17 }
 0x5bc   :  { %4937 = vmatprep.subr.bf16.mxu0 %v6074_v20  ;;  %4969 = vmatprep.subr.bf16.mxu1 %v6078_v23 }
 0x5bf   :  { %4939 = vmatpush1.bf16.msra.mxu0 %v6085_v27  ;;  %4971 = vmatpush1.bf16.msra.mxu1 %v6089_v32 }
 0x5c0   :  { %4941 = vmatprep.subr.bf16.mxu0 %v6093_v36  ;;  %4973 = vmatprep.subr.bf16.mxu1 %v6097_v40 }
 0x5c3   :  { %4943 = vmatpush1.bf16.msra.mxu0 %v6104_v45  ;;  %4975 = vmatpush1.bf16.msra.mxu1 %v6108_v49 }
 0x5c4   :  { %4945 = vmatprep.subr.bf16.mxu0 %v6112_v53  ;;  %4977 = vmatprep.subr.bf16.mxu1 %v6116_v58 }
 0x5c7   :  { %4947 = vmatpush1.bf16.msra.mxu0 %v6123_v63  ;;  %4979 = vmatpush1.bf16.msra.mxu1 %v6127_v5 }
 0x5c8   :  { %4949 = vmatprep.subr.bf16.mxu0 %v6131_v9  ;;  %4981 = vmatprep.subr.bf16.mxu1 %v6135_v13 }
 0x5cb   :  { %4951 = vmatpush1.bf16.msra.mxu0 %v6142_v19  ;;  %4983 = vmatpush1.bf16.msra.mxu1 %v6146_v24 }
 0x5cc   :  { %4985 = vmatprep.subr.bf16.mxu0 %v6150_v31  ;;  %5049 = vmatprep.subr.bf16.mxu1 %v6154_v39 }
 0x5ce   :  { %2360 = vmatmul.mubr.f32.vlgmr.msra.gmra.mrb[10].mxu0 %v2125_v43  ;;  %2431 = vmatmul.mubr.f32.vlgmr.msra.gmra.mrb[10].mxu1 %v2125_v43  ;;  %v7898_v43 = vld [vmem:[#allocation32_spill] sm:$0xff] }
 0x5cf   :  { %4987 = vmatpush1.bf16.msra.mxu0 %v6158_v44  ;;  %5051 = vmatpush1.bf16.msra.mxu1 %v6162_v46 }
 0x5d0   :  { %4989 = vmatprep.subr.bf16.mxu0 %v6164_v48  ;;  %5053 = vmatprep.subr.bf16.mxu1 %v6168_v56 }
 0x5d3   :  { %4991 = vmatpush1.bf16.msra.mxu0 %v7882_v0  ;;  %5055 = vmatpush1.bf16.msra.mxu1 %v7883_v3 }
 0x5d4   :  { %4993 = vmatprep.subr.bf16.mxu0 %v7884_v26  ;;  %5057 = vmatprep.subr.bf16.mxu1 %v7885_v37 }
 0x5d7   :  { %4995 = vmatpush1.bf16.msra.mxu0 %v7886_v12  ;;  %5059 = vmatpush1.bf16.msra.mxu1 %v7887_v2 }
 0x5d8   :  { %4997 = vmatprep.subr.bf16.mxu0 %v7888_v22  ;;  %5061 = vmatprep.subr.bf16.mxu1 %v7889_v29  ;;  %v7900_v29 = vld [vmem:[#allocation34_spill] sm:$0xff]  ;;  %v7942_v22 = vld [vmem:[#allocation76_spill] sm:$0xff] }
 0x5db   :  { %4999 = vmatpush1.bf16.msra.mxu0 %v7890_v16  ;;  %5063 = vmatpush1.bf16.msra.mxu1 %v7891_v51  ;;  %v7901_v16 = vld [vmem:[#allocation35_spill] sm:$0xff]  ;;  %v7902_v51 = vld [vmem:[#allocation36_spill] sm:$0xff] }
 0x5dc   :  { %5001 = vmatprep.subr.bf16.mxu0 %v7892_v11  ;;  %5065 = vmatprep.subr.bf16.mxu1 %v7893_v33  ;;  %v7903_v11 = vld [vmem:[#allocation37_spill] sm:$0xff]  ;;  %v7904_v33 = vld [vmem:[#allocation38_spill] sm:$0xff] }
 0x5df   :  { %5003 = vmatpush1.bf16.msra.mxu0 %v7894_v59  ;;  %5067 = vmatpush1.bf16.msra.mxu1 %v7895_v8  ;;  %v7905_v59 = vld [vmem:[#allocation39_spill] sm:$0xff]  ;;  %v7906_v8 = vld [vmem:[#allocation40_spill] sm:$0xff] }
 0x5e0   :  { %5005 = vmatprep.subr.bf16.mxu0 %v7896_v15  ;;  %5069 = vmatprep.subr.bf16.mxu1 %v7897_v61  ;;  %v7907_v15 = vld [vmem:[#allocation41_spill] sm:$0xff]  ;;  %v7908_v61 = vld [vmem:[#allocation42_spill] sm:$0xff] }
 0x5e3   :  { %5007 = vmatpush1.bf16.msra.mxu0 %v7898_v43  ;;  %5071 = vmatpush1.bf16.msra.mxu1 %v7899_v18  ;;  %v7909_v43 = vld [vmem:[#allocation43_spill] sm:$0xff]  ;;  %v7910_v18 = vld [vmem:[#allocation44_spill] sm:$0xff] }
 0x5e4   :  { %5009 = vmatprep.subr.bf16.mxu0 %v7900_v29  ;;  %5073 = vmatprep.subr.bf16.mxu1 %v7901_v16  ;;  %v7911_v29 = vld [vmem:[#allocation45_spill] sm:$0xff]  ;;  %v7912_v16 = vld [vmem:[#allocation46_spill] sm:$0xff] }
 0x5e7   :  { %5011 = vmatpush1.bf16.msra.mxu0 %v7902_v51  ;;  %5075 = vmatpush1.bf16.msra.mxu1 %v7903_v11  ;;  %v7913_v51 = vld [vmem:[#allocation47_spill] sm:$0xff]  ;;  %v7914_v11 = vld [vmem:[#allocation48_spill] sm:$0xff] }
 0x5e8   :  { %5013 = vmatprep.subr.bf16.mxu0 %v7904_v33  ;;  %5077 = vmatprep.subr.bf16.mxu1 %v7905_v59  ;;  %v7915_v33 = vld [vmem:[#allocation49_spill] sm:$0xff]  ;;  %v7916_v59 = vld [vmem:[#allocation50_spill] sm:$0xff] }
 0x5eb   :  { %5015 = vmatpush1.bf16.msra.mxu0 %v7906_v8  ;;  %5079 = vmatpush1.bf16.msra.mxu1 %v7907_v15  ;;  %v7917_v8 = vld [vmem:[#allocation51_spill] sm:$0xff]  ;;  %v7918_v15 = vld [vmem:[#allocation52_spill] sm:$0xff] }
 0x5ec   :  { %5017 = vmatprep.subr.bf16.mxu0 %v7908_v61  ;;  %5081 = vmatprep.subr.bf16.mxu1 %v7909_v43  ;;  %v7919_v61 = vld [vmem:[#allocation53_spill] sm:$0xff]  ;;  %v7920_v43 = vld [vmem:[#allocation54_spill] sm:$0xff] }
 0x5ef   :  { %5019 = vmatpush1.bf16.msra.mxu0 %v7910_v18  ;;  %5083 = vmatpush1.bf16.msra.mxu1 %v7911_v29  ;;  %v7921_v18 = vld [vmem:[#allocation55_spill] sm:$0xff]  ;;  %v7922_v29 = vld [vmem:[#allocation56_spill] sm:$0xff] }
 0x5f0   :  { %5021 = vmatprep.subr.bf16.mxu0 %v7912_v16  ;;  %5085 = vmatprep.subr.bf16.mxu1 %v7913_v51  ;;  %v7923_v16 = vld [vmem:[#allocation57_spill] sm:$0xff]  ;;  %v7924_v51 = vld [vmem:[#allocation58_spill] sm:$0xff] }
 0x5f3   :  { %5023 = vmatpush1.bf16.msra.mxu0 %v7914_v11  ;;  %5087 = vmatpush1.bf16.msra.mxu1 %v7915_v33  ;;  %v7925_v11 = vld [vmem:[#allocation59_spill] sm:$0xff]  ;;  %v7926_v33 = vld [vmem:[#allocation60_spill] sm:$0xff] }
 0x5f4   :  { %5025 = vmatprep.subr.bf16.mxu0 %v7916_v59  ;;  %5089 = vmatprep.subr.bf16.mxu1 %v7917_v8  ;;  %v7927_v59 = vld [vmem:[#allocation61_spill] sm:$0xff]  ;;  %v7928_v8 = vld [vmem:[#allocation62_spill] sm:$0xff] }
 0x5f7   :  { %5027 = vmatpush1.bf16.msra.mxu0 %v7918_v15  ;;  %5091 = vmatpush1.bf16.msra.mxu1 %v7919_v61  ;;  %v7929_v15 = vld [vmem:[#allocation63_spill] sm:$0xff]  ;;  %v7930_v61 = vld [vmem:[#allocation64_spill] sm:$0xff] }
 0x5f8   :  { %5029 = vmatprep.subr.bf16.mxu0 %v7920_v43  ;;  %5093 = vmatprep.subr.bf16.mxu1 %v7921_v18  ;;  %v7931_v43 = vld [vmem:[#allocation65_spill] sm:$0xff]  ;;  %v7932_v18 = vld [vmem:[#allocation66_spill] sm:$0xff] }
 0x5fb   :  { %5031 = vmatpush1.bf16.msra.mxu0 %v7922_v29  ;;  %5095 = vmatpush1.bf16.msra.mxu1 %v7923_v16  ;;  %v7933_v29 = vld [vmem:[#allocation67_spill] sm:$0xff]  ;;  %v7934_v16 = vld [vmem:[#allocation68_spill] sm:$0xff] }
 0x5fc   :  { %5033 = vmatprep.subr.bf16.mxu0 %v7924_v51  ;;  %5097 = vmatprep.subr.bf16.mxu1 %v7925_v11  ;;  %v7935_v51 = vld [vmem:[#allocation69_spill] sm:$0xff]  ;;  %v7936_v11 = vld [vmem:[#allocation70_spill] sm:$0xff] }
 0x5ff   :  { %5035 = vmatpush1.bf16.msra.mxu0 %v7926_v33  ;;  %5099 = vmatpush1.bf16.msra.mxu1 %v7927_v59  ;;  %v7937_v33 = vld [vmem:[#allocation71_spill] sm:$0xff]  ;;  %v7938_v59 = vld [vmem:[#allocation72_spill] sm:$0xff] }
 0x600   :  { %5037 = vmatprep.subr.bf16.mxu0 %v7928_v8  ;;  %5101 = vmatprep.subr.bf16.mxu1 %v7929_v15  ;;  %v7939_v8 = vld [vmem:[#allocation73_spill] sm:$0xff]  ;;  %v7940_v15 = vld [vmem:[#allocation14_spill] sm:$0xff] }
 0x603   :  { %5039 = vmatpush1.bf16.msra.mxu0 %v7930_v61  ;;  %5103 = vmatpush1.bf16.msra.mxu1 %v7931_v43  ;;  %v7941_v61 = vld [vmem:[#allocation15_spill] sm:$0xff] }
 0x604   :  { %5041 = vmatprep.subr.bf16.mxu0 %v7932_v18  ;;  %5105 = vmatprep.subr.bf16.mxu1 %v7933_v29 }
 0x607   :  { %5043 = vmatpush1.bf16.msra.mxu0 %v7934_v16  ;;  %5107 = vmatpush1.bf16.msra.mxu1 %v7935_v51 }
 0x608   :  { %5045 = vmatprep.subr.bf16.mxu0 %v7936_v11  ;;  %5109 = vmatprep.subr.bf16.mxu1 %v7937_v33 }
 0x60b   :  { %5047 = vmatpush1.bf16.msra.mxu0 %v7938_v59  ;;  %5111 = vmatpush1.bf16.msra.mxu1 %v7939_v8 }
 0x60c   :  { %5113 = vmatprep.subr.bf16.mxu0 %v7940_v15  ;;  %5145 = vmatprep.subr.bf16.mxu1 %v7941_v61 }
 0x681   :  { %v2192_v43 = vpop.f32.mrb[24].mxu0  ;;  %v2263_v18 = vpop.f32.mrb[24].mxu1 }
 0x682   :  { %v2193_v29 = vadd.f32 %v2192_v43, %v7942_v22  ;;  %v2194_v2 = vpop.f32.mrb[25].mxu0  ;;  %v2265_v16 = vpop.f32.mrb[25].mxu1  ;;  %v2264_v8 = vadd.f32 %v2263_v18, %v7756_v21 }
 0x683   :  { %v2195_v51 = vadd.f32 %v2194_v2, %v7754_v25  ;;  %v2266_v33 = vadd.f32 %v2265_v16, %v7755_v30 }
 0x684   :  { %v2268_v12 = vmul.f32 0.5, %v2193_v29  ;;  %v2270_v15 = vmul.f32 0.5, %v2264_v8 }
 0x685   :  { %v2269_v11 = vmul.f32 0.5, %v2195_v51 }
 0x686   :  { %5743 = vtanh.f32 %v2268_v12 }
 0x687   :  { %5745 = vtanh.f32 %v2269_v11 }
 0x688   :  { %5747 = vtanh.f32 %v2266_v33 }
 0x689   :  { %5749 = vtanh.f32 %v2270_v15 }
 0x690   :  { %v5744_v59 = vpop.eup %5743 }
 0x691   :  { %v2274_v61 = vadd.f32 1.0, %v5744_v59  ;;  %v5746_v37 = vpop.eup %5745 }
 0x692   :  { %v2275_v43 = vadd.f32 1.0, %v5746_v37  ;;  %v5748_v22 = vpop.eup %5747 }
 0x693   :  { %v2277_v26 = vmul.f32 0.5, %v2274_v61  ;;  %v5750_v12 = vpop.eup %5749 }
 0x694   :  { %v2278_v3 = vmul.f32 0.5, %v2275_v43  ;;  %v2276_v16 = vadd.f32 1.0, %v5750_v12 }
 0x695   :  { %v2282_v0 = vmul.f32 %v5748_v22, %v2277_v26 }
 0x696   :  { %v2281_v2 = vmul.f32 %v2278_v3, %v6862_v62  ;;  %v2279_v37 = vmul.f32 0.5, %v2276_v16 }
 0x698   :  { %v6980_v29 = vadd.f32 %v2282_v0, %v2281_v2 }
 0x69a   :  { %5751 = vtanh.f32 %v6980_v29 }
 0x6a1   :  { %v2361_v51 = vpop.f32.mrb[10].mxu0  ;;  %v2432_v18 = vpop.f32.mrb[10].mxu1 }
 0x6a2   :  { %v5594_v11 = vadd.f32 %v2361_v51, %v7694_v34  ;;  %v2363_v33 = vpop.f32.mrb[11].mxu0  ;;  %v2434_v59 = vpop.f32.mrb[11].mxu1  ;;  %v5610_v3 = vadd.f32 %v2432_v18, %v6381_v52 }
 0x6a3   :  { %v5595_v8 = vadd.f32 %v2363_v33, %v7695_v28  ;;  %v5611_v62 = vadd.f32 %v2434_v59, %v6374_v41 }
 0x6a4   :  { %v2441_v15 = vmul.f32 0.5, %v5594_v11  ;;  %v5752_v61 = vpop.eup %5751  ;;  %v2443_v22 = vmul.f32 0.5, %v5610_v3  ;;  %v7945_v3 = vld [vmem:[#allocation17_spill] sm:$0xff] }
 0x6a5   :  { %v2442_v26 = vmul.f32 0.5, %v5595_v8  ;;  %v6986_v0 = vmul.f32 %v5752_v61, %v2279_v37 }
 0x6a6   :  { %5753 = vtanh.f32 %v2441_v15 }
 0x6a7   :  { %7943 = vst [vmem:[#allocation79_spill] sm:$0xff] %v6986_v0  ;;  %5755 = vtanh.f32 %v2442_v26  ;;  %2523 = vmatprep.mubr.f32.mxu0 %v6986_v0  ;;  %2594 = vmatprep.mubr.f32.mxu1 %v6986_v0  ;;  %v7961_v0 = vld [vmem:[#allocation33_spill] sm:$0xff] }
 0x6a8   :  { %5757 = vtanh.f32 %v5611_v62 }
 0x6a9   :  { %5759 = vtanh.f32 %v2443_v22  ;;  %v7946_v22 = vld [vmem:[#allocation18_spill] sm:$0xff] }
 0x6b0   :  { %v5754_v43 = vpop.eup %5753 }
 0x6b1   :  { %v2447_v2 = vadd.f32 1.0, %v5754_v43  ;;  %v5756_v12 = vpop.eup %5755  ;;  %v7947_v43 = vld [vmem:[#allocation19_spill] sm:$0xff] }
 0x6b2   :  { %v2448_v51 = vadd.f32 1.0, %v5756_v12  ;;  %v5758_v11 = vpop.eup %5757  ;;  %v7949_v12 = vld [vmem:[#allocation21_spill] sm:$0xff] }
 0x6b3   :  { %v2450_v16 = vmul.f32 0.5, %v2447_v2  ;;  %v5760_v15 = vpop.eup %5759  ;;  %v7948_v2 = vld [vmem:[#allocation20_spill] sm:$0xff] }
 0x6b4   :  { %v2451_v33 = vmul.f32 0.5, %v2448_v51  ;;  %v2449_v61 = vadd.f32 1.0, %v5760_v15  ;;  %v7951_v51 = vld [vmem:[#allocation23_spill] sm:$0xff]  ;;  %v7956_v15 = vld [vmem:[#allocation28_spill] sm:$0xff] }
 0x6b5   :  { %v2455_v59 = vmul.f32 %v5758_v11, %v2450_v16  ;;  %v7950_v16 = vld [vmem:[#allocation22_spill] sm:$0xff]  ;;  %v7952_v11 = vld [vmem:[#allocation24_spill] sm:$0xff] }
 0x6b6   :  { %v2454_v8 = vmul.f32 %v2451_v33, %v6874_v6  ;;  %v2452_v26 = vmul.f32 0.5, %v2449_v61  ;;  %v7944_v6 = vld [vmem:[#allocation16_spill] sm:$0xff]  ;;  %v7953_v33 = vld [vmem:[#allocation25_spill] sm:$0xff] }
 0x6b7   :  { %v7957_v61 = vld [vmem:[#allocation29_spill] sm:$0xff] }
 0x6b8   :  { %v6992_v37 = vadd.f32 %v2455_v59, %v2454_v8  ;;  %v7954_v59 = vld [vmem:[#allocation26_spill] sm:$0xff]  ;;  %v7955_v8 = vld [vmem:[#allocation27_spill] sm:$0xff] }
 0x6ba   :  { %5761 = vtanh.f32 %v6992_v37 }
 0x6c4   :  { %v5762_v18 = vpop.eup %5761 }
 0x6c5   :  { %v2458_v62 = vmul.f32 %v5762_v18, %v2452_v26  ;;  %v7958_v26 = vld [vmem:[#allocation30_spill] sm:$0xff]  ;;  %v7959_v18 = vld [vmem:[#allocation31_spill] sm:$0xff] }
 0x6c7   :  { %2524 = vmatmul.mubr.f32.vlgmr.msra.gmra.mrb[26].mxu0 %v2458_v62  ;;  %2595 = vmatmul.mubr.f32.vlgmr.msra.gmra.mrb[26].mxu1 %v2458_v62 }
 0x6c8   :  { %5115 = vmatpush1.bf16.msra.mxu0 %v6012_v35  ;;  %5147 = vmatpush1.bf16.msra.mxu1 %v6015_v38 }
 0x6c9   :  { %5117 = vmatprep.subr.bf16.mxu0 %v6018_v42  ;;  %5149 = vmatprep.subr.bf16.mxu1 %v6024_v47 }
 0x6ca   :  { %2692 = vmatprep.mubr.f32.mxu0 %v7633_v55  ;;  %2763 = vmatprep.mubr.f32.mxu1 %v7633_v55 }
 0x6cc   :  { %5119 = vmatpush1.bf16.msra.mxu0 %v6028_v50  ;;  %5151 = vmatpush1.bf16.msra.mxu1 %v6032_v54 }
 0x6cd   :  { %5121 = vmatprep.subr.bf16.mxu0 %v6036_v57  ;;  %5153 = vmatprep.subr.bf16.mxu1 %v6040_v60 }
 0x6d0   :  { %5123 = vmatpush1.bf16.msra.mxu0 %v6047_v1  ;;  %5155 = vmatpush1.bf16.msra.mxu1 %v6051_v4 }
 0x6d1   :  { %5125 = vmatprep.subr.bf16.mxu0 %v6055_v7  ;;  %5157 = vmatprep.subr.bf16.mxu1 %v6059_v10 }
 0x6d4   :  { %5127 = vmatpush1.bf16.msra.mxu0 %v6066_v14  ;;  %5159 = vmatpush1.bf16.msra.mxu1 %v6070_v17 }
 0x6d5   :  { %5129 = vmatprep.subr.bf16.mxu0 %v6074_v20  ;;  %5161 = vmatprep.subr.bf16.mxu1 %v6078_v23 }
 0x6d8   :  { %5131 = vmatpush1.bf16.msra.mxu0 %v6085_v27  ;;  %5163 = vmatpush1.bf16.msra.mxu1 %v6089_v32 }
 0x6d9   :  { %5133 = vmatprep.subr.bf16.mxu0 %v6093_v36  ;;  %5165 = vmatprep.subr.bf16.mxu1 %v6097_v40 }
 0x6dc   :  { %5135 = vmatpush1.bf16.msra.mxu0 %v6104_v45  ;;  %5167 = vmatpush1.bf16.msra.mxu1 %v6108_v49 }
 0x6dd   :  { %5137 = vmatprep.subr.bf16.mxu0 %v6112_v53  ;;  %5169 = vmatprep.subr.bf16.mxu1 %v6116_v58 }
 0x6e0   :  { %5139 = vmatpush1.bf16.msra.mxu0 %v6123_v63  ;;  %5171 = vmatpush1.bf16.msra.mxu1 %v6127_v5 }
 0x6e1   :  { %5141 = vmatprep.subr.bf16.mxu0 %v6131_v9  ;;  %5173 = vmatprep.subr.bf16.mxu1 %v6135_v13 }
 0x6e4   :  { %5143 = vmatpush1.bf16.msra.mxu0 %v6142_v19  ;;  %5175 = vmatpush1.bf16.msra.mxu1 %v6146_v24 }
 0x6e5   :  { %5177 = vmatprep.subr.bf16.mxu0 %v6150_v31  ;;  %5241 = vmatprep.subr.bf16.mxu1 %v6154_v39 }
 0x6e7   :  { %2693 = vmatmul.mubr.f32.vlgmr.msra.gmra.mrb[12].mxu0 %v2458_v62  ;;  %2764 = vmatmul.mubr.f32.vlgmr.msra.gmra.mrb[12].mxu1 %v2458_v62  ;;  %v7960_v62 = vld [vmem:[#allocation32_spill] sm:$0xff] }
 0x6e8   :  { %5179 = vmatpush1.bf16.msra.mxu0 %v6158_v44  ;;  %5243 = vmatpush1.bf16.msra.mxu1 %v6162_v46 }
 0x6e9   :  { %5181 = vmatprep.subr.bf16.mxu0 %v6164_v48  ;;  %5245 = vmatprep.subr.bf16.mxu1 %v6168_v56 }
 0x6ec   :  { %5183 = vmatpush1.bf16.msra.mxu0 %v7944_v6  ;;  %5247 = vmatpush1.bf16.msra.mxu1 %v7945_v3 }
 0x6ed   :  { %5185 = vmatprep.subr.bf16.mxu0 %v7946_v22  ;;  %5249 = vmatprep.subr.bf16.mxu1 %v7947_v43 }
 0x6f0   :  { %5187 = vmatpush1.bf16.msra.mxu0 %v7948_v2  ;;  %5251 = vmatpush1.bf16.msra.mxu1 %v7949_v12 }
 0x6f1   :  { %5189 = vmatprep.subr.bf16.mxu0 %v7950_v16  ;;  %5253 = vmatprep.subr.bf16.mxu1 %v7951_v51  ;;  %v7962_v51 = vld [vmem:[#allocation34_spill] sm:$0xff]  ;;  %v8004_v16 = vld [vmem:[#allocation76_spill] sm:$0xff] }
 0x6f4   :  { %5191 = vmatpush1.bf16.msra.mxu0 %v7952_v11  ;;  %5255 = vmatpush1.bf16.msra.mxu1 %v7953_v33  ;;  %v7963_v11 = vld [vmem:[#allocation35_spill] sm:$0xff]  ;;  %v7964_v33 = vld [vmem:[#allocation36_spill] sm:$0xff] }
 0x6f5   :  { %5193 = vmatprep.subr.bf16.mxu0 %v7954_v59  ;;  %5257 = vmatprep.subr.bf16.mxu1 %v7955_v8  ;;  %v7965_v59 = vld [vmem:[#allocation37_spill] sm:$0xff]  ;;  %v7966_v8 = vld [vmem:[#allocation38_spill] sm:$0xff] }
 0x6f8   :  { %5195 = vmatpush1.bf16.msra.mxu0 %v7956_v15  ;;  %5259 = vmatpush1.bf16.msra.mxu1 %v7957_v61  ;;  %v7967_v15 = vld [vmem:[#allocation39_spill] sm:$0xff]  ;;  %v7968_v61 = vld [vmem:[#allocation40_spill] sm:$0xff] }
 0x6f9   :  { %5197 = vmatprep.subr.bf16.mxu0 %v7958_v26  ;;  %5261 = vmatprep.subr.bf16.mxu1 %v7959_v18  ;;  %v7969_v26 = vld [vmem:[#allocation41_spill] sm:$0xff]  ;;  %v7970_v18 = vld [vmem:[#allocation42_spill] sm:$0xff] }
 0x6fc   :  { %5199 = vmatpush1.bf16.msra.mxu0 %v7960_v62  ;;  %5263 = vmatpush1.bf16.msra.mxu1 %v7961_v0  ;;  %v7971_v62 = vld [vmem:[#allocation43_spill] sm:$0xff]  ;;  %v7972_v0 = vld [vmem:[#allocation44_spill] sm:$0xff] }
 0x6fd   :  { %5201 = vmatprep.subr.bf16.mxu0 %v7962_v51  ;;  %5265 = vmatprep.subr.bf16.mxu1 %v7963_v11  ;;  %v7973_v51 = vld [vmem:[#allocation45_spill] sm:$0xff]  ;;  %v7974_v11 = vld [vmem:[#allocation46_spill] sm:$0xff] }
 0x700   :  { %5203 = vmatpush1.bf16.msra.mxu0 %v7964_v33  ;;  %5267 = vmatpush1.bf16.msra.mxu1 %v7965_v59  ;;  %v7975_v33 = vld [vmem:[#allocation47_spill] sm:$0xff]  ;;  %v7976_v59 = vld [vmem:[#allocation48_spill] sm:$0xff] }
 0x701   :  { %5205 = vmatprep.subr.bf16.mxu0 %v7966_v8  ;;  %5269 = vmatprep.subr.bf16.mxu1 %v7967_v15  ;;  %v7977_v8 = vld [vmem:[#allocation49_spill] sm:$0xff]  ;;  %v7978_v15 = vld [vmem:[#allocation50_spill] sm:$0xff] }
 0x704   :  { %5207 = vmatpush1.bf16.msra.mxu0 %v7968_v61  ;;  %5271 = vmatpush1.bf16.msra.mxu1 %v7969_v26  ;;  %v7979_v61 = vld [vmem:[#allocation51_spill] sm:$0xff]  ;;  %v7980_v26 = vld [vmem:[#allocation52_spill] sm:$0xff] }
 0x705   :  { %5209 = vmatprep.subr.bf16.mxu0 %v7970_v18  ;;  %5273 = vmatprep.subr.bf16.mxu1 %v7971_v62  ;;  %v7981_v18 = vld [vmem:[#allocation53_spill] sm:$0xff]  ;;  %v7982_v62 = vld [vmem:[#allocation54_spill] sm:$0xff] }
 0x708   :  { %5211 = vmatpush1.bf16.msra.mxu0 %v7972_v0  ;;  %5275 = vmatpush1.bf16.msra.mxu1 %v7973_v51  ;;  %v7983_v0 = vld [vmem:[#allocation55_spill] sm:$0xff]  ;;  %v7984_v51 = vld [vmem:[#allocation56_spill] sm:$0xff] }
 0x709   :  { %5213 = vmatprep.subr.bf16.mxu0 %v7974_v11  ;;  %5277 = vmatprep.subr.bf16.mxu1 %v7975_v33  ;;  %v7985_v11 = vld [vmem:[#allocation57_spill] sm:$0xff]  ;;  %v7986_v33 = vld [vmem:[#allocation58_spill] sm:$0xff] }
 0x70c   :  { %5215 = vmatpush1.bf16.msra.mxu0 %v7976_v59  ;;  %5279 = vmatpush1.bf16.msra.mxu1 %v7977_v8  ;;  %v7987_v59 = vld [vmem:[#allocation59_spill] sm:$0xff]  ;;  %v7988_v8 = vld [vmem:[#allocation60_spill] sm:$0xff] }
 0x70d   :  { %5217 = vmatprep.subr.bf16.mxu0 %v7978_v15  ;;  %5281 = vmatprep.subr.bf16.mxu1 %v7979_v61  ;;  %v7989_v15 = vld [vmem:[#allocation61_spill] sm:$0xff]  ;;  %v7990_v61 = vld [vmem:[#allocation62_spill] sm:$0xff] }
 0x710   :  { %5219 = vmatpush1.bf16.msra.mxu0 %v7980_v26  ;;  %5283 = vmatpush1.bf16.msra.mxu1 %v7981_v18  ;;  %v7991_v26 = vld [vmem:[#allocation63_spill] sm:$0xff]  ;;  %v7992_v18 = vld [vmem:[#allocation64_spill] sm:$0xff] }
 0x711   :  { %5221 = vmatprep.subr.bf16.mxu0 %v7982_v62  ;;  %5285 = vmatprep.subr.bf16.mxu1 %v7983_v0  ;;  %v7993_v62 = vld [vmem:[#allocation65_spill] sm:$0xff]  ;;  %v7994_v0 = vld [vmem:[#allocation66_spill] sm:$0xff] }
 0x714   :  { %5223 = vmatpush1.bf16.msra.mxu0 %v7984_v51  ;;  %5287 = vmatpush1.bf16.msra.mxu1 %v7985_v11  ;;  %v7995_v51 = vld [vmem:[#allocation67_spill] sm:$0xff]  ;;  %v7996_v11 = vld [vmem:[#allocation68_spill] sm:$0xff] }
 0x715   :  { %5225 = vmatprep.subr.bf16.mxu0 %v7986_v33  ;;  %5289 = vmatprep.subr.bf16.mxu1 %v7987_v59  ;;  %v7997_v33 = vld [vmem:[#allocation69_spill] sm:$0xff]  ;;  %v7998_v59 = vld [vmem:[#allocation70_spill] sm:$0xff] }
 0x718   :  { %5227 = vmatpush1.bf16.msra.mxu0 %v7988_v8  ;;  %5291 = vmatpush1.bf16.msra.mxu1 %v7989_v15  ;;  %v7999_v8 = vld [vmem:[#allocation71_spill] sm:$0xff]  ;;  %v8000_v15 = vld [vmem:[#allocation72_spill] sm:$0xff] }
 0x719   :  { %5229 = vmatprep.subr.bf16.mxu0 %v7990_v61  ;;  %5293 = vmatprep.subr.bf16.mxu1 %v7991_v26  ;;  %v8001_v61 = vld [vmem:[#allocation73_spill] sm:$0xff]  ;;  %v8002_v26 = vld [vmem:[#allocation14_spill] sm:$0xff] }
 0x71c   :  { %5231 = vmatpush1.bf16.msra.mxu0 %v7992_v18  ;;  %5295 = vmatpush1.bf16.msra.mxu1 %v7993_v62  ;;  %v8003_v18 = vld [vmem:[#allocation15_spill] sm:$0xff] }
 0x71d   :  { %5233 = vmatprep.subr.bf16.mxu0 %v7994_v0  ;;  %5297 = vmatprep.subr.bf16.mxu1 %v7995_v51 }
 0x720   :  { %5235 = vmatpush1.bf16.msra.mxu0 %v7996_v11  ;;  %5299 = vmatpush1.bf16.msra.mxu1 %v7997_v33 }
 0x721   :  { %5237 = vmatprep.subr.bf16.mxu0 %v7998_v59  ;;  %5301 = vmatprep.subr.bf16.mxu1 %v7999_v8 }
 0x724   :  { %5239 = vmatpush1.bf16.msra.mxu0 %v8000_v15  ;;  %5303 = vmatpush1.bf16.msra.mxu1 %v8001_v61 }
 0x725   :  { %5305 = vmatprep.subr.bf16.mxu0 %v8002_v26  ;;  %5337 = vmatprep.subr.bf16.mxu1 %v8003_v18 }
 0x79a   :  { %v2525_v62 = vpop.f32.mrb[26].mxu0  ;;  %v2596_v0 = vpop.f32.mrb[26].mxu1 }
 0x79b   :  { %v2526_v51 = vadd.f32 %v2525_v62, %v8004_v16  ;;  %v2527_v12 = vpop.f32.mrb[27].mxu0  ;;  %v2598_v11 = vpop.f32.mrb[27].mxu1  ;;  %v2597_v61 = vadd.f32 %v2596_v0, %v7756_v21 }
 0x79c   :  { %v2528_v33 = vadd.f32 %v2527_v12, %v7754_v25  ;;  %v2599_v8 = vadd.f32 %v2598_v11, %v7755_v30 }
 0x79d   :  { %v2601_v2 = vmul.f32 0.5, %v2526_v51  ;;  %v2603_v26 = vmul.f32 0.5, %v2597_v61 }
 0x79e   :  { %v2602_v59 = vmul.f32 0.5, %v2528_v33 }
 0x79f   :  { %5763 = vtanh.f32 %v2601_v2 }
 0x7a0   :  { %5765 = vtanh.f32 %v2602_v59 }
 0x7a1   :  { %5767 = vtanh.f32 %v2599_v8 }
 0x7a2   :  { %5769 = vtanh.f32 %v2603_v26 }
 0x7a9   :  { %v5764_v15 = vpop.eup %5763 }
 0x7aa   :  { %v2607_v18 = vadd.f32 1.0, %v5764_v15  ;;  %v5766_v43 = vpop.eup %5765 }
 0x7ab   :  { %v2608_v62 = vadd.f32 1.0, %v5766_v43  ;;  %v5768_v16 = vpop.eup %5767 }
 0x7ac   :  { %v2610_v22 = vmul.f32 0.5, %v2607_v18  ;;  %v5770_v2 = vpop.eup %5769 }
 0x7ad   :  { %v2611_v3 = vmul.f32 0.5, %v2608_v62  ;;  %v2609_v11 = vadd.f32 1.0, %v5770_v2 }
 0x7ae   :  { %v2615_v6 = vmul.f32 %v5768_v16, %v2610_v22 }
 0x7af   :  { %v2614_v12 = vmul.f32 %v2611_v3, %v6980_v29  ;;  %v2612_v43 = vmul.f32 0.5, %v2609_v11 }
 0x7b1   :  { %v7098_v51 = vadd.f32 %v2615_v6, %v2614_v12 }
 0x7b3   :  { %5771 = vtanh.f32 %v7098_v51 }
 0x7ba   :  { %v2694_v33 = vpop.f32.mrb[12].mxu0  ;;  %v2765_v0 = vpop.f32.mrb[12].mxu1 }
 0x7bb   :  { %v5596_v59 = vadd.f32 %v2694_v33, %v7694_v34  ;;  %v2696_v8 = vpop.f32.mrb[13].mxu0  ;;  %v2767_v15 = vpop.f32.mrb[13].mxu1  ;;  %v5612_v3 = vadd.f32 %v2765_v0, %v6381_v52 }
 0x7bc   :  { %v5597_v61 = vadd.f32 %v2696_v8, %v7695_v28  ;;  %v5613_v29 = vadd.f32 %v2767_v15, %v6374_v41 }
 0x7bd   :  { %v2774_v26 = vmul.f32 0.5, %v5596_v59  ;;  %v5772_v18 = vpop.eup %5771  ;;  %v2776_v16 = vmul.f32 0.5, %v5612_v3  ;;  %v8043_v3 = vld [vmem:[#allocation54_spill] sm:$0xff] }
 0x7be   :  { %v2775_v22 = vmul.f32 0.5, %v5597_v61  ;;  %v7104_v6 = vmul.f32 %v5772_v18, %v2612_v43 }
 0x7bf   :  { %5773 = vtanh.f32 %v2774_v26 }
 0x7c0   :  { %5775 = vtanh.f32 %v2775_v22  ;;  %2856 = vmatprep.mubr.f32.mxu0 %v7104_v6  ;;  %2927 = vmatprep.mubr.f32.mxu1 %v7104_v6 }
 0x7c1   :  { %5777 = vtanh.f32 %v5613_v29 }
 0x7c2   :  { %5779 = vtanh.f32 %v2776_v16  ;;  %v8044_v16 = vld [vmem:[#allocation55_spill] sm:$0xff] }
 0x7c9   :  { %v5774_v62 = vpop.eup %5773 }
 0x7ca   :  { %v2780_v12 = vadd.f32 1.0, %v5774_v62  ;;  %v5776_v2 = vpop.eup %5775  ;;  %v8045_v62 = vld [vmem:[#allocation56_spill] sm:$0xff] }
 0x7cb   :  { %v2781_v33 = vadd.f32 1.0, %v5776_v2  ;;  %v5778_v59 = vpop.eup %5777  ;;  %v8047_v2 = vld [vmem:[#allocation58_spill] sm:$0xff] }
 0x7cc   :  { %v2783_v11 = vmul.f32 0.5, %v2780_v12  ;;  %v5780_v26 = vpop.eup %5779  ;;  %v8046_v12 = vld [vmem:[#allocation57_spill] sm:$0xff] }
 0x7cd   :  { %v2784_v8 = vmul.f32 0.5, %v2781_v33  ;;  %v2782_v18 = vadd.f32 1.0, %v5780_v26  ;;  %v8049_v33 = vld [vmem:[#allocation60_spill] sm:$0xff]  ;;  %v8054_v26 = vld [vmem:[#allocation65_spill] sm:$0xff] }
 0x7ce   :  { %v2788_v15 = vmul.f32 %v5778_v59, %v2783_v11  ;;  %v8048_v11 = vld [vmem:[#allocation59_spill] sm:$0xff]  ;;  %v8050_v59 = vld [vmem:[#allocation61_spill] sm:$0xff] }
 0x7cf   :  { %v2787_v61 = vmul.f32 %v2784_v8, %v6992_v37  ;;  %v2785_v22 = vmul.f32 0.5, %v2782_v18  ;;  %v8042_v37 = vld [vmem:[#allocation53_spill] sm:$0xff]  ;;  %v8051_v8 = vld [vmem:[#allocation62_spill] sm:$0xff] }
 0x7d0   :  { %v8055_v18 = vld [vmem:[#allocation66_spill] sm:$0xff] }
 0x7d1   :  { %v7110_v43 = vadd.f32 %v2788_v15, %v2787_v61  ;;  %v8052_v15 = vld [vmem:[#allocation63_spill] sm:$0xff]  ;;  %v8053_v61 = vld [vmem:[#allocation64_spill] sm:$0xff] }
 0x7d3   :  { %5781 = vtanh.f32 %v7110_v43 }
 0x7dd   :  { %v5782_v0 = vpop.eup %5781 }
 0x7de   :  { %v2791_v29 = vmul.f32 %v5782_v0, %v2785_v22  ;;  %v8056_v22 = vld [vmem:[#allocation67_spill] sm:$0xff]  ;;  %v8057_v0 = vld [vmem:[#allocation68_spill] sm:$0xff] }
 0x7e0   :  { %2857 = vmatmul.mubr.f32.vlgmr.msra.gmra.mrb[28].mxu0 %v2791_v29  ;;  %2928 = vmatmul.mubr.f32.vlgmr.msra.gmra.mrb[28].mxu1 %v2791_v29 }
 0x7e1   :  { %5307 = vmatpush1.bf16.msra.mxu0 %v6012_v35  ;;  %5339 = vmatpush1.bf16.msra.mxu1 %v6015_v38  ;;  %v8005_v35 = vld [vmem:[#allocation16_spill] sm:$0xff]  ;;  %v8006_v38 = vld [vmem:[#allocation17_spill] sm:$0xff] }
 0x7e2   :  { %5309 = vmatprep.subr.bf16.mxu0 %v6018_v42  ;;  %5341 = vmatprep.subr.bf16.mxu1 %v6024_v47  ;;  %v8007_v42 = vld [vmem:[#allocation18_spill] sm:$0xff]  ;;  %v8008_v47 = vld [vmem:[#allocation19_spill] sm:$0xff] }
 0x7e3   :  { %3025 = vmatprep.mubr.f32.mxu0 %v7633_v55  ;;  %3096 = vmatprep.mubr.f32.mxu1 %v7633_v55  ;;  %v8041_v55 = vld [vmem:[#allocation52_spill] sm:$0xff] }
 0x7e5   :  { %5311 = vmatpush1.bf16.msra.mxu0 %v6028_v50  ;;  %5343 = vmatpush1.bf16.msra.mxu1 %v6032_v54  ;;  %v8009_v50 = vld [vmem:[#allocation20_spill] sm:$0xff]  ;;  %v8010_v54 = vld [vmem:[#allocation21_spill] sm:$0xff] }
 0x7e6   :  { %5313 = vmatprep.subr.bf16.mxu0 %v6036_v57  ;;  %5345 = vmatprep.subr.bf16.mxu1 %v6040_v60  ;;  %v8011_v57 = vld [vmem:[#allocation22_spill] sm:$0xff]  ;;  %v8012_v60 = vld [vmem:[#allocation23_spill] sm:$0xff] }
 0x7e9   :  { %5315 = vmatpush1.bf16.msra.mxu0 %v6047_v1  ;;  %5347 = vmatpush1.bf16.msra.mxu1 %v6051_v4  ;;  %v8013_v1 = vld [vmem:[#allocation24_spill] sm:$0xff]  ;;  %v8014_v4 = vld [vmem:[#allocation25_spill] sm:$0xff] }
 0x7ea   :  { %5317 = vmatprep.subr.bf16.mxu0 %v6055_v7  ;;  %5349 = vmatprep.subr.bf16.mxu1 %v6059_v10  ;;  %v8015_v7 = vld [vmem:[#allocation26_spill] sm:$0xff]  ;;  %v8016_v10 = vld [vmem:[#allocation27_spill] sm:$0xff] }
 0x7ed   :  { %5319 = vmatpush1.bf16.msra.mxu0 %v6066_v14  ;;  %5351 = vmatpush1.bf16.msra.mxu1 %v6070_v17  ;;  %v8017_v14 = vld [vmem:[#allocation28_spill] sm:$0xff]  ;;  %v8018_v17 = vld [vmem:[#allocation29_spill] sm:$0xff] }
 0x7ee   :  { %5321 = vmatprep.subr.bf16.mxu0 %v6074_v20  ;;  %5353 = vmatprep.subr.bf16.mxu1 %v6078_v23  ;;  %v8019_v20 = vld [vmem:[#allocation30_spill] sm:$0xff]  ;;  %v8020_v23 = vld [vmem:[#allocation31_spill] sm:$0xff] }
 0x7f1   :  { %5323 = vmatpush1.bf16.msra.mxu0 %v6085_v27  ;;  %5355 = vmatpush1.bf16.msra.mxu1 %v6089_v32  ;;  %v8021_v27 = vld [vmem:[#allocation32_spill] sm:$0xff]  ;;  %v8022_v32 = vld [vmem:[#allocation33_spill] sm:$0xff] }
 0x7f2   :  { %5325 = vmatprep.subr.bf16.mxu0 %v6093_v36  ;;  %5357 = vmatprep.subr.bf16.mxu1 %v6097_v40  ;;  %v8023_v36 = vld [vmem:[#allocation34_spill] sm:$0xff]  ;;  %v8024_v40 = vld [vmem:[#allocation35_spill] sm:$0xff] }
 0x7f5   :  { %5327 = vmatpush1.bf16.msra.mxu0 %v6104_v45  ;;  %5359 = vmatpush1.bf16.msra.mxu1 %v6108_v49  ;;  %v8025_v45 = vld [vmem:[#allocation36_spill] sm:$0xff]  ;;  %v8026_v49 = vld [vmem:[#allocation37_spill] sm:$0xff] }
 0x7f6   :  { %5329 = vmatprep.subr.bf16.mxu0 %v6112_v53  ;;  %5361 = vmatprep.subr.bf16.mxu1 %v6116_v58  ;;  %v8027_v53 = vld [vmem:[#allocation38_spill] sm:$0xff]  ;;  %v8028_v58 = vld [vmem:[#allocation39_spill] sm:$0xff] }
 0x7f9   :  { %5331 = vmatpush1.bf16.msra.mxu0 %v6123_v63  ;;  %5363 = vmatpush1.bf16.msra.mxu1 %v6127_v5  ;;  %v8029_v63 = vld [vmem:[#allocation40_spill] sm:$0xff]  ;;  %v8030_v5 = vld [vmem:[#allocation41_spill] sm:$0xff] }
 0x7fa   :  { %5333 = vmatprep.subr.bf16.mxu0 %v6131_v9  ;;  %5365 = vmatprep.subr.bf16.mxu1 %v6135_v13  ;;  %v8031_v9 = vld [vmem:[#allocation42_spill] sm:$0xff]  ;;  %v8032_v13 = vld [vmem:[#allocation43_spill] sm:$0xff] }
 0x7fd   :  { %5335 = vmatpush1.bf16.msra.mxu0 %v6142_v19  ;;  %5367 = vmatpush1.bf16.msra.mxu1 %v6146_v24  ;;  %v8033_v19 = vld [vmem:[#allocation44_spill] sm:$0xff]  ;;  %v8034_v24 = vld [vmem:[#allocation45_spill] sm:$0xff] }
 0x7fe   :  { %5369 = vmatprep.subr.bf16.mxu0 %v6150_v31  ;;  %5433 = vmatprep.subr.bf16.mxu1 %v6154_v39  ;;  %v8035_v31 = vld [vmem:[#allocation46_spill] sm:$0xff]  ;;  %v8036_v39 = vld [vmem:[#allocation47_spill] sm:$0xff] }
 0x800   :  { %3026 = vmatmul.mubr.f32.vlgmr.msra.gmra.mrb[14].mxu0 %v2791_v29  ;;  %3097 = vmatmul.mubr.f32.vlgmr.msra.gmra.mrb[14].mxu1 %v2791_v29  ;;  %v8058_v29 = vld [vmem:[#allocation69_spill] sm:$0xff] }
 0x801   :  { %5371 = vmatpush1.bf16.msra.mxu0 %v6158_v44  ;;  %5435 = vmatpush1.bf16.msra.mxu1 %v6162_v46  ;;  %v8037_v44 = vld [vmem:[#allocation48_spill] sm:$0xff]  ;;  %v8038_v46 = vld [vmem:[#allocation49_spill] sm:$0xff] }
 0x802   :  { %5373 = vmatprep.subr.bf16.mxu0 %v6164_v48  ;;  %5437 = vmatprep.subr.bf16.mxu1 %v6168_v56  ;;  %v8039_v48 = vld [vmem:[#allocation50_spill] sm:$0xff]  ;;  %v8040_v56 = vld [vmem:[#allocation51_spill] sm:$0xff] }
 0x805   :  { %5375 = vmatpush1.bf16.msra.mxu0 %v8005_v35  ;;  %5439 = vmatpush1.bf16.msra.mxu1 %v8006_v38  ;;  %v8059_v35 = vld [vmem:[#allocation70_spill] sm:$0xff]  ;;  %v8060_v38 = vld [vmem:[#allocation71_spill] sm:$0xff] }
 0x806   :  { %5377 = vmatprep.subr.bf16.mxu0 %v8007_v42  ;;  %5441 = vmatprep.subr.bf16.mxu1 %v8008_v47  ;;  %v8061_v42 = vld [vmem:[#allocation72_spill] sm:$0xff]  ;;  %v8062_v47 = vld [vmem:[#allocation73_spill] sm:$0xff] }
 0x809   :  { %5379 = vmatpush1.bf16.msra.mxu0 %v8009_v50  ;;  %5443 = vmatpush1.bf16.msra.mxu1 %v8010_v54  ;;  %v3299_v50 = vld [vmem:[%s7421_s6] sm:$0xff]  ;;  %v3300_v54 = vld [vmem:[%s7421_s6 + $0x8] sm:$0xff] }
 0x80a   :  { %5381 = vmatprep.subr.bf16.mxu0 %v8011_v57  ;;  %5445 = vmatprep.subr.bf16.mxu1 %v8012_v60  ;;  %v7215_v57 = vpack.c.bf16 %v3300_v54, %v3299_v50  ;;  %v3304_v50 = vld [vmem:[%s7421_s6 + $0x28] sm:$0xff]  ;;  %v8064_v54 = vld [vmem:[#allocation74_spill] sm:$0xff] }
 0x80d   :  { %5383 = vmatpush1.bf16.msra.mxu0 %v8013_v1  ;;  %5447 = vmatpush1.bf16.msra.mxu1 %v8014_v4  ;;  %v8063_v4 = vld [vmem:[#allocation76_spill] sm:$0xff] }
 0x80e   :  { %5385 = vmatprep.subr.bf16.mxu0 %v8015_v7  ;;  %5449 = vmatprep.subr.bf16.mxu1 %v8016_v10 }
 0x811   :  { %5387 = vmatpush1.bf16.msra.mxu0 %v8017_v14  ;;  %5451 = vmatpush1.bf16.msra.mxu1 %v8018_v17 }
 0x812   :  { %5389 = vmatprep.subr.bf16.mxu0 %v8019_v20  ;;  %5453 = vmatprep.subr.bf16.mxu1 %v8020_v23 }
 0x815   :  { %5391 = vmatpush1.bf16.msra.mxu0 %v8021_v27  ;;  %5455 = vmatpush1.bf16.msra.mxu1 %v8022_v32 }
 0x816   :  { %5393 = vmatprep.subr.bf16.mxu0 %v8023_v36  ;;  %5457 = vmatprep.subr.bf16.mxu1 %v8024_v40 }
 0x819   :  { %5395 = vmatpush1.bf16.msra.mxu0 %v8025_v45  ;;  %5459 = vmatpush1.bf16.msra.mxu1 %v8026_v49 }
 0x81a   :  { %5397 = vmatprep.subr.bf16.mxu0 %v8027_v53  ;;  %5461 = vmatprep.subr.bf16.mxu1 %v8028_v58 }
 0x81d   :  { %5399 = vmatpush1.bf16.msra.mxu0 %v8029_v63  ;;  %5463 = vmatpush1.bf16.msra.mxu1 %v8030_v5 }
 0x81e   :  { %5401 = vmatprep.subr.bf16.mxu0 %v8031_v9  ;;  %5465 = vmatprep.subr.bf16.mxu1 %v8032_v13 }
 0x821   :  { %5403 = vmatpush1.bf16.msra.mxu0 %v8033_v19  ;;  %5467 = vmatpush1.bf16.msra.mxu1 %v8034_v24 }
 0x822   :  { %5405 = vmatprep.subr.bf16.mxu0 %v8035_v31  ;;  %5469 = vmatprep.subr.bf16.mxu1 %v8036_v39 }
 0x825   :  { %5407 = vmatpush1.bf16.msra.mxu0 %v8037_v44  ;;  %5471 = vmatpush1.bf16.msra.mxu1 %v8038_v46 }
 0x826   :  { %5409 = vmatprep.subr.bf16.mxu0 %v8039_v48  ;;  %5473 = vmatprep.subr.bf16.mxu1 %v8040_v56 }
 0x829   :  { %5411 = vmatpush1.bf16.msra.mxu0 %v8041_v55  ;;  %5475 = vmatpush1.bf16.msra.mxu1 %v8042_v37 }
 0x82a   :  { %5413 = vmatprep.subr.bf16.mxu0 %v8043_v3  ;;  %5477 = vmatprep.subr.bf16.mxu1 %v8044_v16 }
 0x82d   :  { %5415 = vmatpush1.bf16.msra.mxu0 %v8045_v62  ;;  %5479 = vmatpush1.bf16.msra.mxu1 %v8046_v12 }
 0x82e   :  { %5417 = vmatprep.subr.bf16.mxu0 %v8047_v2  ;;  %5481 = vmatprep.subr.bf16.mxu1 %v8048_v11 }
 0x831   :  { %5419 = vmatpush1.bf16.msra.mxu0 %v8049_v33  ;;  %5483 = vmatpush1.bf16.msra.mxu1 %v8050_v59 }
 0x832   :  { %5421 = vmatprep.subr.bf16.mxu0 %v8051_v8  ;;  %5485 = vmatprep.subr.bf16.mxu1 %v8052_v15 }
 0x835   :  { %5423 = vmatpush1.bf16.msra.mxu0 %v8053_v61  ;;  %5487 = vmatpush1.bf16.msra.mxu1 %v8054_v26 }
 0x836   :  { %5425 = vmatprep.subr.bf16.mxu0 %v8055_v18  ;;  %5489 = vmatprep.subr.bf16.mxu1 %v8056_v22 }
 0x839   :  { %5427 = vmatpush1.bf16.msra.mxu0 %v8057_v0  ;;  %5491 = vmatpush1.bf16.msra.mxu1 %v8058_v29  ;;  %v3302_v29 = vld [vmem:[%s7421_s6 + $0x18] sm:$0xff] }
 0x83a   :  { %5429 = vmatprep.subr.bf16.mxu0 %v8059_v35  ;;  %5493 = vmatprep.subr.bf16.mxu1 %v8060_v38 }
 0x83d   :  { %5431 = vmatpush1.bf16.msra.mxu0 %v8061_v42  ;;  %5495 = vmatpush1.bf16.msra.mxu1 %v8062_v47 }
 0x83e   :  { %5497 = vmatprep.subr.bf16.mxu0 %v7215_v57 }
 0x8b3   :  { %v2858_v60 = vpop.f32.mrb[28].mxu0  ;;  %v2929_v1 = vpop.f32.mrb[28].mxu1 }
 0x8b4   :  { %v2859_v7 = vadd.f32 %v2858_v60, %v8063_v4  ;;  %v2860_v10 = vpop.f32.mrb[29].mxu0  ;;  %v2931_v14 = vpop.f32.mrb[29].mxu1  ;;  %v2930_v32 = vadd.f32 %v2929_v1, %v7756_v21  ;;  %v3305_v1 = vld [vmem:[%s7421_s6 + $0x30] sm:$0xff] }
 0x8b5   :  { %v2861_v17 = vadd.f32 %v2860_v10, %v7754_v25  ;;  %v2932_v27 = vadd.f32 %v2931_v14, %v7755_v30  ;;  %v3307_v14 = vld [vmem:[%s7421_s6 + $0x40] sm:$0xff] }
 0x8b6   :  { %v2934_v20 = vmul.f32 0.5, %v2859_v7  ;;  %v2936_v36 = vmul.f32 0.5, %v2930_v32  ;;  %v3306_v7 = vld [vmem:[%s7421_s6 + $0x38] sm:$0xff]  ;;  %v3311_v32 = vld [vmem:[%s7421_s6 + $0x60] sm:$0xff] }
 0x8b7   :  { %v2935_v23 = vmul.f32 0.5, %v2861_v17  ;;  %v5508_v10 = vpack.c.bf16 %v3306_v7, %v3305_v1 }
 0x8b8   :  { %5783 = vtanh.f32 %v2934_v20  ;;  %v3309_v20 = vld [vmem:[%s7421_s6 + $0x50] sm:$0xff] }
 0x8b9   :  { %5785 = vtanh.f32 %v2935_v23  ;;  %v3310_v23 = vld [vmem:[%s7421_s6 + $0x58] sm:$0xff] }
 0x8ba   :  { %5787 = vtanh.f32 %v2932_v27  ;;  %v5516_v27 = vpack.c.bf16 %v3310_v23, %v3309_v20 }
 0x8bb   :  { %5789 = vtanh.f32 %v2936_v36  ;;  %v3312_v36 = vld [vmem:[%s7421_s6 + $0x68] sm:$0xff] }
 0x8c2   :  { %v5784_v40 = vpop.eup %5783 }
 0x8c3   :  { %v2940_v45 = vadd.f32 1.0, %v5784_v40  ;;  %v5786_v49 = vpop.eup %5785  ;;  %v5520_v40 = vpack.c.bf16 %v3312_v36, %v3311_v32 }
 0x8c4   :  { %v2941_v58 = vadd.f32 1.0, %v5786_v49  ;;  %v5788_v63 = vpop.eup %5787  ;;  %v3314_v49 = vld [vmem:[%s7421_s6 + $0x78] sm:$0xff] }
 0x8c5   :  { %v2943_v53 = vmul.f32 0.5, %v2940_v45  ;;  %v5790_v24 = vpop.eup %5789  ;;  %v3313_v45 = vld [vmem:[%s7421_s6 + $0x70] sm:$0xff] }
 0x8c6   :  { %v2944_v5 = vmul.f32 0.5, %v2941_v58  ;;  %v2942_v31 = vadd.f32 1.0, %v5790_v24  ;;  %v8065_v58 = vld [vmem:[#allocation75_spill] sm:$0xff] }
 0x8c7   :  { %v2948_v9 = vmul.f32 %v5788_v63, %v2943_v53  ;;  %v5524_v53 = vpack.c.bf16 %v3314_v49, %v3313_v45  ;;  %v8066_v63 = vld [vmem:[#allocation77_spill] sm:$0xff]  ;;  %v3436_v24 = vld [vmem:[%s7423_s8 + $0x8] sm:$0xff] }
 0x8c8   :  { %v2947_v13 = vmul.f32 %v2944_v5, %v7098_v51  ;;  %v2945_v37 = vmul.f32 0.5, %v2942_v31  ;;  %v8067_v5 = vld [vmem:[#allocation78_spill] sm:$0xff] }
 0x8ca   :  { %v7223_v19 = vadd.f32 %v2948_v9, %v2947_v13  ;;  %v8068_v9 = vld [vmem:[#allocation79_spill] sm:$0xff]  ;;  %v3435_v13 = vld [vmem:[%s7423_s8] sm:$0xff] }
 0x8cb   :  { %v5528_v31 = vpack.c.bf16 %v3436_v24, %v3435_v13 }
 0x8cc   :  { %5791 = vtanh.f32 %v7223_v19 }
 0x8cd   :  { %5529 = vmatprep.subr.bf16.mxu1 %v5528_v31 }
 0x8d3   :  { %v3027_v39 = vpop.f32.mrb[14].mxu0  ;;  %v3098_v44 = vpop.f32.mrb[14].mxu1 }
 0x8d4   :  { %v5598_v46 = vadd.f32 %v3027_v39, %v7694_v34  ;;  %v3029_v48 = vpop.f32.mrb[15].mxu0  ;;  %v3100_v56 = vpop.f32.mrb[15].mxu1  ;;  %v5614_v34 = vadd.f32 %v3098_v44, %v6381_v52  ;;  %v3301_v52 = vld [vmem:[%s7421_s6 + $0x10] sm:$0xff] }
 0x8d5   :  { %v5599_v55 = vadd.f32 %v3029_v48, %v7695_v28  ;;  %v5615_v51 = vadd.f32 %v3100_v56, %v6374_v41  ;;  %v5500_v47 = vpack.c.bf16 %v3302_v29, %v3301_v52  ;;  %v3437_v39 = vld [vmem:[%s7423_s8 + $0x10] sm:$0xff]  ;;  %v3440_v48 = vld [vmem:[%s7423_s8 + $0x28] sm:$0xff]  ;;  %v3575_v52 = vld [vmem:[%s7425_s10 + $0x20] sm:$0xff] }
 0x8d6   :  { %v3107_v3 = vmul.f32 0.5, %v5598_v46  ;;  %v5792_v16 = vpop.eup %5791  ;;  %v3109_v2 = vmul.f32 0.5, %v5614_v34  ;;  %v3439_v46 = vld [vmem:[%s7423_s8 + $0x20] sm:$0xff]  ;;  %v3446_v34 = vld [vmem:[%s7423_s8 + $0x58] sm:$0xff]  ;;  %v3576_v29 = vld [vmem:[%s7425_s10 + $0x28] sm:$0xff] }
 0x8d7   :  { %v3108_v62 = vmul.f32 0.5, %v5599_v55  ;;  %v7229_v12 = vmul.f32 %v5792_v16, %v2945_v37  ;;  %v5536_v56 = vpack.c.bf16 %v3440_v48, %v3439_v46  ;;  %v3441_v55 = vld [vmem:[%s7423_s8 + $0x30] sm:$0xff]  ;;  %v3442_v37 = vld [vmem:[%s7423_s8 + $0x38] sm:$0xff]  ;;  %v3443_v16 = vld [vmem:[%s7423_s8 + $0x40] sm:$0xff] }
 0x8d8   :  { %5793 = vtanh.f32 %v3107_v3  ;;  %v5540_v3 = vpack.c.bf16 %v3442_v37, %v3441_v55 }
 0x8d9   :  { %5795 = vtanh.f32 %v3108_v62  ;;  %3189 = vmatprep.mubr.f32.mxu0 %v7229_v12  ;;  %3260 = vmatprep.mubr.f32.mxu1 %v7229_v12  ;;  %v3444_v62 = vld [vmem:[%s7423_s8 + $0x48] sm:$0xff] }
 0x8da   :  { %5797 = vtanh.f32 %v5615_v51  ;;  %v5544_v51 = vpack.c.bf16 %v3444_v62, %v3443_v16 }
 0x8db   :  { %5799 = vtanh.f32 %v3109_v2 }
 0x8e2   :  { %v5794_v11 = vpop.eup %5793 }
 0x8e3   :  { %v3113_v28 = vadd.f32 1.0, %v5794_v11  ;;  %v5796_v33 = vpop.eup %5795  ;;  %v3447_v11 = vld [vmem:[%s7423_s8 + $0x60] sm:$0xff] }
 0x8e4   :  { %v3114_v8 = vadd.f32 1.0, %v5796_v33  ;;  %v5798_v15 = vpop.eup %5797 }
 0x8e5   :  { %v3116_v59 = vmul.f32 0.5, %v3113_v28  ;;  %v5800_v22 = vpop.eup %5799  ;;  %v3448_v28 = vld [vmem:[%s7423_s8 + $0x68] sm:$0xff] }
 0x8e6   :  { %v3117_v61 = vmul.f32 0.5, %v3114_v8  ;;  %v3115_v0 = vadd.f32 1.0, %v5800_v22  ;;  %v5552_v33 = vpack.c.bf16 %v3448_v28, %v3447_v11  ;;  %v3450_v8 = vld [vmem:[%s7423_s8 + $0x78] sm:$0xff] }
 0x8e7   :  { %v3121_v41 = vmul.f32 %v5798_v15, %v3116_v59  ;;  %v3449_v59 = vld [vmem:[%s7423_s8 + $0x70] sm:$0xff]  ;;  %v3574_v22 = vld [vmem:[%s7425_s10 + $0x18] sm:$0xff] }
 0x8e8   :  { %v3120_v26 = vmul.f32 %v3117_v61, %v7110_v43  ;;  %v3118_v35 = vmul.f32 0.5, %v3115_v0  ;;  %v3303_v43 = vld [vmem:[%s7421_s6 + $0x20] sm:$0xff]  ;;  %v5556_v15 = vpack.c.bf16 %v3450_v8, %v3449_v59 }
 0x8e9   :  { %v5504_v60 = vpack.c.bf16 %v3304_v50, %v3303_v43  ;;  %v3571_v61 = vld [vmem:[%s7425_s10] sm:$0xff] }
 0x8ea   :  { %v3122_v18 = vadd.f32 %v3121_v41, %v3120_v26  ;;  %v3572_v41 = vld [vmem:[%s7425_s10 + $0x8] sm:$0xff]  ;;  %v3573_v26 = vld [vmem:[%s7425_s10 + $0x10] sm:$0xff] }
 0x8eb   :  { %v7345_v0 = vpack.c.bf16 %v3574_v22, %v3573_v26 }
 0x8ec   :  { %5801 = vtanh.f32 %v3122_v18  ;;  %v5560_v18 = vpack.c.bf16 %v3572_v41, %v3571_v61 }
 0x8f6   :  { %v5802_v38 = vpop.eup %5801 }
 0x8f7   :  { %v3124_v42 = vmul.f32 %v5802_v38, %v3118_v35  ;;  %v7354_v35 = vpack.c.bf16 %v3576_v29, %v3575_v52 }
 0x8f9   :  { %3190 = vmatmul.mubr.f32.vlgmr.msra.gmra.mrb[30].mxu0 %v3124_v42  ;;  %3261 = vmatmul.mubr.f32.vlgmr.msra.gmra.mrb[30].mxu1 %v3124_v42 }
 0x8fa   :  { %5499 = vmatpush3.bf16.msra.mxu0 %v7215_v57  ;;  %3860 = vmatprep.mubr.f32.mxu0 %v8064_v54  ;;  %v3308_v57 = vld [vmem:[%s7421_s6 + $0x48] sm:$0xff] }
 0x8fb   :  { %5501 = vmatprep.subr.bf16.mxu0 %v5500_v47  ;;  %v5512_v17 = vpack.c.bf16 %v3308_v57, %v3307_v14  ;;  %5531 = vmatpush3.bf16.msra.mxu1 %v5528_v31 }
 0x8fe   :  { %5503 = vmatpush3.bf16.msra.mxu0 %v5500_v47 }
 0x8ff   :  { %5505 = vmatprep.subr.bf16.mxu0 %v5504_v60 }
 0x902   :  { %5507 = vmatpush3.bf16.msra.mxu0 %v5504_v60 }
 0x903   :  { %5509 = vmatprep.subr.bf16.mxu0 %v5508_v10 }
 0x906   :  { %5511 = vmatpush3.bf16.msra.mxu0 %v5508_v10 }
 0x907   :  { %5513 = vmatprep.subr.bf16.mxu0 %v5512_v17 }
 0x90a   :  { %5515 = vmatpush3.bf16.msra.mxu0 %v5512_v17 }
 0x90b   :  { %5517 = vmatprep.subr.bf16.mxu0 %v5516_v27 }
 0x90e   :  { %5519 = vmatpush3.bf16.msra.mxu0 %v5516_v27 }
 0x90f   :  { %5521 = vmatprep.subr.bf16.mxu0 %v5520_v40 }
 0x912   :  { %5523 = vmatpush3.bf16.msra.mxu0 %v5520_v40 }
 0x913   :  { %5525 = vmatprep.subr.bf16.mxu0 %v5524_v53 }
 0x916   :  { %5527 = vmatpush3.bf16.msra.mxu0 %v5524_v53 }
 0x917   :  { %5561 = vmatprep.subr.bf16.mxu0 %v5560_v18 }
 0x919   :  { %3861 = vmatmul.mubr.f32.vlgmr.msra.gmra.mrb[32].mxu0 %v8065_v58 }
 0x91a   :  { %3863 = vmatprep.mubr.f32.mxu0 %v8066_v63  ;;  %5563 = vmatpush3.bf16.msra.mxu0 %v5560_v18 }
 0x91b   :  { %5565 = vmatprep.subr.bf16.mxu0 %v7345_v0 }
 0x91d   :  { %3864 = vmatmul.mubr.f32.gmra.mrb[34].mxu0 %v8067_v5 }
 0x91e   :  { %3866 = vmatprep.mubr.f32.mxu0 %v8068_v9  ;;  %5567 = vmatpush3.bf16.msra.mxu0 %v7345_v0 }
 0x91f   :  { %5569 = vmatprep.subr.bf16.mxu0 %v7354_v35 }
 0x921   :  { %3867 = vmatmul.mubr.f32.gmra.mrb[36].mxu0 %v7104_v6  ;;  %v3438_v6 = vld [vmem:[%s7423_s8 + $0x18] sm:$0xff] }
 0x922   :  { %3869 = vmatprep.mubr.f32.mxu0 %v7229_v12  ;;  %v5532_v44 = vpack.c.bf16 %v3438_v6, %v3437_v39  ;;  %v3445_v12 = vld [vmem:[%s7423_s8 + $0x50] sm:$0xff]  ;;  %5571 = vmatpush3.bf16.msra.mxu0 %v7354_v35 }
 0x923   :  { %v5548_v2 = vpack.c.bf16 %v3446_v34, %v3445_v12  ;;  %v3578_v12 = vld [vmem:[%s7425_s10 + $0x38] sm:$0xff] }
 0x924   :  { %5533 = vmatprep.subr.bf16.mxu1 %v5532_v44 }
 0x925   :  { %5535 = vmatpush3.bf16.msra.mxu1 %v5532_v44 }
 0x926   :  { %5537 = vmatprep.subr.bf16.mxu1 %v5536_v56 }
 0x929   :  { %5539 = vmatpush3.bf16.msra.mxu1 %v5536_v56 }
 0x92a   :  { %5541 = vmatprep.subr.bf16.mxu1 %v5540_v3 }
 0x92d   :  { %5543 = vmatpush3.bf16.msra.mxu1 %v5540_v3 }
 0x92e   :  { %5545 = vmatprep.subr.bf16.mxu1 %v5544_v51 }
 0x931   :  { %5547 = vmatpush3.bf16.msra.mxu1 %v5544_v51  ;;  %v3577_v51 = vld [vmem:[%s7425_s10 + $0x30] sm:$0xff] }
 0x932   :  { %5549 = vmatprep.subr.bf16.mxu1 %v5548_v2  ;;  %v5572_v34 = vpack.c.bf16 %v3578_v12, %v3577_v51 }
 0x934   :  { %5573 = vmatprep.subr.bf16.mxu0 %v5572_v34 }
 0x935   :  { %5551 = vmatpush3.bf16.msra.mxu1 %v5548_v2  ;;  %5575 = vmatpush3.bf16.msra.mxu0 %v5572_v34  ;;  %v3754_v2 = vld [vmem:[%s7424_s9] ss:$0 sm:$0xff] }
 0x936   :  { %5553 = vmatprep.subr.bf16.mxu1 %v5552_v33 }
 0x939   :  { %5555 = vmatpush3.bf16.msra.mxu1 %v5552_v33 }
 0x93a   :  { %5557 = vmatprep.subr.bf16.mxu1 %v5556_v15 }
 0x93d   :  { %5559 = vmatpush3.bf16.msra.mxu1 %v5556_v15 }
 0x93e   :  { %5576 = vmatprep.subr.bf16.mxu1 %v5560_v18 }
 0x9cc   :  { %v3191_v38 = vpop.f32.mrb[30].mxu0  ;;  %v3262_v42 = vpop.f32.mrb[30].mxu1 }
 0x9cd   :  { %v3192_v47 = vadd.f32 %v3191_v38, %v8063_v4  ;;  %v3193_v43 = vpop.f32.mrb[31].mxu0  ;;  %v3264_v50 = vpop.f32.mrb[31].mxu1  ;;  %v3263_v10 = vadd.f32 %v3262_v42, %v7756_v21 }
 0x9ce   :  { %v3194_v54 = vadd.f32 %v3193_v43, %v7754_v25  ;;  %v3265_v7 = vadd.f32 %v3264_v50, %v7755_v30  ;;  %v3753_v30 = vld [vmem:[%s7422_s7] ss:$0 sm:$0xff] }
 0x9cf   :  { %v3267_v60 = vmul.f32 0.5, %v3192_v47  ;;  %v3269_v14 = vmul.f32 0.5, %v3263_v10  ;;  %v3755_v10 = vld [vmem:[%s7426_s11] ss:$0 sm:$0xff] }
 0x9d0   :  { %v3268_v1 = vmul.f32 0.5, %v3194_v54 }
 0x9d1   :  { %5803 = vtanh.f32 %v3267_v60 }
 0x9d2   :  { %5805 = vtanh.f32 %v3268_v1 }
 0x9d3   :  { %5807 = vtanh.f32 %v3265_v7 }
 0x9d4   :  { %5809 = vtanh.f32 %v3269_v14 }
 0x9db   :  { %v5804_v57 = vpop.eup %5803 }
 0x9dc   :  { %v3273_v17 = vadd.f32 1.0, %v5804_v57  ;;  %v5806_v20 = vpop.eup %5805 }
 0x9dd   :  { %v3274_v4 = vadd.f32 1.0, %v5806_v20  ;;  %v5808_v27 = vpop.eup %5807 }
 0x9de   :  { %v3276_v23 = vmul.f32 0.5, %v3273_v17  ;;  %v5810_v45 = vpop.eup %5809 }
 0x9df   :  { %v3277_v32 = vmul.f32 0.5, %v3274_v4  ;;  %v3275_v21 = vadd.f32 1.0, %v5810_v45 }
 0x9e0   :  { %v3281_v36 = vmul.f32 %v5808_v27, %v3276_v23 }
 0x9e1   :  { %v3280_v25 = vmul.f32 %v3277_v32, %v7223_v19  ;;  %v3278_v5 = vmul.f32 0.5, %v3275_v21 }
 0x9e3   :  { %v3282_v40 = vadd.f32 %v3281_v36, %v3280_v25 }
 0x9e5   :  { %5811 = vtanh.f32 %v3282_v40 }
 0x9ec   :  { %v3862_v49 = vpop.f32.mrb[32].mxu0 }
 0x9ed   :  { %v3394_v53 = vadd.f32 %v3862_v49, %v3753_v30  ;;  %v3388_v58 = vpop.f32.mrb[33].mxu0 }
 0x9ee   :  { %v3389_v63 = vadd.f32 %v3753_v30, %v3388_v58 }
 0x9ef   :  { %v5812_v9 = vpop.eup %5811  ;;  %v3428_v31 = vmax.f32 %v3394_v53, 0.0 }
 0x9f0   :  { %v3427_v13 = vmax.f32 %v3389_v63, 0.0  ;;  %v3865_v24 = vpop.f32.mrb[34].mxu0  ;;  %v3284_v19 = vmul.f32 %v5812_v9, %v3278_v5 }
 0x9f1   :  { %v3404_v39 = vadd.f32 %v3865_v24, %v3753_v30  ;;  %v3398_v6 = vpop.f32.mrb[35].mxu0 }
 0x9f2   :  { %v3399_v44 = vadd.f32 %v3753_v30, %v3398_v6  ;;  %3904 = vmatprep.mubr.f32.mxu1 %v3427_v13  ;;  %3870 = vmatmul.mubr.f32.gmra.mrb[38].mxu0 %v3284_v19 }
 0x9f3   :  { %3905 = vmatmul.mubr.f32.vlgmr.msra.gmra.mrb[32].mxu1 %v3428_v31  ;;  %v3430_v56 = vmax.f32 %v3404_v39, 0.0 }
 0x9f4   :  { %v3429_v46 = vmax.f32 %v3399_v44, 0.0  ;;  %v3868_v48 = vpop.f32.mrb[36].mxu0  ;;  %5580 = vmatpush3.bf16.msra.mxu1 %v5560_v18 }
 0x9f5   :  { %v3414_v55 = vadd.f32 %v3868_v48, %v3753_v30  ;;  %v3408_v37 = vpop.f32.mrb[37].mxu0  ;;  %5577 = vmatprep.subr.bf16.mxu1 %v7345_v0 }
 0x9f6   :  { %v3409_v3 = vadd.f32 %v3753_v30, %v3408_v37  ;;  %3907 = vmatprep.mubr.f32.mxu1 %v3429_v46 }
 0x9f7   :  { %3908 = vmatmul.mubr.f32.gmra.mrb[34].mxu1 %v3430_v56  ;;  %v3432_v62 = vmax.f32 %v3414_v55, 0.0 }
 0x9f8   :  { %v3431_v16 = vmax.f32 %v3409_v3, 0.0  ;;  %5581 = vmatpush3.bf16.msra.mxu1 %v7345_v0 }
 0x9f9   :  { %5578 = vmatprep.subr.bf16.mxu1 %v7354_v35 }
 0x9fa   :  { %3910 = vmatprep.mubr.f32.mxu1 %v3431_v16 }
 0x9fb   :  { %3911 = vmatmul.mubr.f32.gmra.mrb[36].mxu1 %v3432_v62 }
 0x9fc   :  { %5582 = vmatpush3.bf16.msra.mxu1 %v7354_v35 }
 0x9fd   :  { %5579 = vmatprep.subr.bf16.mxu1 %v5572_v34 }
 0xa00   :  { %5583 = vmatpush3.bf16.msra.mxu1 %v5572_v34 }
 0xac5   :  { %v3871_v11 = vpop.f32.mrb[38].mxu0 }
 0xac6   :  { %v3906_v28 = vpop.f32.mrb[32].mxu1  ;;  %v3424_v33 = vadd.f32 %v3871_v11, %v3753_v30  ;;  %v3418_v8 = vpop.f32.mrb[39].mxu0 }
 0xac7   :  { %v3530_v59 = vadd.f32 %v3906_v28, %v3754_v2  ;;  %v3524_v15 = vpop.f32.mrb[33].mxu1  ;;  %v3419_v61 = vadd.f32 %v3753_v30, %v3418_v8 }
 0xac8   :  { %v3525_v41 = vadd.f32 %v3754_v2, %v3524_v15  ;;  %v3434_v0 = vmax.f32 %v3424_v33, 0.0 }
 0xac9   :  { %v3433_v26 = vmax.f32 %v3419_v61, 0.0  ;;  %v3564_v52 = vmax.f32 %v3530_v59, 0.0 }
 0xaca   :  { %v3563_v18 = vmax.f32 %v3525_v41, 0.0  ;;  %v3909_v22 = vpop.f32.mrb[34].mxu1 }
 0xacb   :  { %v3540_v29 = vadd.f32 %v3909_v22, %v3754_v2  ;;  %v3534_v35 = vpop.f32.mrb[35].mxu1  ;;  %3913 = vmatprep.mubr.f32.mxu1 %v3433_v26 }
 0xacc   :  { %v3535_v38 = vadd.f32 %v3754_v2, %v3534_v35  ;;  %3932 = vmatprep.mubr.msk.f32.mxu0 %vm3586_vm1, %v3563_v18  ;;  %3914 = vmatmul.mubr.f32.gmra.mrb[38].mxu1 %v3434_v0 }
 0xacd   :  { %3933 = vmatmul.mubr.msk.f32.vlgmr.msra.gmra.mrb[40].mxu0 %vm3586_vm1, %v3564_v52  ;;  %v3566_v43 = vmax.f32 %v3540_v29, 0.0 }
 0xace   :  { %v3565_v42 = vmax.f32 %v3535_v38, 0.0  ;;  %v3912_v47 = vpop.f32.mrb[36].mxu1 }
 0xacf   :  { %v3550_v50 = vadd.f32 %v3912_v47, %v3754_v2  ;;  %v3544_v54 = vpop.f32.mrb[37].mxu1 }
 0xad0   :  { %v3545_v60 = vadd.f32 %v3754_v2, %v3544_v54  ;;  %3935 = vmatprep.mubr.msk.f32.mxu0 %vm3586_vm1, %v3565_v42 }
 0xad1   :  { %3936 = vmatmul.mubr.msk.f32.gmra.mrb[42].mxu0 %vm3586_vm1, %v3566_v43  ;;  %v3568_v7 = vmax.f32 %v3550_v50, 0.0 }
 0xad2   :  { %v3567_v1 = vmax.f32 %v3545_v60, 0.0 }
 0xad4   :  { %3938 = vmatprep.mubr.msk.f32.mxu1 %vm3586_vm1, %v3567_v1 }
 0xad5   :  { %3939 = vmatmul.mubr.msk.f32.vlgmr.msra.gmra.mrb[40].mxu1 %vm3586_vm1, %v3568_v7 }
 0xb9f   :  { %v3915_v14 = vpop.f32.mrb[38].mxu1 }
 0xba0   :  { %v3934_v57 = vpop.f32.mrb[40].mxu0  ;;  %v3560_v17 = vadd.f32 %v3915_v14, %v3754_v2  ;;  %v3554_v23 = vpop.f32.mrb[39].mxu1 }
 0xba1   :  { %v3683_v20 = vadd.f32 %v3934_v57, %v3755_v10  ;;  %v3677_v4 = vpop.f32.mrb[41].mxu0  ;;  %v3555_v27 = vadd.f32 %v3754_v2, %v3554_v23 }
 0xba2   :  { %v3678_v32 = vadd.f32 %v3755_v10, %v3677_v4  ;;  %v3570_v40 = vmax.f32 %v3560_v17, 0.0 }
 0xba3   :  { %3717 = vst [vmem:[%s7427_s12 + $0x8] sm:$0xff] %v3683_v20  ;;  %v3569_v36 = vmax.f32 %v3555_v27, 0.0 }
 0xba4   :  { %3716 = vst [vmem:[%s7427_s12] sm:$0xff] %v3678_v32  ;;  %v3937_v25 = vpop.f32.mrb[42].mxu0 }
 0xba5   :  { %v3693_v45 = vadd.f32 %v3937_v25, %v3755_v10  ;;  %v3687_v30 = vpop.f32.mrb[43].mxu0  ;;  %3941 = vmatprep.mubr.msk.f32.mxu1 %vm3586_vm1, %v3569_v36 }
 0xba6   :  { %v3688_v21 = vadd.f32 %v3755_v10, %v3687_v30  ;;  %3942 = vmatmul.mubr.msk.f32.gmra.mrb[42].mxu1 %vm3586_vm1, %v3570_v40 }
 0xba7   :  { %3719 = vst [vmem:[%s7427_s12 + $0x18] sm:$0xff] %v3693_v45 }
 0xba8   :  { %3718 = vst [vmem:[%s7427_s12 + $0x10] sm:$0xff] %v3688_v21  ;;  %v3940_v49 = vpop.f32.mrb[40].mxu1 }
 0xba9   :  { %v3703_v53 = vadd.f32 %v3940_v49, %v3755_v10  ;;  %v3697_v58 = vpop.f32.mrb[41].mxu1 }
 0xbaa   :  { %v3698_v63 = vadd.f32 %v3755_v10, %v3697_v58 }
 0xbab   :  { %3721 = vst [vmem:[%s7427_s12 + $0x28] sm:$0xff] %v3703_v53 }
 0xbac   :  { %3720 = vst [vmem:[%s7427_s12 + $0x20] sm:$0xff] %v3698_v63 }
 0xc79   :  { %v3943_v5 = vpop.f32.mrb[42].mxu1 }
 0xc7a   :  { %v3713_v9 = vadd.f32 %v3943_v5, %v3755_v10  ;;  %v3707_v13 = vpop.f32.mrb[43].mxu1 }
 0xc7b   :  { %v3708_v24 = vadd.f32 %v3755_v10, %v3707_v13 }
 0xc7c   :  { %3723 = vst [vmem:[%s7427_s12 + $0x38] sm:$0xff] %v3713_v9 }
 0xc7d   :  { %3722 = vst [vmem:[%s7427_s12 + $0x30] sm:$0xff] %v3708_v24 }
 0xc7e   :  { %3728 = vsyncpa [#allocation9], 1 }
 0xc7f   :  { %3729 = vsyncpa [#allocation11], 1 }

</bundles_post_ra>
